<compile_context>
chip_gen: v7x
topology: tpu7x:2x2x1
jax: 0.10.0
libtpu: 0.0.40
codegen_flags: <defaults>
</compile_context>

<pallas_src>
import jax
import jax.numpy as jnp
from jax import lax
from jax.experimental import pallas as pl
from jax.experimental.pallas import tpu as pltpu

IN_FEATURES = 196608
OUT_FEATURES = 10


def linear_kernel(x_ref, w_ref, o_ref, acc_ref):
    k = pl.program_id(1)

    @pl.when(k == 0)
    def _init():
        acc_ref[...] = jnp.zeros_like(acc_ref)

    # Partial x @ W.T over this K tile, accumulated in f32 on the MXU.
    # x_ref: (B, tk), w_ref: (N, tk)  -> contract dim 1 with dim 1 -> (B, N)
    acc_ref[...] += lax.dot_general(
        x_ref[...],
        w_ref[...],
        (((1,), (1,)), ((), ())),
        preferred_element_type=jnp.float32,
    )

    @pl.when(k == pl.num_programs(1) - 1)
    def _finalize():
        o_ref[...] = acc_ref[...].reshape(o_ref.shape)


def pallas_linear(x, weight, bias, *, num_splits=2, tk=49152):
    """y = x @ weight.T + bias, like torch.nn.Linear.

    x:      (B, K)   float32
    weight: (N, K)   float32   (native PyTorch layout, no transpose)
    bias:   (N,)     float32
    """
    B, K = x.shape
    N, K2 = weight.shape
    assert K == K2
    assert K % num_splits == 0
    k_half = K // num_splits
    assert k_half % tk == 0
    nk = k_half // tk  # inner reduction steps per K-half

    partial = pl.pallas_call(
        linear_kernel,
        out_shape=jax.ShapeDtypeStruct((num_splits, B, N), jnp.float32),
        grid_spec=pltpu.PrefetchScalarGridSpec(
            num_scalar_prefetch=0,
            grid=(num_splits, nk),
            in_specs=[
                # x tile: (B, tk), lane-dense along K
                pl.BlockSpec((B, tk), lambda c, k: (0, c * nk + k)),
                # weight tile in native (N, K) layout: (10, tk), lane-dense
                pl.BlockSpec((N, tk), lambda c, k: (0, c * nk + k)),
            ],
            # each K-half writes its own partial (B, N) slab
            out_specs=pl.BlockSpec((1, B, N), lambda c, k: (c, 0, 0)),
            scratch_shapes=[pltpu.VMEM((B, N), jnp.float32)],
        ),
        compiler_params=pltpu.CompilerParams(
            dimension_semantics=("parallel", "arbitrary"),
            vmem_limit_bytes=32 * 1024 * 1024,
        ),
        cost_estimate=pl.CostEstimate(
            flops=2 * B * K * N,
            bytes_accessed=(B * K + N * K + B * N) * 4,
            transcendentals=0,
        ),
    )(x, weight)

    # Tiny cross-core reduction + bias add in plain JAX (40 bytes of bias).
    y = partial.sum(axis=0) + bias.reshape(1, N)
    return y.astype(x.dtype)


def init_params(key):
    """Deterministic init matching torch.nn.Linear default (uniform +-1/sqrt(K))."""
    kw, kb = jax.random.split(key)
    bound = 1.0 / (IN_FEATURES ** 0.5)
    weight = jax.random.uniform(
        kw, (OUT_FEATURES, IN_FEATURES), jnp.float32, minval=-bound, maxval=bound
    )
    bias = jax.random.uniform(
        kb, (OUT_FEATURES,), jnp.float32, minval=-bound, maxval=bound
    )
    return weight, bias


if __name__ == "__main__":
    key = jax.random.PRNGKey(0)
    k_in, k_params = jax.random.split(key)

    B = 2
    x = jax.random.normal(k_in, (B, IN_FEATURES), jnp.float32)
    weight, bias = init_params(k_params)

    y = pallas_linear(x, weight, bias)
    y = jax.block_until_ready(y)

    # Pure-JAX reference check.
    y_ref = x @ weight.T + bias
    assert y.shape == (B, OUT_FEATURES)
    assert jnp.allclose(y, y_ref, atol=1e-3, rtol=1e-3), (
        float(jnp.max(jnp.abs(y - y_ref)))
    )

    print("KERNEL_OK")
</pallas_src>

<mosaic_0001>
module attributes {stable_mosaic.version = 11 : i64} {
  func.func @linear_kernel(%arg0: i32, %arg1: i32, %arg2: memref<2x49152xf32, #tpu.memory_space<vmem>>, %arg3: memref<10x49152xf32, #tpu.memory_space<vmem>>, %arg4: memref<1x2x10xf32, #tpu.memory_space<vmem>>, %arg5: memref<2x10xf32, #tpu.memory_space<vmem>>) attributes {dimension_semantics = [#tpu.dimension_semantics<parallel>, #tpu.dimension_semantics<arbitrary>], iteration_bounds = array<i64: 2, 2>, scalar_prefetch = 0 : i64, scratch_operands = 1 : i64, tpu.core_type = #tpu.core_type<tc>, window_params = [{transform_indices = @transform_0, window_bounds = array<i64: 2, 49152>}, {transform_indices = @transform_1, window_bounds = array<i64: 10, 49152>}, {transform_indices = @transform_2, window_bounds = array<i64: 1, 2, 10>}]} {
    %c0_i32 = arith.constant 0 : i32
    %0 = arith.cmpi eq, %arg1, %c0_i32 : i32
    %1 = arith.extui %0 : i1 to i32
    %c0_i32_0 = arith.constant 0 : i32
    %2 = arith.cmpi ne, %1, %c0_i32_0 : i32
    scf.if %2 {
      %cst_9 = arith.constant 0.000000e+00 : f32
      %12 = vector.broadcast %cst_9 : f32 to vector<2x10xf32>
      %c0_10 = arith.constant 0 : index
      %c0_11 = arith.constant 0 : index
      %13 = vector.load %arg5[%c0_10, %c0_11] : memref<2x10xf32, #tpu.memory_space<vmem>>, vector<2x10xf32>
      tpu.vector_store %arg5[%c0_10, %c0_11], %12 {strides = array<i32>} : memref<2x10xf32, #tpu.memory_space<vmem>>, vector<2x10xf32>,
    } else {
    }
    %c0 = arith.constant 0 : index
    %c0_1 = arith.constant 0 : index
    %3 = vector.load %arg5[%c0, %c0_1] : memref<2x10xf32, #tpu.memory_space<vmem>>, vector<2x10xf32>
    %c0_2 = arith.constant 0 : index
    %c0_3 = arith.constant 0 : index
    %4 = vector.load %arg2[%c0_2, %c0_3] : memref<2x49152xf32, #tpu.memory_space<vmem>>, vector<2x49152xf32>
    %c0_4 = arith.constant 0 : index
    %c0_5 = arith.constant 0 : index
    %5 = vector.load %arg3[%c0_4, %c0_5] : memref<10x49152xf32, #tpu.memory_space<vmem>>, vector<10x49152xf32>
    %cst = arith.constant dense<0.000000e+00> : vector<2x10xf32>
    %6 = tpu.matmul %4, %5, %cst {dimension_numbers = #tpu.dot_dimension_numbers<[1], [1], [0], [0], [0, 0, 1, 0], [], []>} : vector<2x49152xf32>, vector<10x49152xf32>, vector<2x10xf32> -> vector<2x10xf32>
    %7 = arith.addf %3, %6 : vector<2x10xf32>
    %c0_6 = arith.constant 0 : index
    %c0_7 = arith.constant 0 : index
    %8 = vector.load %arg5[%c0_6, %c0_7] : memref<2x10xf32, #tpu.memory_space<vmem>>, vector<2x10xf32>
    tpu.vector_store %arg5[%c0_6, %c0_7], %7 {strides = array<i32>} : memref<2x10xf32, #tpu.memory_space<vmem>>, vector<2x10xf32>,
    %c1_i32 = arith.constant 1 : i32
    %9 = arith.cmpi eq, %arg1, %c1_i32 : i32
    %10 = arith.extui %9 : i1 to i32
    %c0_i32_8 = arith.constant 0 : i32
    %11 = arith.cmpi ne, %10, %c0_i32_8 : i32
    scf.if %11 {
      %c0_9 = arith.constant 0 : index
      %c0_10 = arith.constant 0 : index
      %12 = vector.load %arg5[%c0_9, %c0_10] : memref<2x10xf32, #tpu.memory_space<vmem>>, vector<2x10xf32>
      %13 = vector.shape_cast %12 : vector<2x10xf32> to vector<1x2x10xf32>
      %c0_11 = arith.constant 0 : index
      %c0_12 = arith.constant 0 : index
      %c0_13 = arith.constant 0 : index
      %14 = vector.load %arg4[%c0_11, %c0_12, %c0_13] : memref<1x2x10xf32, #tpu.memory_space<vmem>>, vector<1x2x10xf32>
      tpu.vector_store %arg4[%c0_11, %c0_12, %c0_13], %13 {strides = array<i32>} : memref<1x2x10xf32, #tpu.memory_space<vmem>>, vector<1x2x10xf32>,
    } else {
    }
    return
  }
  func.func @transform_0(%arg0: i32, %arg1: i32) -> (i32, i32) {
    %c2_i32 = arith.constant 2 : i32
    %0 = arith.muli %arg0, %c2_i32 : i32
    %1 = arith.addi %0, %arg1 : i32
    %c0_i32 = arith.constant 0 : i32
    %c0_i32_0 = arith.constant 0 : i32
    return %c0_i32, %1 : i32, i32
  }
  func.func @transform_1(%arg0: i32, %arg1: i32) -> (i32, i32) {
    %c2_i32 = arith.constant 2 : i32
    %0 = arith.muli %arg0, %c2_i32 : i32
    %1 = arith.addi %0, %arg1 : i32
    %c0_i32 = arith.constant 0 : i32
    %c0_i32_0 = arith.constant 0 : i32
    return %c0_i32, %1 : i32, i32
  }
  func.func @transform_2(%arg0: i32, %arg1: i32) -> (i32, i32, i32) {
    %c0_i32 = arith.constant 0 : i32
    %c0_i32_0 = arith.constant 0 : i32
    %c0_i32_1 = arith.constant 0 : i32
    return %arg0, %c0_i32, %c0_i32_0 : i32, i32, i32
  }
}

</mosaic_0001>

<bundles_post_ra>
// kernel: tpu_custom_call.1
= control target key start
LH: loop header
LB: loop body
LE: loop exit
PB: predicated region body
PF: predicated region fallthrough
CT: control target
= control target key end

     0   :  { %7 = vsyncpa [#allocation4], 0  ;;  %s19337_s0 = inlined_call_operand.hbm [shape: f32[2,196608], index: 0, kind: input, shape index: {}]   ;;  %s19338_s1 = inlined_call_operand.hbm [shape: f32[10,196608], index: 1, kind: input, shape index: {}]   ;;  %s19339_s2 = inlined_call_operand.hbm [shape: f32[2,2,10], index: 2, kind: output, shape index: {}]  }
   0x1   :  { %9 = vsyncpa [#allocation4 + $0x1], 0 }
   0x2   :  { %10 = vsyncpa [#allocation7], 0 }
   0x3   :  { %12 = vsyncpa [#allocation7 + $0x1], 0 }
   0x4   :  { %13 = vsyncpa [#allocation5], 0 }
   0x5   :  { %15 = vsyncpa [#allocation5 + $0x1], 0  ;;  %s17997_s9 = smov 0   ;;  %s17999_s10 = smov 0  }
   0x6   :  { %s18001_s11 = smov 0   ;;  %s18003_s12 = smov 0  }
   0x7   :  { %s18005_s13 = smov 0   ;;  %s18007_s14 = smov 0  }
   0x8   :  { %s18009_s15 = smov 0   ;;  %s18011_s16 = smov 0  }
   0x9   :  { %s18013_s17 = smov 0   ;;  %s18015_s18 = smov 0  }
   0xa   :  { %s18017_s19 = smov 0  }
   0xb LB: > { %19346 = sst [smem:[#allocation12_spill]] %s17964_s17  ;;  %s16784_s20 = sadd.s32 4294967295, %s17972_s19   ;;  %s17972_s19 = sphi %s18017_s19, %s21_s19   ;;  %s17968_s18 = sphi %s18015_s18, %s19362_s18   ;;  %s17964_s17 = sphi %s18013_s17, %s19361_s17   ;;  %s17960_s16 = sphi %s18011_s16, %s19360_s16   ;;  %s17956_s15 = sphi %s18009_s15, %s19359_s15   ;;  %s17952_s14 = sphi %s18007_s14, %s19368_s14   ;;  %s17948_s13 = sphi %s18005_s13, %s19367_s13   ;;  %s17944_s12 = sphi %s18003_s12, %s19366_s12   ;;  %s17940_s11 = sphi %s18001_s11, %s19365_s11   ;;  %s17936_s10 = sphi %s17999_s10, %s19364_s10   ;;  %s17932_s9 = sphi %s17997_s9, %s19363_s9  }
   0xc   : > { %19347 = sst [smem:[#allocation13_spill]] %s17968_s18  ;;  %s16785_s21 = sadd.s32 4294967294, %s17972_s19  }
   0xd   : > { %s30_s22 = sadd.s32 1, %s17964_s17  ;;  %s33_s23 = sadd.s32 1, %s17968_s18 }
   0xe   : > { %p31_p0 = scmp.ge.s32.totalorder %s30_s22, 2  ;;  %s16786_s24 = sshll.u32 %s17968_s18, 1 }
   0xf   : > { %s18056_s25 = sadd.s32 %s17964_s17, %s16786_s24  ;;  %s44_s26 = sadd.s32 1, %s17952_s14 }
  0x10   : > { %s19370_s22 = smov (%p31_p0, %s30_s22), 0  ;;  %s19372_s23 = smov (!%p31_p0, %s33_s23), %s17968_s18 }
  0x11   : > { %19348 = sst [smem:[#allocation14_spill]] %s19370_s22  ;;  %p51_p1 = scmp.ne.s32.totalorder %s17952_s14, %s17948_s13 }
  0x12   : > { %p52_p2 = scmp.eq.s32.totalorder %s17972_s19, 0  ;;  %p35_p3 = scmp.ge.s32.totalorder %s19372_s23, 2 }
  0x13   : > { %p57_p4 = scmp.ne.s32.totalorder %s17948_s13, %s17944_s12  ;;  %p58_p6 = scmp.eq.s32.totalorder %s16784_s20, 0 }
  0x14   : > { %p18066_p5 = por %p52_p2, %p51_p1  ;;  %s19374_s23 = smov (%p35_p3, %s19372_s23), 0 }
  0x15   : > { %19350 = sst [smem:[#allocation15_spill]] %s19374_s23  ;;  %p18072_p7 = por %p58_p6, %p57_p4 }
  0x16   : > { %s100_s29 = sadd.s32 1, %s17940_s11  ;;  %s16787_s30 = sshll.u32 %s19374_s23, 1 }
  0x17   : > { %s19351_s28 = scalar_select %p18072_p7, 1, 0 }
  0x18   : > { %s97_s3 = ssub.s32 %s17968_s18, %s19374_s23  ;;  %s40_s4 = sadd.s32 %s16787_s30, %s19370_s22 }
  0x19   : > { %p98_p8 = scmp.eq.s32.totalorder %s97_s3, 0  ;;  %s41_s5 = ssub.s32 %s18056_s25, %s40_s4 }
  0x1a   : > { %p110_p9 = scmp.ne.s32.totalorder %s17940_s11, %s17936_s10  ;;  %p42_p10 = scmp.eq.s32.totalorder %s41_s5, 0 }
  0x1b   : > { %p111_p11 = scmp.eq.s32.totalorder %s16784_s20, 3  ;;  %p116_p13 = scmp.ne.s32.totalorder %s17936_s10, %s17932_s9 }
  0x1c   : > { %s18085_s6 = scalar_select %p98_p8, %s17940_s11, %s100_s29  }
  0x1d   : > { %s18088_s7 = scalar_select %p42_p10, %s17952_s14, %s44_s26  }
  0x1e   : > { %p18090_p12 = por %p111_p11, %p110_p9  ;;  %p117_p0 = scmp.eq.s32.totalorder %s16785_s21, 3 }
  0x1f   : > { %p17595_p1 = scmp.lt.s32.totalorder %s17972_s19, 4  ;;  %s18100_s12 = sand.u32 1, %s17952_s14  }
  0x20   : > { %s19352_s8 = scalar_select %p18090_p12, 1, 0 }
  0x21   : > { %p18102_p2 = por %p117_p0, %p116_p13  ;;  %s17574_s20 = smul.u32 768, %s18100_s12 }
  0x22   : > { %p18109_p3 = pnand %p17595_p1, %p18066_p5  ;;  %s16804_s29 = smul.u32 12288, %s18056_s25 }
  0x23   : > { %s19353_s24 = scalar_select %p18102_p2, 1, 0 }
  0x24   : > { %s18117_s3 = scalar_lea.hbm %s19337_s0, %s16804_s29  ;;  %s141_s4 = scalar_lea.vmem [#allocation3], %s17574_s20 }
  0x25   : > { %s151_s5 = sshll.u32 %s141_s4, 4  ;;  %s17575_s27 = smul.u32 6144, %s18100_s12  ;;  %s18119_s5 = int_to_ptr.vmem [resolvable:$true] %s151_s5 }
  0x26   : > { %s138_s23 = scalar_lea.sflag [#allocation4], %s18100_s12  ;;  %s17786_s22 = scalar_lea.hbm %s18117_s3, 12288 }
  0x27   : > { %p17787_p4 = scmp.ne.s32.totalorder %s18117_s3, %s17786_s22  ;;  %p17788_p5 = pneg %p18109_p3 }
  0x28   : > { %s17791_s30 = scalar_lea.hbm %s19337_s0, 49152  ;;  %p17792_p9 = scmp.lt.u32.totalorder %s18117_s3, %s19337_s0 }
  0x29   : > { %p17789_p6 = pnand %p17788_p5, %p17787_p4  ;;  %p17793_p10 = scmp.lt.u32.totalorder %s17791_s30, %s17786_s22 }
  0x2a   : > { %p17795_p13 = scmp.lt.u32.totalorder %s17786_s22, %s18117_s3 }
  0x2b   : > { %p17790_p8 = pneg %p17789_p6  ;;  %p17794_p11 = por %p17793_p10, %p17792_p9 }
  0x2d   : > { %p17796_p0 = por %p17795_p13, %p17794_p11 }
  0x2f   : > { %p17797_p1 = pnand %p17796_p0, %p17790_p8 }
  0x31   : > { %17800 = shalt.err (!%p17797_p1)
}
  0x32   : > { %s17801_s20 = scalar_lea.vmem %s18119_s5, 12288  ;;  %s17974_s4 = smov [#allocation3]  }
  0x33   : > { %p17802_p4 = scmp.ne.s32.totalorder %s18119_s5, %s17801_s20  ;;  %s17806_s29 = sshll.u32 %s17974_s4, 4  ;;  %s17807_s29 = int_to_ptr.vmem [resolvable:$false] %s17806_s29 }
  0x34   : > { %s17808_s17 = scalar_lea.vmem %s17807_s29, 24576  ;;  %p17809_p12 = scmp.lt.s32.totalorder %s18119_s5, %s17807_s29 }
  0x35   : > { %p17804_p6 = pnand %p17802_p4, %p17788_p5  ;;  %p17810_p9 = scmp.lt.s32.totalorder %s17808_s17, %s17801_s20 }
  0x37   : > { %p17805_p2 = pneg %p17804_p6  ;;  %p17811_p10 = por %p17810_p9, %p17809_p12 }
  0x39   : > { %p17812_p11 = pnand %p17811_p10, %p17805_p2 }
  0x3b   : > { %17815 = shalt.err (!%p17812_p11)
}
  0x3c   : > { %17587 = dma.hbm_to_vmem [thread:$0]  (!%p18109_p3), %s18117_s3, 12288, %s18119_s5, %s138_s23  }
  0x3d   : > { %s16805_s18 = smul.u32 49152, %s18056_s25  ;;  %p16796_p8 = scmp.ge.s32.totalorder %s17972_s19, 1 }
  0x3e   : > { %p179_p13 = scmp.lt.s32.totalorder %s17972_s19, 5  ;;  %s162_s20 = scalar_lea.vmem [#allocation6], %s17575_s27 }
  0x3f   : > { %s18154_s30 = scalar_lea.hbm %s19338_s1, %s16805_s18  ;;  %s171_s4 = sshll.u32 %s162_s20, 4  ;;  %s18162_s4 = int_to_ptr.vmem [resolvable:$true] %s171_s4 }
  0x40   : > { %p18158_p12 = pnand %p16796_p8, %p179_p13  ;;  %s159_s23 = scalar_lea.sflag [#allocation7], %s18100_s12 }
  0x41   : > { %s17816_s25 = scalar_lea.hbm %s18154_s30, 98304  ;;  %s17821_s17 = scalar_lea.hbm %s19338_s1, 393216 }
  0x42   : > { %p17817_p2 = scmp.ne.s32.totalorder %s18154_s30, %s17816_s25  ;;  %p17822_p4 = scmp.lt.u32.totalorder %s18154_s30, %s19338_s1 }
  0x43   : > { %p17823_p6 = scmp.lt.u32.totalorder %s17821_s17, %s17816_s25  ;;  %p17825_p10 = scmp.lt.u32.totalorder %s17816_s25, %s18154_s30 }
  0x44   : > { %p17819_p0 = pnand %p17817_p2, %p17788_p5 }
  0x45   : > { %p17824_p9 = por %p17823_p6, %p17822_p4 }
  0x46   : > { %p17820_p1 = pneg %p17819_p0 }
  0x47   : > { %p17826_p11 = por %p17825_p10, %p17824_p9 }
  0x49   : > { %p17827_p8 = pnand %p17826_p11, %p17820_p1 }
  0x4b   : > { %17830 = shalt.err (!%p17827_p8)
}
  0x4c   : > { %s17831_s22 = scalar_lea.vmem %s18162_s4, 98304  ;;  %s17975_s21 = smov [#allocation6]  }
  0x4d   : > { %p17832_p13 = scmp.ne.s32.totalorder %s18162_s4, %s17831_s22  ;;  %s17836_s20 = sshll.u32 %s17975_s21, 4  ;;  %s17837_s20 = int_to_ptr.vmem [resolvable:$false] %s17836_s20 }
  0x4e   : > { %s17838_s3 = scalar_lea.vmem %s17837_s20, 196608  ;;  %p17839_p7 = scmp.lt.s32.totalorder %s18162_s4, %s17837_s20 }
  0x4f   : > { %p17834_p2 = pnand %p17832_p13, %p17788_p5  ;;  %p17840_p4 = scmp.lt.s32.totalorder %s17838_s3, %s17831_s22 }
  0x51   : > { %p17835_p0 = pneg %p17834_p2  ;;  %p17841_p6 = por %p17840_p4, %p17839_p7 }
  0x53   : > { %p17842_p9 = pnand %p17841_p6, %p17835_p0 }
  0x55   : > { %17845 = shalt.err (!%p17842_p9)
}
  0x56   : > { %s17976_s25 = smov 196608   ;;  %s17977_s5 = smov 49152  }
  0x57   : > { %s17978_s17 = smov 3072   ;;  %183 = sbr.rel (%p18158_p12) target bundleno = 1132 (0x46c), region = 28 }
  0x58   : > { %17590 = dma.hbm_to_vmem [thread:$0]  (!%p18109_p3), %s18154_s30, 98304, %s18162_s4, %s159_s23, %s17976_s25, %s17977_s5, %s17978_s17  }
  0x59   : > { %s185_s18 = sand.u32 (!%p18158_p12), 1, %s17948_s13   ;;  %p19356_p7 = scmp.ne.s32.totalorder (!%p18158_p12), %s19351_s28, 0 }
  0x5a   : > { %s17576_s27 = smul.u32 (!%p18158_p12), 768, %s185_s18  ;;  %s186_s22 = scalar_lea.sflag (!%p18158_p12), [#allocation4], %s185_s18 }
  0x5c   : > { %s18193_s21 = scalar_lea.vmem (!%p18158_p12), [#allocation3], %s17576_s27 }
  0x5e   : > { %17919 = dma.done.wait (%p19356_p7), %s186_s22, 12288  }
  0x5f   : > { %17921 = vsyncadd (%p19356_p7), %s186_s22, 4294955008  ;;  %s17577_s20 = smul.u32 6144, %s185_s18  ;;  %s195_s26 = scalar_lea.sflag [#allocation7], %s185_s18 }
  0x61   : > { %s18199_s12 = scalar_lea.vmem [#allocation6], %s17577_s20 }
  0x62   : > { %17923 = dma.done.wait (%p19356_p7), %s195_s26, 98304  }
  0x63   : > { %17925 = vsyncadd (%p19356_p7), %s195_s26, 4294868992  ;;  %s221_s30 = sand.u32 1, %s17936_s10   ;;  %p16798_p3 = scmp.ne.s32.totalorder %s17956_s15, 0 }
  0x64   : > { %s18208_s4 = sshll.u32 %s221_s30, 1  ;;  %vm234_vm0 = vcmask (!%p16798_p3), 74752   ;;  %v17979_v0 = vmov (!%p16798_p3), 0.0  }
  0x65   : > { %s223_s29 = scalar_lea.vmem [#allocation8], %s18208_s4  ;;  %233 = sbr.rel (%p16798_p3) target bundleno = 108 (0x6c), region = 40  ;;  %235 = vst.msk [vmem:[#allocation2] sm:$0x3] (!%p16798_p3), %vm234_vm0, %v17979_v0 }
  0x6c PF: > { %v334_v1 = vld [vmem:[%s18199_s12 + $0x8] sm:$0xff]  ;;  %v333_v3 = vld [vmem:[%s18199_s12] sm:$0xff]  ;;  %v1201_v4 = vlaneseq  ;;  %v336_v7 = vld [vmem:[%s18199_s12 + $0x18] sm:$0xff]  ;;  %v17980_v9 = vmov 1983009808   ;;  %vm16654_vm1 = vcmask 74752  }
  0x6d   : > { %v718_v2 = vld [vmem:[%s18199_s12 + $0xc08] sm:$0x3]  ;;  %v717_v6 = vld [vmem:[%s18199_s12 + $0xc00] sm:$0x3]  ;;  %v720_v8 = vld [vmem:[%s18199_s12 + $0xc18] sm:$0x3]  ;;  %v1199_v10 = vunpack.c.l.s4 %v17980_v9 }
  0x6e   : > { %v16806_v5 = vpack.c.bf16 %v718_v2, %v334_v1  ;;  %v16808_v11 = vpack.c.bf16 %v717_v6, %v333_v3  ;;  %v16810_v12 = vpack.c.bf16 %v720_v8, %v336_v7  ;;  %v335_v13 = vld [vmem:[%s18199_s12 + $0x10] sm:$0xff]  ;;  %v237_v15 = vld [vmem:[%s18193_s21] sm:$0xff]  ;;  %v1202_v16 = vshrl.u32 %v1201_v4, 7  ;;  %v338_v20 = vld [vmem:[%s18199_s12 + $0x28] sm:$0xff]  ;;  %p16799_p5 = scmp.ne.s32.totalorder %s17956_s15, 1 }
  0x6f   : > { %v719_v14 = vld [vmem:[%s18199_s12 + $0xc10] sm:$0x3]  ;;  %v1200_v18 = vunpack.c.0.s8 %v1199_v10  ;;  %v1197_v19 = vcombine.high %v237_v15, %v237_v15  ;;  %v722_v21 = vld [vmem:[%s18199_s12 + $0xc28] sm:$0x3]  ;;  %v340_v23 = vld [vmem:[%s18199_s12 + $0x38] sm:$0xff] }
  0x70   : > { %16807 = vmatprep.subr.bf16.mxu0 %v16806_v5  ;;  %v16812_v17 = vpack.c.bf16 %v719_v14, %v335_v13  ;;  %16811 = vmatprep.subr.bf16.mxu1 %v16810_v12  ;;  %v16814_v22 = vpack.c.bf16 %v722_v21, %v338_v20  ;;  %v724_v24 = vld [vmem:[%s18199_s12 + $0xc38] sm:$0x3]  ;;  %v337_v26 = vld [vmem:[%s18199_s12 + $0x20] sm:$0xff]  ;;  %v238_v28 = vld [vmem:[%s18193_s21 + $0x8] sm:$0xff] }
  0x71   : > { %16809 = vmatpush1.bf16.xpose.msra.mxu0 %v16808_v11  ;;  %v18225_v25 = vsub.s32 %v1200_v18, %v1202_v16  ;;  %v16818_v27 = vpack.c.bf16 %v724_v24, %v340_v23  ;;  %v721_v29 = vld [vmem:[%s18199_s12 + $0xc20] sm:$0x3]  ;;  %v339_v30 = vld [vmem:[%s18199_s12 + $0x30] sm:$0xff]  ;;  %v1214_v32 = vcombine.high %v238_v28, %v238_v28  ;;  %v342_v36 = vld [vmem:[%s18199_s12 + $0x48] sm:$0xff] }
  0x72   : > { %16813 = vmatpush1.bf16.xpose.msra.mxu1 %v16812_v17  ;;  %16815 = vmatprep.subr.bf16.mxu0 %v16814_v22  ;;  %v723_v31 = vld [vmem:[%s18199_s12 + $0xc30] sm:$0x3]  ;;  %v726_v37 = vld [vmem:[%s18199_s12 + $0xc48] sm:$0x3]  ;;  %v344_v39 = vld [vmem:[%s18199_s12 + $0x58] sm:$0xff]  ;;  %v16816_v44 = vpack.c.bf16 %v721_v29, %v337_v26 }
  0x73   : > { %v1204_v33 = vrot.slane %v237_v15, %v18225_v25  ;;  %v1211_v34 = vrot.slane %v1197_v19, %v18225_v25  ;;  %16819 = vmatprep.subr.bf16.mxu1 %v16818_v27  ;;  %v1221_v35 = vrot.slane %v238_v28, %v18225_v25  ;;  %v1228_v38 = vrot.slane %v1214_v32, %v18225_v25  ;;  %v728_v40 = vld [vmem:[%s18199_s12 + $0xc58] sm:$0x3]  ;;  %v239_v41 = vld [vmem:[%s18193_s21 + $0x10] sm:$0xff]  ;;  %v341_v51 = vld [vmem:[%s18199_s12 + $0x40] sm:$0xff] }
  0x74   : > { %v16820_v45 = vpack.c.bf16 %v723_v31, %v339_v30  ;;  %v16822_v47 = vpack.c.bf16 %v726_v37, %v342_v36  ;;  %v16826_v49 = vpack.c.bf16 %v728_v40, %v344_v39  ;;  %v1231_v50 = vcombine.high %v239_v41, %v239_v41  ;;  %v725_v52 = vld [vmem:[%s18199_s12 + $0xc40] sm:$0x3]  ;;  %v343_v53 = vld [vmem:[%s18199_s12 + $0x50] sm:$0xff]  ;;  %v346_v56 = vld [vmem:[%s18199_s12 + $0x68] sm:$0xff] }
  0x75   : > { %v1212_v42 = vcombine.high %v1204_v33, %v1204_v33  ;;  %v1213_v43 = vcombine.high %v1211_v34, %v1211_v34  ;;  %v1229_v46 = vcombine.high %v1221_v35, %v1221_v35  ;;  %v1230_v48 = vcombine.high %v1228_v38, %v1228_v38  ;;  %v727_v54 = vld [vmem:[%s18199_s12 + $0xc50] sm:$0x3]  ;;  %v730_v57 = vld [vmem:[%s18199_s12 + $0xc68] sm:$0x3]  ;;  %v348_v59 = vld [vmem:[%s18199_s12 + $0x78] sm:$0xff] }
  0x76   : > { %v1238_v55 = vrot.slane %v239_v41, %v18225_v25  ;;  %v1245_v58 = vrot.slane %v1231_v50, %v18225_v25  ;;  %v732_v60 = vld [vmem:[%s18199_s12 + $0xc78] sm:$0x3]  ;;  %v16824_v62 = vpack.c.bf16 %v725_v52, %v341_v51  ;;  %v16828_v63 = vpack.c.bf16 %v727_v54, %v343_v53  ;;  %v345_v5 = vld [vmem:[%s18199_s12 + $0x60] sm:$0xff]  ;;  %v347_v7 = vld [vmem:[%s18199_s12 + $0x70] sm:$0xff] }
  0x77   : > { %3277 = vmatprep.mubr.f32.mxu0 %v1212_v42  ;;  %3347 = vmatprep.mubr.f32.mxu1 %v1213_v43  ;;  %v240_v61 = vld [vmem:[%s18193_s21 + $0x18] sm:$0xff]  ;;  %v16830_v1 = vpack.c.bf16 %v730_v57, %v346_v56  ;;  %v16834_v3 = vpack.c.bf16 %v732_v60, %v348_v59  ;;  %v729_v6 = vld [vmem:[%s18199_s12 + $0xc60] sm:$0x3]  ;;  %v731_v8 = vld [vmem:[%s18199_s12 + $0xc70] sm:$0x3] }
  0x78   : > { %3278 = vmatmul.mubr.f32.vlgmr.msra.gmra.mrb[0].mxu0 %v1204_v33  ;;  %v1246_v0 = vcombine.high %v1238_v55, %v1238_v55  ;;  %v1247_v2 = vcombine.high %v1245_v58, %v1245_v58  ;;  %v1248_v4 = vcombine.high %v240_v61, %v240_v61  ;;  %v1255_v9 = vrot.slane %v240_v61, %v18225_v25  ;;  %v350_v10 = vld [vmem:[%s18199_s12 + $0x88] sm:$0xff]  ;;  %v352_v13 = vld [vmem:[%s18199_s12 + $0x98] sm:$0xff]  ;;  %v241_v15 = vld [vmem:[%s18193_s21 + $0x20] sm:$0xff] }
  0x79   : > { %3348 = vmatmul.mubr.f32.vlgmr.msra.gmra.mrb[0].mxu1 %v1211_v34  ;;  %16817 = vmatpush1.bf16.xpose.msra.mxu0 %v16816_v44  ;;  %v734_v11 = vld [vmem:[%s18199_s12 + $0xc88] sm:$0x3]  ;;  %v736_v14 = vld [vmem:[%s18199_s12 + $0xc98] sm:$0x3]  ;;  %v16832_v16 = vpack.c.bf16 %v729_v6, %v345_v5  ;;  %v16836_v17 = vpack.c.bf16 %v731_v8, %v347_v7  ;;  %v1265_v22 = vcombine.high %v241_v15, %v241_v15  ;;  %v349_v23 = vld [vmem:[%s18199_s12 + $0x80] sm:$0xff] }
  0x7a   : > { %16821 = vmatpush1.bf16.xpose.msra.mxu1 %v16820_v45  ;;  %3417 = vmatprep.mubr.f32.mxu0 %v1229_v46  ;;  %v1262_v12 = vrot.slane %v1248_v4, %v18225_v25  ;;  %v1263_v18 = vcombine.high %v1255_v9, %v1255_v9  ;;  %v16838_v19 = vpack.c.bf16 %v734_v11, %v350_v10  ;;  %v733_v24 = vld [vmem:[%s18199_s12 + $0xc80] sm:$0x3]  ;;  %v351_v26 = vld [vmem:[%s18199_s12 + $0x90] sm:$0xff]  ;;  %v354_v29 = vld [vmem:[%s18199_s12 + $0xa8] sm:$0xff] }
  0x7b   : > { %16823 = vmatprep.subr.bf16.mxu0 %v16822_v47  ;;  %3487 = vmatprep.mubr.f32.mxu1 %v1230_v48  ;;  %v16842_v21 = vpack.c.bf16 %v736_v14, %v352_v13  ;;  %v735_v27 = vld [vmem:[%s18199_s12 + $0xc90] sm:$0x3]  ;;  %v1272_v28 = vrot.slane %v241_v15, %v18225_v25  ;;  %v738_v30 = vld [vmem:[%s18199_s12 + $0xca8] sm:$0x3]  ;;  %v1279_v31 = vrot.slane %v1265_v22, %v18225_v25  ;;  %v356_v32 = vld [vmem:[%s18199_s12 + $0xb8] sm:$0xff] }
  0x7c   : > { %16827 = vmatprep.subr.bf16.mxu1 %v16826_v49  ;;  %v1264_v20 = vcombine.high %v1262_v12, %v1262_v12  ;;  %v740_v33 = vld [vmem:[%s18199_s12 + $0xcb8] sm:$0x3]  ;;  %v242_v34 = vld [vmem:[%s18193_s21 + $0x28] sm:$0xff]  ;;  %v16844_v36 = vpack.c.bf16 %v735_v27, %v351_v26  ;;  %v353_v42 = vld [vmem:[%s18199_s12 + $0xa0] sm:$0xff] }
  0x7d   : > { %v1280_v37 = vcombine.high %v1272_v28, %v1272_v28  ;;  %v1281_v39 = vcombine.high %v1279_v31, %v1279_v31  ;;  %v16850_v40 = vpack.c.bf16 %v740_v33, %v356_v32  ;;  %v1282_v41 = vcombine.high %v242_v34, %v242_v34  ;;  %v737_v43 = vld [vmem:[%s18199_s12 + $0xca0] sm:$0x3]  ;;  %v355_v44 = vld [vmem:[%s18199_s12 + $0xb0] sm:$0xff]  ;;  %v358_v47 = vld [vmem:[%s18199_s12 + $0xc8] sm:$0xff] }
  0x7e   : > { %v739_v45 = vld [vmem:[%s18199_s12 + $0xcb0] sm:$0x3]  ;;  %v1289_v46 = vrot.slane %v242_v34, %v18225_v25  ;;  %v742_v48 = vld [vmem:[%s18199_s12 + $0xcc8] sm:$0x3]  ;;  %v360_v50 = vld [vmem:[%s18199_s12 + $0xd8] sm:$0xff]  ;;  %v16848_v53 = vpack.c.bf16 %v737_v43, %v353_v42 }
  0x7f   : > { %v1296_v49 = vrot.slane %v1282_v41, %v18225_v25  ;;  %v744_v51 = vld [vmem:[%s18199_s12 + $0xcd8] sm:$0x3]  ;;  %v243_v52 = vld [vmem:[%s18193_s21 + $0x30] sm:$0xff]  ;;  %v16852_v54 = vpack.c.bf16 %v739_v45, %v355_v44  ;;  %v16854_v56 = vpack.c.bf16 %v742_v48, %v358_v47  ;;  %v357_v60 = vld [vmem:[%s18199_s12 + $0xc0] sm:$0xff] }
  0x80   : > { %3418 = vmatmul.mubr.f32.vlgmr.msra.gmra.mrb[2].mxu0 %v1221_v35  ;;  %v16840_v35 = vpack.c.bf16 %v733_v24, %v349_v23  ;;  %v1299_v59 = vcombine.high %v243_v52, %v243_v52  ;;  %v741_v61 = vld [vmem:[%s18199_s12 + $0xcc0] sm:$0x3]  ;;  %v364_v4 = vld [vmem:[%s18199_s12 + $0xf8] sm:$0xff]  ;;  %v246_v43 = vld [vmem:[%s18193_s21 + $0x48] sm:$0xff] }
  0x81   : > { %3488 = vmatmul.mubr.f32.vlgmr.msra.gmra.mrb[2].mxu1 %v1228_v38  ;;  %16825 = vmatpush1.bf16.xpose.msra.mxu0 %v16824_v62  ;;  %v16846_v38 = vpack.c.bf16 %v738_v30, %v354_v29  ;;  %v1298_v57 = vcombine.high %v1296_v49, %v1296_v49  ;;  %v359_v62 = vld [vmem:[%s18199_s12 + $0xd0] sm:$0xff]  ;;  %v748_v5 = vld [vmem:[%s18199_s12 + $0xcf8] sm:$0x3]  ;;  %v16856_v7 = vpack.c.bf16 %v741_v61, %v357_v60  ;;  %v361_v14 = vld [vmem:[%s18199_s12 + $0xe0] sm:$0xff] }
  0x82   : > { %16829 = vmatpush1.bf16.xpose.msra.mxu1 %v16828_v63  ;;  %3557 = vmatprep.mubr.f32.mxu0 %v1246_v0  ;;  %v743_v63 = vld [vmem:[%s18199_s12 + $0xcd0] sm:$0x3]  ;;  %v1306_v0 = vrot.slane %v243_v52, %v18225_v25  ;;  %v244_v6 = vld [vmem:[%s18193_s21 + $0x38] sm:$0xff]  ;;  %v745_v15 = vld [vmem:[%s18199_s12 + $0xce0] sm:$0x3] }
  0x83   : > { %16831 = vmatprep.subr.bf16.mxu0 %v16830_v1  ;;  %3627 = vmatprep.mubr.f32.mxu1 %v1247_v2  ;;  %v362_v1 = vld [vmem:[%s18199_s12 + $0xe8] sm:$0xff]  ;;  %v16860_v8 = vpack.c.bf16 %v743_v63, %v359_v62  ;;  %v1316_v13 = vcombine.high %v244_v6, %v244_v6  ;;  %v368_v22 = vld [vmem:[%s18199_s12 + $0x118] sm:$0xff]  ;;  %v245_v24 = vld [vmem:[%s18193_s21 + $0x40] sm:$0xff]  ;;  %v16864_v26 = vpack.c.bf16 %v745_v15, %v361_v14 }
  0x84   : > { %16835 = vmatprep.subr.bf16.mxu1 %v16834_v3  ;;  %v746_v2 = vld [vmem:[%s18199_s12 + $0xce8] sm:$0x3]  ;;  %v1313_v3 = vrot.slane %v1299_v59, %v18225_v25  ;;  %v752_v23 = vld [vmem:[%s18199_s12 + $0xd18] sm:$0x3]  ;;  %v1333_v32 = vcombine.high %v245_v24, %v245_v24  ;;  %v365_v33 = vld [vmem:[%s18199_s12 + $0x100] sm:$0xff] }
  0x85   : > { %v16862_v10 = vpack.c.bf16 %v746_v2, %v362_v1  ;;  %v749_v34 = vld [vmem:[%s18199_s12 + $0xd00] sm:$0x3]  ;;  %v372_v41 = vld [vmem:[%s18199_s12 + $0x138] sm:$0xff]  ;;  %v247_v61 = vld [vmem:[%s18193_s21 + $0x50] sm:$0xff] }
  0x86   : > { %v1315_v11 = vcombine.high %v1313_v3, %v1313_v3  ;;  %v756_v42 = vld [vmem:[%s18199_s12 + $0xd38] sm:$0x3]  ;;  %v16872_v44 = vpack.c.bf16 %v749_v34, %v365_v33  ;;  %v753_v52 = vld [vmem:[%s18199_s12 + $0xd20] sm:$0x3] }
  0x87   : > { %v376_v59 = vld [vmem:[%s18199_s12 + $0x158] sm:$0xff]  ;;  %v249_v34 = vld [vmem:[%s18193_s21 + $0x60] sm:$0xff] }
  0x88   : > { %3558 = vmatmul.mubr.f32.vlgmr.msra.gmra.mrb[4].mxu0 %v1238_v55  ;;  %v1297_v55 = vcombine.high %v1289_v46, %v1289_v46  ;;  %v760_v60 = vld [vmem:[%s18199_s12 + $0xd58] sm:$0x3] }
  0x89   : > { %3628 = vmatmul.mubr.f32.vlgmr.msra.gmra.mrb[4].mxu1 %v1245_v58  ;;  %16833 = vmatpush1.bf16.xpose.msra.mxu0 %v16832_v16  ;;  %v16858_v58 = vpack.c.bf16 %v744_v51, %v360_v50  ;;  %v363_v16 = vld [vmem:[%s18199_s12 + $0xf0] sm:$0xff]  ;;  %v1350_v50 = vcombine.high %v246_v43, %v246_v43  ;;  %v369_v51 = vld [vmem:[%s18199_s12 + $0x120] sm:$0xff]  ;;  %v764_v14 = vld [vmem:[%s18199_s12 + $0xd78] sm:$0x3] }
  0x8a   : > { %16837 = vmatpush1.bf16.xpose.msra.mxu1 %v16836_v17  ;;  %3697 = vmatprep.mubr.f32.mxu0 %v1263_v18  ;;  %v747_v17 = vld [vmem:[%s18199_s12 + $0xcf0] sm:$0x3]  ;;  %v1323_v18 = vrot.slane %v244_v6, %v18225_v25  ;;  %v16880_v62 = vpack.c.bf16 %v753_v52, %v369_v51  ;;  %v757_v6 = vld [vmem:[%s18199_s12 + $0xd40] sm:$0x3]  ;;  %v248_v15 = vld [vmem:[%s18193_s21 + $0x58] sm:$0xff] }
  0x8b   : > { %16839 = vmatprep.subr.bf16.mxu0 %v16838_v19  ;;  %3767 = vmatprep.mubr.f32.mxu1 %v1264_v20  ;;  %v366_v19 = vld [vmem:[%s18199_s12 + $0x108] sm:$0xff]  ;;  %v16868_v27 = vpack.c.bf16 %v747_v17, %v363_v16  ;;  %v768_v33 = vld [vmem:[%s18199_s12 + $0xd98] sm:$0x3] }
  0x8c   : > { %16843 = vmatprep.subr.bf16.mxu1 %v16842_v21  ;;  %v750_v20 = vld [vmem:[%s18199_s12 + $0xd08] sm:$0x3]  ;;  %v1330_v21 = vrot.slane %v1316_v13, %v18225_v25  ;;  %v380_v13 = vld [vmem:[%s18199_s12 + $0x178] sm:$0xff] }
  0x8d   : > { %v16870_v29 = vpack.c.bf16 %v750_v20, %v366_v19  ;;  %v772_v51 = vld [vmem:[%s18199_s12 + $0xdb8] sm:$0x3]  ;;  %v250_v52 = vld [vmem:[%s18193_s21 + $0x68] sm:$0xff] }
  0x8e   : > { %v1332_v30 = vcombine.high %v1330_v21, %v1330_v21 }
  0x90   : > { %3698 = vmatmul.mubr.f32.vlgmr.msra.gmra.mrb[6].mxu0 %v1255_v9  ;;  %v1314_v9 = vcombine.high %v1306_v0, %v1306_v0 }
  0x91   : > { %3768 = vmatmul.mubr.f32.vlgmr.msra.gmra.mrb[6].mxu1 %v1262_v12  ;;  %16841 = vmatpush1.bf16.xpose.msra.mxu0 %v16840_v35  ;;  %v16866_v12 = vpack.c.bf16 %v748_v5, %v364_v4  ;;  %v367_v35 = vld [vmem:[%s18199_s12 + $0x110] sm:$0xff]  ;;  %v1367_v4 = vcombine.high %v247_v61, %v247_v61  ;;  %v373_v5 = vld [vmem:[%s18199_s12 + $0x140] sm:$0xff] }
  0x92   : > { %16845 = vmatpush1.bf16.xpose.msra.mxu1 %v16844_v36  ;;  %3837 = vmatprep.mubr.f32.mxu0 %v1280_v37  ;;  %v751_v36 = vld [vmem:[%s18199_s12 + $0xd10] sm:$0x3]  ;;  %v1340_v37 = vrot.slane %v245_v24, %v18225_v25  ;;  %v16888_v16 = vpack.c.bf16 %v757_v6, %v373_v5  ;;  %v761_v24 = vld [vmem:[%s18199_s12 + $0xd60] sm:$0x3]  ;;  %v776_v5 = vld [vmem:[%s18199_s12 + $0xdd8] sm:$0x3] }
  0x93   : > { %16847 = vmatprep.subr.bf16.mxu0 %v16846_v38  ;;  %3907 = vmatprep.mubr.f32.mxu1 %v1281_v39  ;;  %v370_v38 = vld [vmem:[%s18199_s12 + $0x128] sm:$0xff]  ;;  %v16876_v45 = vpack.c.bf16 %v751_v36, %v367_v35  ;;  %v251_v6 = vld [vmem:[%s18193_s21 + $0x70] sm:$0xff] }
  0x94   : > { %16851 = vmatprep.subr.bf16.mxu1 %v16850_v40  ;;  %v754_v39 = vld [vmem:[%s18199_s12 + $0xd28] sm:$0x3]  ;;  %v1347_v40 = vrot.slane %v1333_v32, %v18225_v25  ;;  %v384_v32 = vld [vmem:[%s18199_s12 + $0x198] sm:$0xff] }
  0x95   : > { %v16878_v47 = vpack.c.bf16 %v754_v39, %v370_v38 }
  0x96   : > { %v1349_v48 = vcombine.high %v1347_v40, %v1347_v40 }
  0x98   : > { %3838 = vmatmul.mubr.f32.vlgmr.msra.gmra.mrb[8].mxu0 %v1272_v28  ;;  %v1331_v28 = vcombine.high %v1323_v18, %v1323_v18 }
  0x99   : > { %3908 = vmatmul.mubr.f32.vlgmr.msra.gmra.mrb[8].mxu1 %v1279_v31  ;;  %16849 = vmatpush1.bf16.xpose.msra.mxu0 %v16848_v53  ;;  %v16874_v31 = vpack.c.bf16 %v752_v23, %v368_v22  ;;  %v371_v53 = vld [vmem:[%s18199_s12 + $0x130] sm:$0xff]  ;;  %v1384_v22 = vcombine.high %v248_v15, %v248_v15  ;;  %v377_v23 = vld [vmem:[%s18199_s12 + $0x160] sm:$0xff] }
  0x9a   : > { %16853 = vmatpush1.bf16.xpose.msra.mxu1 %v16852_v54  ;;  %3977 = vmatprep.mubr.f32.mxu0 %v1297_v55  ;;  %v755_v54 = vld [vmem:[%s18199_s12 + $0xd30] sm:$0x3]  ;;  %v1357_v55 = vrot.slane %v246_v43, %v18225_v25  ;;  %v16896_v35 = vpack.c.bf16 %v761_v24, %v377_v23  ;;  %v765_v43 = vld [vmem:[%s18199_s12 + $0xd80] sm:$0x3]  ;;  %v780_v23 = vld [vmem:[%s18199_s12 + $0xdf8] sm:$0x3] }
  0x9b   : > { %16855 = vmatprep.subr.bf16.mxu0 %v16854_v56  ;;  %4047 = vmatprep.mubr.f32.mxu1 %v1298_v57  ;;  %v374_v56 = vld [vmem:[%s18199_s12 + $0x148] sm:$0xff]  ;;  %v16884_v63 = vpack.c.bf16 %v755_v54, %v371_v53  ;;  %v252_v24 = vld [vmem:[%s18193_s21 + $0x78] sm:$0xff] }
  0x9c   : > { %16859 = vmatprep.subr.bf16.mxu1 %v16858_v58  ;;  %v758_v57 = vld [vmem:[%s18199_s12 + $0xd48] sm:$0x3]  ;;  %v1364_v58 = vrot.slane %v1350_v50, %v18225_v25  ;;  %v388_v50 = vld [vmem:[%s18199_s12 + $0x1b8] sm:$0xff] }
  0x9d   : > { %v16886_v1 = vpack.c.bf16 %v758_v57, %v374_v56 }
  0x9e   : > { %v1366_v2 = vcombine.high %v1364_v58, %v1364_v58 }
  0xa0   : > { %3978 = vmatmul.mubr.f32.vlgmr.msra.gmra.mrb[10].mxu0 %v1289_v46  ;;  %v1348_v46 = vcombine.high %v1340_v37, %v1340_v37 }
  0xa1   : > { %4048 = vmatmul.mubr.f32.vlgmr.msra.gmra.mrb[10].mxu1 %v1296_v49  ;;  %16857 = vmatpush1.bf16.xpose.msra.mxu0 %v16856_v7  ;;  %v16882_v49 = vpack.c.bf16 %v756_v42, %v372_v41  ;;  %v375_v7 = vld [vmem:[%s18199_s12 + $0x150] sm:$0xff]  ;;  %v1401_v41 = vcombine.high %v249_v34, %v249_v34  ;;  %v381_v42 = vld [vmem:[%s18199_s12 + $0x180] sm:$0xff] }
  0xa2   : > { %16861 = vmatpush1.bf16.xpose.msra.mxu1 %v16860_v8  ;;  %4117 = vmatprep.mubr.f32.mxu0 %v1314_v9  ;;  %v759_v8 = vld [vmem:[%s18199_s12 + $0xd50] sm:$0x3]  ;;  %v1374_v9 = vrot.slane %v247_v61, %v18225_v25  ;;  %v16904_v53 = vpack.c.bf16 %v765_v43, %v381_v42  ;;  %v769_v61 = vld [vmem:[%s18199_s12 + $0xda0] sm:$0x3]  ;;  %v784_v42 = vld [vmem:[%s18199_s12 + $0xe18] sm:$0x3] }
  0xa3   : > { %16863 = vmatprep.subr.bf16.mxu0 %v16862_v10  ;;  %4187 = vmatprep.mubr.f32.mxu1 %v1315_v11  ;;  %v378_v10 = vld [vmem:[%s18199_s12 + $0x168] sm:$0xff]  ;;  %v16892_v17 = vpack.c.bf16 %v759_v8, %v375_v7  ;;  %v253_v43 = vld [vmem:[%s18193_s21 + $0x80] sm:$0xff] }
  0xa4   : > { %16867 = vmatprep.subr.bf16.mxu1 %v16866_v12  ;;  %v762_v11 = vld [vmem:[%s18199_s12 + $0xd68] sm:$0x3]  ;;  %v1381_v12 = vrot.slane %v1367_v4, %v18225_v25  ;;  %v392_v4 = vld [vmem:[%s18199_s12 + $0x1d8] sm:$0xff] }
  0xa5   : > { %v16894_v19 = vpack.c.bf16 %v762_v11, %v378_v10 }
  0xa6   : > { %v1383_v20 = vcombine.high %v1381_v12, %v1381_v12 }
  0xa8   : > { %4118 = vmatmul.mubr.f32.vlgmr.msra.gmra.mrb[12].mxu0 %v1306_v0  ;;  %v1365_v0 = vcombine.high %v1357_v55, %v1357_v55 }
  0xa9   : > { %4188 = vmatmul.mubr.f32.vlgmr.msra.gmra.mrb[12].mxu1 %v1313_v3  ;;  %16865 = vmatpush1.bf16.xpose.msra.mxu0 %v16864_v26  ;;  %v16890_v3 = vpack.c.bf16 %v760_v60, %v376_v59  ;;  %v379_v26 = vld [vmem:[%s18199_s12 + $0x170] sm:$0xff]  ;;  %v1418_v59 = vcombine.high %v250_v52, %v250_v52  ;;  %v385_v60 = vld [vmem:[%s18199_s12 + $0x1a0] sm:$0xff] }
  0xaa   : > { %16869 = vmatpush1.bf16.xpose.msra.mxu1 %v16868_v27  ;;  %4257 = vmatprep.mubr.f32.mxu0 %v1331_v28  ;;  %v763_v27 = vld [vmem:[%s18199_s12 + $0xd70] sm:$0x3]  ;;  %v1391_v28 = vrot.slane %v248_v15, %v18225_v25  ;;  %v16912_v7 = vpack.c.bf16 %v769_v61, %v385_v60  ;;  %v773_v15 = vld [vmem:[%s18199_s12 + $0xdc0] sm:$0x3]  ;;  %v788_v60 = vld [vmem:[%s18199_s12 + $0xe38] sm:$0x3] }
  0xab   : > { %16871 = vmatprep.subr.bf16.mxu0 %v16870_v29  ;;  %4327 = vmatprep.mubr.f32.mxu1 %v1332_v30  ;;  %v382_v29 = vld [vmem:[%s18199_s12 + $0x188] sm:$0xff]  ;;  %v16900_v36 = vpack.c.bf16 %v763_v27, %v379_v26 }
  0xac   : > { %16875 = vmatprep.subr.bf16.mxu1 %v16874_v31  ;;  %v766_v30 = vld [vmem:[%s18199_s12 + $0xd88] sm:$0x3]  ;;  %v1398_v31 = vrot.slane %v1384_v22, %v18225_v25  ;;  %v396_v22 = vld [vmem:[%s18199_s12 + $0x1f8] sm:$0xff] }
  0xad   : > { %v16902_v38 = vpack.c.bf16 %v766_v30, %v382_v29  ;;  %v254_v61 = vld [vmem:[%s18193_s21 + $0x88] sm:$0xff] }
  0xae   : > { %v1400_v39 = vcombine.high %v1398_v31, %v1398_v31 }
  0xb0   : > { %4258 = vmatmul.mubr.f32.vlgmr.msra.gmra.mrb[14].mxu0 %v1323_v18  ;;  %v1382_v18 = vcombine.high %v1374_v9, %v1374_v9 }
  0xb1   : > { %4328 = vmatmul.mubr.f32.vlgmr.msra.gmra.mrb[14].mxu1 %v1330_v21  ;;  %16873 = vmatpush1.bf16.xpose.msra.mxu0 %v16872_v44  ;;  %v16898_v21 = vpack.c.bf16 %v764_v14, %v380_v13  ;;  %v383_v44 = vld [vmem:[%s18199_s12 + $0x190] sm:$0xff]  ;;  %v1435_v13 = vcombine.high %v251_v6, %v251_v6  ;;  %v389_v14 = vld [vmem:[%s18199_s12 + $0x1c0] sm:$0xff] }
  0xb2   : > { %16877 = vmatpush1.bf16.xpose.msra.mxu1 %v16876_v45  ;;  %4397 = vmatprep.mubr.f32.mxu0 %v1348_v46  ;;  %v767_v45 = vld [vmem:[%s18199_s12 + $0xd90] sm:$0x3]  ;;  %v1408_v46 = vrot.slane %v249_v34, %v18225_v25  ;;  %v16920_v26 = vpack.c.bf16 %v773_v15, %v389_v14  ;;  %v777_v34 = vld [vmem:[%s18199_s12 + $0xde0] sm:$0x3]  ;;  %v792_v14 = vld [vmem:[%s18199_s12 + $0xe58] sm:$0x3] }
  0xb3   : > { %16879 = vmatprep.subr.bf16.mxu0 %v16878_v47  ;;  %4467 = vmatprep.mubr.f32.mxu1 %v1349_v48  ;;  %v386_v47 = vld [vmem:[%s18199_s12 + $0x1a8] sm:$0xff]  ;;  %v16908_v54 = vpack.c.bf16 %v767_v45, %v383_v44  ;;  %v255_v15 = vld [vmem:[%s18193_s21 + $0x90] sm:$0xff] }
  0xb4   : > { %16883 = vmatprep.subr.bf16.mxu1 %v16882_v49  ;;  %v770_v48 = vld [vmem:[%s18199_s12 + $0xda8] sm:$0x3]  ;;  %v1415_v49 = vrot.slane %v1401_v41, %v18225_v25  ;;  %v400_v41 = vld [vmem:[%s18199_s12 + $0x218] sm:$0xff] }
  0xb5   : > { %v16910_v56 = vpack.c.bf16 %v770_v48, %v386_v47 }
  0xb6   : > { %v1417_v57 = vcombine.high %v1415_v49, %v1415_v49 }
  0xb8   : > { %4398 = vmatmul.mubr.f32.vlgmr.msra.gmra.mrb[16].mxu0 %v1340_v37  ;;  %v1399_v37 = vcombine.high %v1391_v28, %v1391_v28 }
  0xb9   : > { %4468 = vmatmul.mubr.f32.vlgmr.msra.gmra.mrb[16].mxu1 %v1347_v40  ;;  %16881 = vmatpush1.bf16.xpose.msra.mxu0 %v16880_v62  ;;  %v16906_v40 = vpack.c.bf16 %v768_v33, %v384_v32  ;;  %v387_v62 = vld [vmem:[%s18199_s12 + $0x1b0] sm:$0xff]  ;;  %v1452_v32 = vcombine.high %v252_v24, %v252_v24  ;;  %v393_v33 = vld [vmem:[%s18199_s12 + $0x1e0] sm:$0xff] }
  0xba   : > { %16885 = vmatpush1.bf16.xpose.msra.mxu1 %v16884_v63  ;;  %4537 = vmatprep.mubr.f32.mxu0 %v1365_v0  ;;  %v771_v63 = vld [vmem:[%s18199_s12 + $0xdb0] sm:$0x3]  ;;  %v1425_v0 = vrot.slane %v250_v52, %v18225_v25  ;;  %v16928_v44 = vpack.c.bf16 %v777_v34, %v393_v33  ;;  %v781_v52 = vld [vmem:[%s18199_s12 + $0xe00] sm:$0x3]  ;;  %v796_v33 = vld [vmem:[%s18199_s12 + $0xe78] sm:$0x3] }
  0xbb   : > { %16887 = vmatprep.subr.bf16.mxu0 %v16886_v1  ;;  %4607 = vmatprep.mubr.f32.mxu1 %v1366_v2  ;;  %v390_v1 = vld [vmem:[%s18199_s12 + $0x1c8] sm:$0xff]  ;;  %v16916_v8 = vpack.c.bf16 %v771_v63, %v387_v62  ;;  %v256_v34 = vld [vmem:[%s18193_s21 + $0x98] sm:$0xff] }
  0xbc   : > { %16891 = vmatprep.subr.bf16.mxu1 %v16890_v3  ;;  %v774_v2 = vld [vmem:[%s18199_s12 + $0xdc8] sm:$0x3]  ;;  %v1432_v3 = vrot.slane %v1418_v59, %v18225_v25  ;;  %v404_v59 = vld [vmem:[%s18199_s12 + $0x238] sm:$0xff] }
  0xbd   : > { %v16918_v10 = vpack.c.bf16 %v774_v2, %v390_v1 }
  0xbe   : > { %v1434_v11 = vcombine.high %v1432_v3, %v1432_v3 }
  0xc0   : > { %4538 = vmatmul.mubr.f32.vlgmr.msra.gmra.mrb[18].mxu0 %v1357_v55  ;;  %v1416_v55 = vcombine.high %v1408_v46, %v1408_v46 }
  0xc1   : > { %4608 = vmatmul.mubr.f32.vlgmr.msra.gmra.mrb[18].mxu1 %v1364_v58  ;;  %16889 = vmatpush1.bf16.xpose.msra.mxu0 %v16888_v16  ;;  %v16914_v58 = vpack.c.bf16 %v772_v51, %v388_v50  ;;  %v391_v16 = vld [vmem:[%s18199_s12 + $0x1d0] sm:$0xff]  ;;  %v1469_v50 = vcombine.high %v253_v43, %v253_v43  ;;  %v397_v51 = vld [vmem:[%s18199_s12 + $0x200] sm:$0xff] }
  0xc2   : > { %16893 = vmatpush1.bf16.xpose.msra.mxu1 %v16892_v17  ;;  %4677 = vmatprep.mubr.f32.mxu0 %v1382_v18  ;;  %v775_v17 = vld [vmem:[%s18199_s12 + $0xdd0] sm:$0x3]  ;;  %v1442_v18 = vrot.slane %v251_v6, %v18225_v25  ;;  %v16936_v62 = vpack.c.bf16 %v781_v52, %v397_v51  ;;  %v785_v6 = vld [vmem:[%s18199_s12 + $0xe20] sm:$0x3]  ;;  %v800_v51 = vld [vmem:[%s18199_s12 + $0xe98] sm:$0x3] }
  0xc3   : > { %16895 = vmatprep.subr.bf16.mxu0 %v16894_v19  ;;  %4747 = vmatprep.mubr.f32.mxu1 %v1383_v20  ;;  %v394_v19 = vld [vmem:[%s18199_s12 + $0x1e8] sm:$0xff]  ;;  %v16924_v27 = vpack.c.bf16 %v775_v17, %v391_v16  ;;  %v257_v52 = vld [vmem:[%s18193_s21 + $0xa0] sm:$0xff] }
  0xc4   : > { %16899 = vmatprep.subr.bf16.mxu1 %v16898_v21  ;;  %v778_v20 = vld [vmem:[%s18199_s12 + $0xde8] sm:$0x3]  ;;  %v1449_v21 = vrot.slane %v1435_v13, %v18225_v25  ;;  %v408_v13 = vld [vmem:[%s18199_s12 + $0x258] sm:$0xff] }
  0xc5   : > { %v16926_v29 = vpack.c.bf16 %v778_v20, %v394_v19 }
  0xc6   : > { %v1451_v30 = vcombine.high %v1449_v21, %v1449_v21 }
  0xc8   : > { %4678 = vmatmul.mubr.f32.vlgmr.msra.gmra.mrb[20].mxu0 %v1374_v9  ;;  %v1433_v9 = vcombine.high %v1425_v0, %v1425_v0 }
  0xc9   : > { %4748 = vmatmul.mubr.f32.vlgmr.msra.gmra.mrb[20].mxu1 %v1381_v12  ;;  %16897 = vmatpush1.bf16.xpose.msra.mxu0 %v16896_v35  ;;  %v16922_v12 = vpack.c.bf16 %v776_v5, %v392_v4  ;;  %v395_v35 = vld [vmem:[%s18199_s12 + $0x1f0] sm:$0xff]  ;;  %v1486_v4 = vcombine.high %v254_v61, %v254_v61  ;;  %v401_v5 = vld [vmem:[%s18199_s12 + $0x220] sm:$0xff] }
  0xca   : > { %16901 = vmatpush1.bf16.xpose.msra.mxu1 %v16900_v36  ;;  %4817 = vmatprep.mubr.f32.mxu0 %v1399_v37  ;;  %v779_v36 = vld [vmem:[%s18199_s12 + $0xdf0] sm:$0x3]  ;;  %v1459_v37 = vrot.slane %v252_v24, %v18225_v25  ;;  %v16944_v16 = vpack.c.bf16 %v785_v6, %v401_v5  ;;  %v789_v24 = vld [vmem:[%s18199_s12 + $0xe40] sm:$0x3]  ;;  %v804_v5 = vld [vmem:[%s18199_s12 + $0xeb8] sm:$0x3] }
  0xcb   : > { %16903 = vmatprep.subr.bf16.mxu0 %v16902_v38  ;;  %4887 = vmatprep.mubr.f32.mxu1 %v1400_v39  ;;  %v398_v38 = vld [vmem:[%s18199_s12 + $0x208] sm:$0xff]  ;;  %v16932_v45 = vpack.c.bf16 %v779_v36, %v395_v35 }
  0xcc   : > { %16907 = vmatprep.subr.bf16.mxu1 %v16906_v40  ;;  %v782_v39 = vld [vmem:[%s18199_s12 + $0xe08] sm:$0x3]  ;;  %v1466_v40 = vrot.slane %v1452_v32, %v18225_v25  ;;  %v412_v32 = vld [vmem:[%s18199_s12 + $0x278] sm:$0xff] }
  0xcd   : > { %v16934_v47 = vpack.c.bf16 %v782_v39, %v398_v38  ;;  %v258_v6 = vld [vmem:[%s18193_s21 + $0xa8] sm:$0xff] }
  0xce   : > { %v1468_v48 = vcombine.high %v1466_v40, %v1466_v40 }
  0xd0   : > { %4818 = vmatmul.mubr.f32.vlgmr.msra.gmra.mrb[22].mxu0 %v1391_v28  ;;  %v1450_v28 = vcombine.high %v1442_v18, %v1442_v18 }
  0xd1   : > { %4888 = vmatmul.mubr.f32.vlgmr.msra.gmra.mrb[22].mxu1 %v1398_v31  ;;  %16905 = vmatpush1.bf16.xpose.msra.mxu0 %v16904_v53  ;;  %v16930_v31 = vpack.c.bf16 %v780_v23, %v396_v22  ;;  %v399_v53 = vld [vmem:[%s18199_s12 + $0x210] sm:$0xff]  ;;  %v1503_v22 = vcombine.high %v255_v15, %v255_v15  ;;  %v405_v23 = vld [vmem:[%s18199_s12 + $0x240] sm:$0xff] }
  0xd2   : > { %16909 = vmatpush1.bf16.xpose.msra.mxu1 %v16908_v54  ;;  %4957 = vmatprep.mubr.f32.mxu0 %v1416_v55  ;;  %v783_v54 = vld [vmem:[%s18199_s12 + $0xe10] sm:$0x3]  ;;  %v1476_v55 = vrot.slane %v253_v43, %v18225_v25  ;;  %v16952_v35 = vpack.c.bf16 %v789_v24, %v405_v23  ;;  %v793_v43 = vld [vmem:[%s18199_s12 + $0xe60] sm:$0x3]  ;;  %v808_v23 = vld [vmem:[%s18199_s12 + $0xed8] sm:$0x3] }
  0xd3   : > { %16911 = vmatprep.subr.bf16.mxu0 %v16910_v56  ;;  %5027 = vmatprep.mubr.f32.mxu1 %v1417_v57  ;;  %v402_v56 = vld [vmem:[%s18199_s12 + $0x228] sm:$0xff]  ;;  %v16940_v63 = vpack.c.bf16 %v783_v54, %v399_v53  ;;  %v259_v24 = vld [vmem:[%s18193_s21 + $0xb0] sm:$0xff] }
  0xd4   : > { %16915 = vmatprep.subr.bf16.mxu1 %v16914_v58  ;;  %v786_v57 = vld [vmem:[%s18199_s12 + $0xe28] sm:$0x3]  ;;  %v1483_v58 = vrot.slane %v1469_v50, %v18225_v25  ;;  %v416_v50 = vld [vmem:[%s18199_s12 + $0x298] sm:$0xff] }
  0xd5   : > { %v16942_v1 = vpack.c.bf16 %v786_v57, %v402_v56 }
  0xd6   : > { %v1485_v2 = vcombine.high %v1483_v58, %v1483_v58 }
  0xd8   : > { %4958 = vmatmul.mubr.f32.vlgmr.msra.gmra.mrb[24].mxu0 %v1408_v46  ;;  %v1467_v46 = vcombine.high %v1459_v37, %v1459_v37 }
  0xd9   : > { %5028 = vmatmul.mubr.f32.vlgmr.msra.gmra.mrb[24].mxu1 %v1415_v49  ;;  %16913 = vmatpush1.bf16.xpose.msra.mxu0 %v16912_v7  ;;  %v16938_v49 = vpack.c.bf16 %v784_v42, %v400_v41  ;;  %v403_v7 = vld [vmem:[%s18199_s12 + $0x230] sm:$0xff]  ;;  %v1520_v41 = vcombine.high %v256_v34, %v256_v34  ;;  %v409_v42 = vld [vmem:[%s18199_s12 + $0x260] sm:$0xff] }
  0xda   : > { %16917 = vmatpush1.bf16.xpose.msra.mxu1 %v16916_v8  ;;  %5097 = vmatprep.mubr.f32.mxu0 %v1433_v9  ;;  %v787_v8 = vld [vmem:[%s18199_s12 + $0xe30] sm:$0x3]  ;;  %v1493_v9 = vrot.slane %v254_v61, %v18225_v25  ;;  %v16960_v53 = vpack.c.bf16 %v793_v43, %v409_v42  ;;  %v797_v61 = vld [vmem:[%s18199_s12 + $0xe80] sm:$0x3]  ;;  %v812_v42 = vld [vmem:[%s18199_s12 + $0xef8] sm:$0x3] }
  0xdb   : > { %16919 = vmatprep.subr.bf16.mxu0 %v16918_v10  ;;  %5167 = vmatprep.mubr.f32.mxu1 %v1434_v11  ;;  %v406_v10 = vld [vmem:[%s18199_s12 + $0x248] sm:$0xff]  ;;  %v16948_v17 = vpack.c.bf16 %v787_v8, %v403_v7  ;;  %v260_v43 = vld [vmem:[%s18193_s21 + $0xb8] sm:$0xff] }
  0xdc   : > { %16923 = vmatprep.subr.bf16.mxu1 %v16922_v12  ;;  %v790_v11 = vld [vmem:[%s18199_s12 + $0xe48] sm:$0x3]  ;;  %v1500_v12 = vrot.slane %v1486_v4, %v18225_v25  ;;  %v420_v4 = vld [vmem:[%s18199_s12 + $0x2b8] sm:$0xff] }
  0xdd   : > { %v16950_v19 = vpack.c.bf16 %v790_v11, %v406_v10 }
  0xde   : > { %v1502_v20 = vcombine.high %v1500_v12, %v1500_v12 }
  0xe0   : > { %5098 = vmatmul.mubr.f32.vlgmr.msra.gmra.mrb[26].mxu0 %v1425_v0  ;;  %v1484_v0 = vcombine.high %v1476_v55, %v1476_v55 }
  0xe1   : > { %5168 = vmatmul.mubr.f32.vlgmr.msra.gmra.mrb[26].mxu1 %v1432_v3  ;;  %16921 = vmatpush1.bf16.xpose.msra.mxu0 %v16920_v26  ;;  %v16946_v3 = vpack.c.bf16 %v788_v60, %v404_v59  ;;  %v407_v26 = vld [vmem:[%s18199_s12 + $0x250] sm:$0xff]  ;;  %v1537_v59 = vcombine.high %v257_v52, %v257_v52  ;;  %v413_v60 = vld [vmem:[%s18199_s12 + $0x280] sm:$0xff] }
  0xe2   : > { %16925 = vmatpush1.bf16.xpose.msra.mxu1 %v16924_v27  ;;  %5237 = vmatprep.mubr.f32.mxu0 %v1450_v28  ;;  %v791_v27 = vld [vmem:[%s18199_s12 + $0xe50] sm:$0x3]  ;;  %v1510_v28 = vrot.slane %v255_v15, %v18225_v25  ;;  %v16968_v7 = vpack.c.bf16 %v797_v61, %v413_v60  ;;  %v801_v15 = vld [vmem:[%s18199_s12 + $0xea0] sm:$0x3]  ;;  %v816_v60 = vld [vmem:[%s18199_s12 + $0xf18] sm:$0x3] }
  0xe3   : > { %16927 = vmatprep.subr.bf16.mxu0 %v16926_v29  ;;  %5307 = vmatprep.mubr.f32.mxu1 %v1451_v30  ;;  %v410_v29 = vld [vmem:[%s18199_s12 + $0x268] sm:$0xff]  ;;  %v16956_v36 = vpack.c.bf16 %v791_v27, %v407_v26  ;;  %v261_v61 = vld [vmem:[%s18193_s21 + $0xc0] sm:$0xff] }
  0xe4   : > { %16931 = vmatprep.subr.bf16.mxu1 %v16930_v31  ;;  %v794_v30 = vld [vmem:[%s18199_s12 + $0xe68] sm:$0x3]  ;;  %v1517_v31 = vrot.slane %v1503_v22, %v18225_v25  ;;  %v424_v22 = vld [vmem:[%s18199_s12 + $0x2d8] sm:$0xff] }
  0xe5   : > { %v16958_v38 = vpack.c.bf16 %v794_v30, %v410_v29 }
  0xe6   : > { %v1519_v39 = vcombine.high %v1517_v31, %v1517_v31 }
  0xe8   : > { %5238 = vmatmul.mubr.f32.vlgmr.msra.gmra.mrb[28].mxu0 %v1442_v18  ;;  %v1501_v18 = vcombine.high %v1493_v9, %v1493_v9 }
  0xe9   : > { %5308 = vmatmul.mubr.f32.vlgmr.msra.gmra.mrb[28].mxu1 %v1449_v21  ;;  %16929 = vmatpush1.bf16.xpose.msra.mxu0 %v16928_v44  ;;  %v16954_v21 = vpack.c.bf16 %v792_v14, %v408_v13  ;;  %v411_v44 = vld [vmem:[%s18199_s12 + $0x270] sm:$0xff]  ;;  %v1554_v13 = vcombine.high %v258_v6, %v258_v6  ;;  %v417_v14 = vld [vmem:[%s18199_s12 + $0x2a0] sm:$0xff] }
  0xea   : > { %16933 = vmatpush1.bf16.xpose.msra.mxu1 %v16932_v45  ;;  %5377 = vmatprep.mubr.f32.mxu0 %v1467_v46  ;;  %v795_v45 = vld [vmem:[%s18199_s12 + $0xe70] sm:$0x3]  ;;  %v1527_v46 = vrot.slane %v256_v34, %v18225_v25  ;;  %v16976_v26 = vpack.c.bf16 %v801_v15, %v417_v14  ;;  %v805_v34 = vld [vmem:[%s18199_s12 + $0xec0] sm:$0x3]  ;;  %v820_v14 = vld [vmem:[%s18199_s12 + $0xf38] sm:$0x3] }
  0xeb   : > { %16935 = vmatprep.subr.bf16.mxu0 %v16934_v47  ;;  %5447 = vmatprep.mubr.f32.mxu1 %v1468_v48  ;;  %v414_v47 = vld [vmem:[%s18199_s12 + $0x288] sm:$0xff]  ;;  %v16964_v54 = vpack.c.bf16 %v795_v45, %v411_v44 }
  0xec   : > { %16939 = vmatprep.subr.bf16.mxu1 %v16938_v49  ;;  %v798_v48 = vld [vmem:[%s18199_s12 + $0xe88] sm:$0x3]  ;;  %v1534_v49 = vrot.slane %v1520_v41, %v18225_v25  ;;  %v428_v41 = vld [vmem:[%s18199_s12 + $0x2f8] sm:$0xff] }
  0xed   : > { %v16966_v56 = vpack.c.bf16 %v798_v48, %v414_v47  ;;  %v262_v15 = vld [vmem:[%s18193_s21 + $0xc8] sm:$0xff] }
  0xee   : > { %v1536_v57 = vcombine.high %v1534_v49, %v1534_v49 }
  0xf0   : > { %5378 = vmatmul.mubr.f32.vlgmr.msra.gmra.mrb[30].mxu0 %v1459_v37  ;;  %v1518_v37 = vcombine.high %v1510_v28, %v1510_v28 }
  0xf1   : > { %5448 = vmatmul.mubr.f32.vlgmr.msra.gmra.mrb[30].mxu1 %v1466_v40  ;;  %16937 = vmatpush1.bf16.xpose.msra.mxu0 %v16936_v62  ;;  %v16962_v40 = vpack.c.bf16 %v796_v33, %v412_v32  ;;  %v415_v62 = vld [vmem:[%s18199_s12 + $0x290] sm:$0xff]  ;;  %v1571_v32 = vcombine.high %v259_v24, %v259_v24  ;;  %v421_v33 = vld [vmem:[%s18199_s12 + $0x2c0] sm:$0xff] }
  0xf2   : > { %16941 = vmatpush1.bf16.xpose.msra.mxu1 %v16940_v63  ;;  %5517 = vmatprep.mubr.f32.mxu0 %v1484_v0  ;;  %v799_v63 = vld [vmem:[%s18199_s12 + $0xe90] sm:$0x3]  ;;  %v1544_v0 = vrot.slane %v257_v52, %v18225_v25  ;;  %v16984_v44 = vpack.c.bf16 %v805_v34, %v421_v33  ;;  %v809_v52 = vld [vmem:[%s18199_s12 + $0xee0] sm:$0x3]  ;;  %v824_v33 = vld [vmem:[%s18199_s12 + $0xf58] sm:$0x3] }
  0xf3   : > { %16943 = vmatprep.subr.bf16.mxu0 %v16942_v1  ;;  %5587 = vmatprep.mubr.f32.mxu1 %v1485_v2  ;;  %v418_v1 = vld [vmem:[%s18199_s12 + $0x2a8] sm:$0xff]  ;;  %v16972_v8 = vpack.c.bf16 %v799_v63, %v415_v62  ;;  %v263_v34 = vld [vmem:[%s18193_s21 + $0xd0] sm:$0xff] }
  0xf4   : > { %16947 = vmatprep.subr.bf16.mxu1 %v16946_v3  ;;  %v802_v2 = vld [vmem:[%s18199_s12 + $0xea8] sm:$0x3]  ;;  %v1551_v3 = vrot.slane %v1537_v59, %v18225_v25  ;;  %v432_v59 = vld [vmem:[%s18199_s12 + $0x318] sm:$0xff] }
  0xf5   : > { %v16974_v10 = vpack.c.bf16 %v802_v2, %v418_v1 }
  0xf6   : > { %v1553_v11 = vcombine.high %v1551_v3, %v1551_v3 }
  0xf8   : > { %5518 = vmatmul.mubr.f32.vlgmr.msra.gmra.mrb[32].mxu0 %v1476_v55  ;;  %v1535_v55 = vcombine.high %v1527_v46, %v1527_v46 }
  0xf9   : > { %5588 = vmatmul.mubr.f32.vlgmr.msra.gmra.mrb[32].mxu1 %v1483_v58  ;;  %16945 = vmatpush1.bf16.xpose.msra.mxu0 %v16944_v16  ;;  %v16970_v58 = vpack.c.bf16 %v800_v51, %v416_v50  ;;  %v419_v16 = vld [vmem:[%s18199_s12 + $0x2b0] sm:$0xff]  ;;  %v1588_v50 = vcombine.high %v260_v43, %v260_v43  ;;  %v425_v51 = vld [vmem:[%s18199_s12 + $0x2e0] sm:$0xff] }
  0xfa   : > { %16949 = vmatpush1.bf16.xpose.msra.mxu1 %v16948_v17  ;;  %5657 = vmatprep.mubr.f32.mxu0 %v1501_v18  ;;  %v803_v17 = vld [vmem:[%s18199_s12 + $0xeb0] sm:$0x3]  ;;  %v1561_v18 = vrot.slane %v258_v6, %v18225_v25  ;;  %v16992_v62 = vpack.c.bf16 %v809_v52, %v425_v51  ;;  %v813_v6 = vld [vmem:[%s18199_s12 + $0xf00] sm:$0x3]  ;;  %v828_v51 = vld [vmem:[%s18199_s12 + $0xf78] sm:$0x3] }
  0xfb   : > { %16951 = vmatprep.subr.bf16.mxu0 %v16950_v19  ;;  %5727 = vmatprep.mubr.f32.mxu1 %v1502_v20  ;;  %v422_v19 = vld [vmem:[%s18199_s12 + $0x2c8] sm:$0xff]  ;;  %v16980_v27 = vpack.c.bf16 %v803_v17, %v419_v16  ;;  %v264_v52 = vld [vmem:[%s18193_s21 + $0xd8] sm:$0xff] }
  0xfc   : > { %16955 = vmatprep.subr.bf16.mxu1 %v16954_v21  ;;  %v806_v20 = vld [vmem:[%s18199_s12 + $0xec8] sm:$0x3]  ;;  %v1568_v21 = vrot.slane %v1554_v13, %v18225_v25  ;;  %v436_v13 = vld [vmem:[%s18199_s12 + $0x338] sm:$0xff] }
  0xfd   : > { %v16982_v29 = vpack.c.bf16 %v806_v20, %v422_v19 }
  0xfe   : > { %v1570_v30 = vcombine.high %v1568_v21, %v1568_v21 }
 0x100   : > { %5658 = vmatmul.mubr.f32.vlgmr.msra.gmra.mrb[34].mxu0 %v1493_v9  ;;  %v1552_v9 = vcombine.high %v1544_v0, %v1544_v0 }
 0x101   : > { %5728 = vmatmul.mubr.f32.vlgmr.msra.gmra.mrb[34].mxu1 %v1500_v12  ;;  %16953 = vmatpush1.bf16.xpose.msra.mxu0 %v16952_v35  ;;  %v16978_v12 = vpack.c.bf16 %v804_v5, %v420_v4  ;;  %v423_v35 = vld [vmem:[%s18199_s12 + $0x2d0] sm:$0xff]  ;;  %v1605_v4 = vcombine.high %v261_v61, %v261_v61  ;;  %v429_v5 = vld [vmem:[%s18199_s12 + $0x300] sm:$0xff] }
 0x102   : > { %16957 = vmatpush1.bf16.xpose.msra.mxu1 %v16956_v36  ;;  %5797 = vmatprep.mubr.f32.mxu0 %v1518_v37  ;;  %v807_v36 = vld [vmem:[%s18199_s12 + $0xed0] sm:$0x3]  ;;  %v1578_v37 = vrot.slane %v259_v24, %v18225_v25  ;;  %v17000_v16 = vpack.c.bf16 %v813_v6, %v429_v5  ;;  %v817_v24 = vld [vmem:[%s18199_s12 + $0xf20] sm:$0x3]  ;;  %v832_v5 = vld [vmem:[%s18199_s12 + $0xf98] sm:$0x3] }
 0x103   : > { %16959 = vmatprep.subr.bf16.mxu0 %v16958_v38  ;;  %5867 = vmatprep.mubr.f32.mxu1 %v1519_v39  ;;  %v426_v38 = vld [vmem:[%s18199_s12 + $0x2e8] sm:$0xff]  ;;  %v16988_v45 = vpack.c.bf16 %v807_v36, %v423_v35  ;;  %v265_v6 = vld [vmem:[%s18193_s21 + $0xe0] sm:$0xff] }
 0x104   : > { %16963 = vmatprep.subr.bf16.mxu1 %v16962_v40  ;;  %v810_v39 = vld [vmem:[%s18199_s12 + $0xee8] sm:$0x3]  ;;  %v1585_v40 = vrot.slane %v1571_v32, %v18225_v25  ;;  %v440_v32 = vld [vmem:[%s18199_s12 + $0x358] sm:$0xff] }
 0x105   : > { %v16990_v47 = vpack.c.bf16 %v810_v39, %v426_v38 }
 0x106   : > { %v1587_v48 = vcombine.high %v1585_v40, %v1585_v40 }
 0x108   : > { %5798 = vmatmul.mubr.f32.vlgmr.msra.gmra.mrb[36].mxu0 %v1510_v28  ;;  %v1569_v28 = vcombine.high %v1561_v18, %v1561_v18 }
 0x109   : > { %5868 = vmatmul.mubr.f32.vlgmr.msra.gmra.mrb[36].mxu1 %v1517_v31  ;;  %16961 = vmatpush1.bf16.xpose.msra.mxu0 %v16960_v53  ;;  %v16986_v31 = vpack.c.bf16 %v808_v23, %v424_v22  ;;  %v427_v53 = vld [vmem:[%s18199_s12 + $0x2f0] sm:$0xff]  ;;  %v1622_v22 = vcombine.high %v262_v15, %v262_v15  ;;  %v433_v23 = vld [vmem:[%s18199_s12 + $0x320] sm:$0xff] }
 0x10a   : > { %16965 = vmatpush1.bf16.xpose.msra.mxu1 %v16964_v54  ;;  %5937 = vmatprep.mubr.f32.mxu0 %v1535_v55  ;;  %v811_v54 = vld [vmem:[%s18199_s12 + $0xef0] sm:$0x3]  ;;  %v1595_v55 = vrot.slane %v260_v43, %v18225_v25  ;;  %v17008_v35 = vpack.c.bf16 %v817_v24, %v433_v23  ;;  %v821_v43 = vld [vmem:[%s18199_s12 + $0xf40] sm:$0x3] }
 0x10b   : > { %16967 = vmatprep.subr.bf16.mxu0 %v16966_v56  ;;  %6007 = vmatprep.mubr.f32.mxu1 %v1536_v57  ;;  %v430_v56 = vld [vmem:[%s18199_s12 + $0x308] sm:$0xff]  ;;  %v16996_v63 = vpack.c.bf16 %v811_v54, %v427_v53 }
 0x10c   : > { %16971 = vmatprep.subr.bf16.mxu1 %v16970_v58  ;;  %v814_v57 = vld [vmem:[%s18199_s12 + $0xf08] sm:$0x3]  ;;  %v1602_v58 = vrot.slane %v1588_v50, %v18225_v25  ;;  %v444_v50 = vld [vmem:[%s18199_s12 + $0x378] sm:$0xff] }
 0x10d   : > { %v16998_v1 = vpack.c.bf16 %v814_v57, %v430_v56 }
 0x10e   : > { %v1604_v2 = vcombine.high %v1602_v58, %v1602_v58 }
 0x110   : > { %5938 = vmatmul.mubr.f32.vlgmr.msra.gmra.mrb[38].mxu0 %v1527_v46  ;;  %v1586_v46 = vcombine.high %v1578_v37, %v1578_v37 }
 0x111   : > { %6008 = vmatmul.mubr.f32.vlgmr.msra.gmra.mrb[38].mxu1 %v1534_v49  ;;  %16969 = vmatpush1.bf16.xpose.msra.mxu0 %v16968_v7  ;;  %v16994_v49 = vpack.c.bf16 %v812_v42, %v428_v41  ;;  %v431_v7 = vld [vmem:[%s18199_s12 + $0x310] sm:$0xff]  ;;  %v1639_v41 = vcombine.high %v263_v34, %v263_v34  ;;  %v437_v42 = vld [vmem:[%s18199_s12 + $0x340] sm:$0xff] }
 0x112   : > { %16973 = vmatpush1.bf16.xpose.msra.mxu1 %v16972_v8  ;;  %6077 = vmatprep.mubr.f32.mxu0 %v1552_v9  ;;  %v815_v8 = vld [vmem:[%s18199_s12 + $0xf10] sm:$0x3]  ;;  %v1612_v9 = vrot.slane %v261_v61, %v18225_v25  ;;  %v17016_v53 = vpack.c.bf16 %v821_v43, %v437_v42  ;;  %v825_v61 = vld [vmem:[%s18199_s12 + $0xf60] sm:$0x3] }
 0x113   : > { %16975 = vmatprep.subr.bf16.mxu0 %v16974_v10  ;;  %6147 = vmatprep.mubr.f32.mxu1 %v1553_v11  ;;  %v434_v10 = vld [vmem:[%s18199_s12 + $0x328] sm:$0xff]  ;;  %v17004_v17 = vpack.c.bf16 %v815_v8, %v431_v7 }
 0x114   : > { %16979 = vmatprep.subr.bf16.mxu1 %v16978_v12  ;;  %v818_v11 = vld [vmem:[%s18199_s12 + $0xf28] sm:$0x3]  ;;  %v1619_v12 = vrot.slane %v1605_v4, %v18225_v25  ;;  %v448_v4 = vld [vmem:[%s18199_s12 + $0x398] sm:$0xff] }
 0x115   : > { %v17006_v19 = vpack.c.bf16 %v818_v11, %v434_v10 }
 0x116   : > { %v1621_v20 = vcombine.high %v1619_v12, %v1619_v12 }
 0x118   : > { %6078 = vmatmul.mubr.f32.vlgmr.msra.gmra.mrb[40].mxu0 %v1544_v0  ;;  %v1603_v0 = vcombine.high %v1595_v55, %v1595_v55 }
 0x119   : > { %6148 = vmatmul.mubr.f32.vlgmr.msra.gmra.mrb[40].mxu1 %v1551_v3  ;;  %16977 = vmatpush1.bf16.xpose.msra.mxu0 %v16976_v26  ;;  %v17002_v3 = vpack.c.bf16 %v816_v60, %v432_v59  ;;  %v435_v26 = vld [vmem:[%s18199_s12 + $0x330] sm:$0xff]  ;;  %v1656_v59 = vcombine.high %v264_v52, %v264_v52  ;;  %v441_v60 = vld [vmem:[%s18199_s12 + $0x360] sm:$0xff] }
 0x11a   : > { %16981 = vmatpush1.bf16.xpose.msra.mxu1 %v16980_v27  ;;  %6217 = vmatprep.mubr.f32.mxu0 %v1569_v28  ;;  %v819_v27 = vld [vmem:[%s18199_s12 + $0xf30] sm:$0x3]  ;;  %v1629_v28 = vrot.slane %v262_v15, %v18225_v25  ;;  %v17024_v7 = vpack.c.bf16 %v825_v61, %v441_v60  ;;  %v829_v15 = vld [vmem:[%s18199_s12 + $0xf80] sm:$0x3] }
 0x11b   : > { %16983 = vmatprep.subr.bf16.mxu0 %v16982_v29  ;;  %6287 = vmatprep.mubr.f32.mxu1 %v1570_v30  ;;  %v438_v29 = vld [vmem:[%s18199_s12 + $0x348] sm:$0xff]  ;;  %v17012_v36 = vpack.c.bf16 %v819_v27, %v435_v26 }
 0x11c   : > { %16987 = vmatprep.subr.bf16.mxu1 %v16986_v31  ;;  %v822_v30 = vld [vmem:[%s18199_s12 + $0xf48] sm:$0x3]  ;;  %v1636_v31 = vrot.slane %v1622_v22, %v18225_v25 }
 0x11d   : > { %v17014_v38 = vpack.c.bf16 %v822_v30, %v438_v29  ;;  %v834_v22 = vld [vmem:[%s18199_s12 + $0xfa8] sm:$0x3]  ;;  %v836_v29 = vld [vmem:[%s18199_s12 + $0xfb8] sm:$0x3] }
 0x11e   : > { %v1638_v39 = vcombine.high %v1636_v31, %v1636_v31  ;;  %v266_v30 = vld [vmem:[%s18193_s21 + $0xe8] sm:$0xff] }
 0x11f   : > { %v1697_v42 = vrot.slane %v266_v30, %v18225_v25 }
 0x120   : > { %6218 = vmatmul.mubr.f32.vlgmr.msra.gmra.mrb[42].mxu0 %v1561_v18  ;;  %v1620_v18 = vcombine.high %v1612_v9, %v1612_v9 }
 0x121   : > { %6288 = vmatmul.mubr.f32.vlgmr.msra.gmra.mrb[42].mxu1 %v1568_v21  ;;  %16985 = vmatpush1.bf16.xpose.msra.mxu0 %v16984_v44  ;;  %v17010_v21 = vpack.c.bf16 %v820_v14, %v436_v13  ;;  %v439_v44 = vld [vmem:[%s18199_s12 + $0x350] sm:$0xff]  ;;  %v1673_v13 = vcombine.high %v265_v6, %v265_v6  ;;  %v445_v14 = vld [vmem:[%s18199_s12 + $0x380] sm:$0xff] }
 0x122   : > { %16989 = vmatpush1.bf16.xpose.msra.mxu1 %v16988_v45  ;;  %6357 = vmatprep.mubr.f32.mxu0 %v1586_v46  ;;  %v823_v45 = vld [vmem:[%s18199_s12 + $0xf50] sm:$0x3]  ;;  %v1646_v46 = vrot.slane %v263_v34, %v18225_v25 }
 0x123   : > { %16991 = vmatprep.subr.bf16.mxu0 %v16990_v47  ;;  %6427 = vmatprep.mubr.f32.mxu1 %v1587_v48  ;;  %v442_v47 = vld [vmem:[%s18199_s12 + $0x368] sm:$0xff]  ;;  %v17020_v54 = vpack.c.bf16 %v823_v45, %v439_v44  ;;  %v1687_v23 = vrot.slane %v1673_v13, %v18225_v25  ;;  %v268_v13 = vld [vmem:[%s18193_s21 + $0xf8] sm:$0xff] }
 0x124   : > { %16995 = vmatprep.subr.bf16.mxu1 %v16994_v49  ;;  %v826_v48 = vld [vmem:[%s18199_s12 + $0xf68] sm:$0x3]  ;;  %v1653_v49 = vrot.slane %v1639_v41, %v18225_v25  ;;  %v835_v41 = vld [vmem:[%s18199_s12 + $0xfb0] sm:$0x3] }
 0x125   : > { %v17022_v56 = vpack.c.bf16 %v826_v48, %v442_v47  ;;  %v454_v45 = vld [vmem:[%s18199_s12 + $0x3c8] sm:$0xff] }
 0x126   : > { %v1655_v57 = vcombine.high %v1653_v49, %v1653_v49 }
 0x128   : > { %6358 = vmatmul.mubr.f32.vlgmr.msra.gmra.mrb[44].mxu0 %v1578_v37  ;;  %v1637_v37 = vcombine.high %v1629_v28, %v1629_v28 }
 0x129   : > { %6428 = vmatmul.mubr.f32.vlgmr.msra.gmra.mrb[44].mxu1 %v1585_v40  ;;  %16993 = vmatpush1.bf16.xpose.msra.mxu0 %v16992_v62  ;;  %v17018_v40 = vpack.c.bf16 %v824_v33, %v440_v32  ;;  %v443_v62 = vld [vmem:[%s18199_s12 + $0x370] sm:$0xff] }
 0x12a   : > { %16997 = vmatpush1.bf16.xpose.msra.mxu1 %v16996_v63  ;;  %6497 = vmatprep.mubr.f32.mxu0 %v1603_v0  ;;  %v827_v63 = vld [vmem:[%s18199_s12 + $0xf70] sm:$0x3]  ;;  %v1663_v0 = vrot.slane %v264_v52, %v18225_v25  ;;  %v840_v52 = vld [vmem:[%s18199_s12 + $0xfd8] sm:$0x3] }
 0x12b   : > { %16999 = vmatprep.subr.bf16.mxu0 %v16998_v1  ;;  %6567 = vmatprep.mubr.f32.mxu1 %v1604_v2  ;;  %v446_v1 = vld [vmem:[%s18199_s12 + $0x388] sm:$0xff]  ;;  %v17028_v8 = vpack.c.bf16 %v827_v63, %v443_v62  ;;  %v453_v62 = vld [vmem:[%s18199_s12 + $0x3c0] sm:$0xff] }
 0x12c   : > { %17003 = vmatprep.subr.bf16.mxu1 %v17002_v3  ;;  %v830_v2 = vld [vmem:[%s18199_s12 + $0xf88] sm:$0x3]  ;;  %v1670_v3 = vrot.slane %v1656_v59, %v18225_v25  ;;  %v837_v63 = vld [vmem:[%s18199_s12 + $0xfc0] sm:$0x3] }
 0x12d   : > { %v17030_v10 = vpack.c.bf16 %v830_v2, %v446_v1  ;;  %v839_v1 = vld [vmem:[%s18199_s12 + $0xfd0] sm:$0x3] }
 0x12e   : > { %v1672_v11 = vcombine.high %v1670_v3, %v1670_v3 }
 0x130   : > { %6498 = vmatmul.mubr.f32.vlgmr.msra.gmra.mrb[46].mxu0 %v1595_v55  ;;  %v1654_v55 = vcombine.high %v1646_v46, %v1646_v46 }
 0x131   : > { %6568 = vmatmul.mubr.f32.vlgmr.msra.gmra.mrb[46].mxu1 %v1602_v58  ;;  %17001 = vmatpush1.bf16.xpose.msra.mxu0 %v17000_v16  ;;  %v17026_v58 = vpack.c.bf16 %v828_v51, %v444_v50  ;;  %v447_v16 = vld [vmem:[%s18199_s12 + $0x390] sm:$0xff]  ;;  %v456_v51 = vld [vmem:[%s18199_s12 + $0x3d8] sm:$0xff] }
 0x132   : > { %17005 = vmatpush1.bf16.xpose.msra.mxu1 %v17004_v17  ;;  %6637 = vmatprep.mubr.f32.mxu0 %v1620_v18  ;;  %v831_v17 = vld [vmem:[%s18199_s12 + $0xf90] sm:$0x3]  ;;  %v1680_v18 = vrot.slane %v265_v6, %v18225_v25  ;;  %v17050_v60 = vpack.c.bf16 %v840_v52, %v456_v51  ;;  %v842_v6 = vld [vmem:[%s18199_s12 + $0xfe8] sm:$0x3] }
 0x133   : > { %17007 = vmatprep.subr.bf16.mxu0 %v17006_v19  ;;  %6707 = vmatprep.mubr.f32.mxu1 %v1621_v20  ;;  %v17036_v32 = vpack.c.bf16 %v831_v17, %v447_v16 }
 0x134   : > { %17011 = vmatprep.subr.bf16.mxu1 %v17010_v21  ;;  %v450_v21 = vld [vmem:[%s18199_s12 + $0x3a8] sm:$0xff]  ;;  %v1688_v33 = vcombine.high %v1680_v18, %v1680_v18 }
 0x135   : > { %v17038_v34 = vpack.c.bf16 %v834_v22, %v450_v21  ;;  %v1724_v21 = vcombine.high %v268_v13, %v268_v13  ;;  %v457_v22 = vld [vmem:[%s18199_s12 + $0x3e0] sm:$0xff] }
 0x138   : > { %6638 = vmatmul.mubr.f32.vlgmr.msra.gmra.mrb[48].mxu0 %v1612_v9  ;;  %v1671_v9 = vcombine.high %v1663_v0, %v1663_v0 }
 0x139   : > { %6708 = vmatmul.mubr.f32.vlgmr.msra.gmra.mrb[48].mxu1 %v1619_v12  ;;  %17009 = vmatpush1.bf16.xpose.msra.mxu0 %v17008_v35  ;;  %v17034_v12 = vpack.c.bf16 %v832_v5, %v448_v4  ;;  %v1689_v35 = vcombine.high %v1687_v23, %v1687_v23  ;;  %v458_v5 = vld [vmem:[%s18199_s12 + $0x3e8] sm:$0xff] }
 0x13a   : > { %17013 = vmatpush1.bf16.xpose.msra.mxu1 %v17012_v36  ;;  %6777 = vmatprep.mubr.f32.mxu0 %v1637_v37  ;;  %v1690_v37 = vcombine.high %v266_v30, %v266_v30  ;;  %v462_v30 = vld [vmem:[%s18199_s12 + $0x408] sm:$0xff] }
 0x13b   : > { %17015 = vmatprep.subr.bf16.mxu0 %v17014_v38  ;;  %6847 = vmatprep.mubr.f32.mxu1 %v1638_v39  ;;  %v449_v38 = vld [vmem:[%s18199_s12 + $0x3a0] sm:$0xff] }
 0x13c   : > { %17019 = vmatprep.subr.bf16.mxu1 %v17018_v40  ;;  %v833_v39 = vld [vmem:[%s18199_s12 + $0xfa0] sm:$0x3]  ;;  %v451_v40 = vld [vmem:[%s18199_s12 + $0x3b0] sm:$0xff]  ;;  %v1704_v47 = vrot.slane %v1690_v37, %v18225_v25  ;;  %v848_v37 = vld [vmem:[%s18199_s12 + $0x1018] sm:$0x3] }
 0x13e   : > { %v1706_v59 = vcombine.high %v1704_v47, %v1704_v47 }
 0x140   : > { %6778 = vmatmul.mubr.f32.vlgmr.msra.gmra.mrb[50].mxu0 %v1629_v28  ;;  %v452_v28 = vld [vmem:[%s18199_s12 + $0x3b8] sm:$0xff] }
 0x141   : > { %6848 = vmatmul.mubr.f32.vlgmr.msra.gmra.mrb[50].mxu1 %v1636_v31  ;;  %17017 = vmatpush1.bf16.xpose.msra.mxu0 %v17016_v53  ;;  %v17032_v31 = vpack.c.bf16 %v829_v15, %v445_v14  ;;  %v17042_v36 = vpack.c.bf16 %v836_v29, %v452_v28  ;;  %v267_v53 = vld [vmem:[%s18193_s21 + $0xf0] sm:$0xff]  ;;  %v17048_v14 = vpack.c.bf16 %v837_v63, %v453_v62  ;;  %v270_v62 = vld [vmem:[%s18193_s21 + $0x108] sm:$0xff] }
 0x142   : > { %17021 = vmatpush1.bf16.xpose.msra.mxu1 %v17020_v54  ;;  %6917 = vmatprep.mubr.f32.mxu0 %v1654_v55  ;;  %v17040_v54 = vpack.c.bf16 %v833_v39, %v449_v38  ;;  %v17044_v55 = vpack.c.bf16 %v835_v41, %v451_v40  ;;  %v1707_v61 = vcombine.high %v267_v53, %v267_v53  ;;  %v269_v38 = vld [vmem:[%s18193_s21 + $0x100] sm:$0xff] }
 0x143   : > { %17023 = vmatprep.subr.bf16.mxu0 %v17022_v56  ;;  %6987 = vmatprep.mubr.f32.mxu1 %v1655_v57  ;;  %v1705_v57 = vcombine.high %v1697_v42, %v1697_v42  ;;  %v1714_v2 = vrot.slane %v267_v53, %v18225_v25  ;;  %v1748_v51 = vrot.slane %v269_v38, %v18225_v25 }
 0x144   : > { %17027 = vmatprep.subr.bf16.mxu1 %v17026_v58 }
 0x145   : > { %v1722_v17 = vcombine.high %v1714_v2, %v1714_v2 }
 0x148   : > { %6918 = vmatmul.mubr.f32.vlgmr.msra.gmra.mrb[52].mxu0 %v1646_v46  ;;  %v838_v46 = vld [vmem:[%s18199_s12 + $0xfc8] sm:$0x3] }
 0x149   : > { %6988 = vmatmul.mubr.f32.vlgmr.msra.gmra.mrb[52].mxu1 %v1653_v49  ;;  %17025 = vmatpush1.bf16.xpose.msra.mxu0 %v17024_v7  ;;  %v17046_v58 = vpack.c.bf16 %v838_v46, %v454_v45  ;;  %v1721_v7 = vrot.slane %v1707_v61, %v18225_v25  ;;  %v1741_v46 = vcombine.high %v269_v38, %v269_v38  ;;  %v852_v61 = vld [vmem:[%s18199_s12 + $0x1038] sm:$0x3] }
 0x14a   : > { %17029 = vmatpush1.bf16.xpose.msra.mxu1 %v17028_v8  ;;  %7057 = vmatprep.mubr.f32.mxu0 %v1671_v9 }
 0x14b   : > { %17031 = vmatprep.subr.bf16.mxu0 %v17030_v10  ;;  %v3279_v19 = vpop.f32.mrb[0].mxu0  ;;  %7127 = vmatprep.mubr.f32.mxu1 %v1672_v11  ;;  %v460_v11 = vld [vmem:[%s18199_s12 + $0x3f8] sm:$0xff] }
 0x14c   : > { %v3349_v20 = vpop.f32.mrb[0].mxu1  ;;  %17035 = vmatprep.subr.bf16.mxu1 %v17034_v12  ;;  %v3281_v26 = vpop.f32.mrb[1].mxu0  ;;  %v844_v12 = vld [vmem:[%s18199_s12 + $0xff8] sm:$0x3] }
 0x14d   : > { %v3350_v24 = vadd.f32 %v3349_v20, %v3279_v19  ;;  %v3351_v27 = vpop.f32.mrb[1].mxu1  ;;  %v1723_v19 = vcombine.high %v1721_v7, %v1721_v7  ;;  %v17058_v20 = vpack.c.bf16 %v844_v12, %v460_v11  ;;  %v843_v26 = vld [vmem:[%s18199_s12 + $0xff0] sm:$0x3]  ;;  %v1765_v11 = vrot.slane %v270_v62, %v18225_v25 }
 0x14e   : > { %v1731_v27 = vrot.slane %v268_v13, %v18225_v25 }
 0x150   : > { %7058 = vmatmul.mubr.f32.vlgmr.msra.gmra.mrb[54].mxu0 %v1663_v0  ;;  %v455_v0 = vld [vmem:[%s18199_s12 + $0x3d0] sm:$0xff] }
 0x151   : > { %7128 = vmatmul.mubr.f32.vlgmr.msra.gmra.mrb[54].mxu1 %v1670_v3  ;;  %17033 = vmatpush1.bf16.xpose.msra.mxu0 %v17032_v31  ;;  %v17052_v15 = vpack.c.bf16 %v839_v1, %v455_v0  ;;  %v846_v31 = vld [vmem:[%s18199_s12 + $0x1008] sm:$0x3] }
 0x152   : > { %17037 = vmatpush1.bf16.xpose.msra.mxu1 %v17036_v32  ;;  %7197 = vmatprep.mubr.f32.mxu0 %v1688_v33  ;;  %v1738_v32 = vrot.slane %v1724_v21, %v18225_v25  ;;  %v856_v21 = vld [vmem:[%s18199_s12 + $0x1058] sm:$0x3] }
 0x153   : > { %17039 = vmatprep.subr.bf16.mxu0 %v17038_v34  ;;  %v3419_v43 = vpop.f32.mrb[2].mxu0  ;;  %7267 = vmatprep.mubr.f32.mxu1 %v1689_v35 }
 0x154   : > { %v3489_v44 = vpop.f32.mrb[2].mxu1  ;;  %17043 = vmatprep.subr.bf16.mxu1 %v17042_v36  ;;  %v3420_v48 = vadd.f32 %v3419_v43, %v3350_v24  ;;  %v3421_v49 = vpop.f32.mrb[3].mxu0  ;;  %v459_v24 = vld [vmem:[%s18199_s12 + $0x3f0] sm:$0xff]  ;;  %v464_v36 = vld [vmem:[%s18199_s12 + $0x418] sm:$0xff]  ;;  %v17062_v43 = vpack.c.bf16 %v846_v31, %v462_v30 }
 0x155   : > { %v3491_v50 = vpop.f32.mrb[3].mxu1  ;;  %v17060_v40 = vpack.c.bf16 %v843_v26, %v459_v24  ;;  %v17066_v45 = vpack.c.bf16 %v848_v37, %v464_v36  ;;  %v463_v49 = vld [vmem:[%s18199_s12 + $0x410] sm:$0xff] }
 0x156   : > { %v3490_v56 = vadd.f32 %v3489_v44, %v3420_v48  ;;  %v1740_v44 = vcombine.high %v1738_v32, %v1738_v32  ;;  %v845_v48 = vld [vmem:[%s18199_s12 + $0x1000] sm:$0x3]  ;;  %v847_v50 = vld [vmem:[%s18199_s12 + $0x1010] sm:$0x3] }
 0x157   : > { %v17068_v0 = vpack.c.bf16 %v847_v50, %v463_v49 }
 0x158   : > { %7198 = vmatmul.mubr.f32.vlgmr.msra.gmra.mrb[56].mxu0 %v1680_v18  ;;  %v17054_v18 = vpack.c.bf16 %v842_v6, %v458_v5  ;;  %v1758_v6 = vcombine.high %v270_v62, %v270_v62 }
 0x159   : > { %7268 = vmatmul.mubr.f32.vlgmr.msra.gmra.mrb[56].mxu1 %v1687_v23  ;;  %17041 = vmatpush1.bf16.xpose.msra.mxu0 %v17040_v54  ;;  %v841_v23 = vld [vmem:[%s18199_s12 + $0xfe0] sm:$0x3]  ;;  %v466_v54 = vld [vmem:[%s18199_s12 + $0x428] sm:$0xff] }
 0x15a   : > { %17045 = vmatpush1.bf16.xpose.msra.mxu1 %v17044_v55  ;;  %7337 = vmatprep.mubr.f32.mxu0 %v1705_v57  ;;  %v17056_v39 = vpack.c.bf16 %v841_v23, %v457_v22  ;;  %v850_v55 = vld [vmem:[%s18199_s12 + $0x1028] sm:$0x3]  ;;  %v271_v22 = vld [vmem:[%s18193_s21 + $0x110] sm:$0xff] }
 0x15b   : > { %17047 = vmatprep.subr.bf16.mxu0 %v17046_v58  ;;  %v3559_v3 = vpop.f32.mrb[4].mxu0  ;;  %7407 = vmatprep.mubr.f32.mxu1 %v1706_v59  ;;  %v1775_v31 = vcombine.high %v271_v22, %v271_v22  ;;  %v1782_v36 = vrot.slane %v271_v22, %v18225_v25 }
 0x15c   : > { %v3629_v4 = vpop.f32.mrb[4].mxu1  ;;  %17051 = vmatprep.subr.bf16.mxu1 %v17050_v60  ;;  %v3560_v8 = vadd.f32 %v3559_v3, %v3490_v56  ;;  %v3561_v9 = vpop.f32.mrb[5].mxu0  ;;  %v1755_v56 = vrot.slane %v1741_v46, %v18225_v25  ;;  %v468_v60 = vld [vmem:[%s18199_s12 + $0x438] sm:$0xff]  ;;  %v17070_v3 = vpack.c.bf16 %v850_v55, %v466_v54 }
 0x15d   : > { %v3631_v10 = vpop.f32.mrb[5].mxu1  ;;  %v17074_v5 = vpack.c.bf16 %v852_v61, %v468_v60  ;;  %v467_v9 = vld [vmem:[%s18199_s12 + $0x430] sm:$0xff]  ;;  %v860_v46 = vld [vmem:[%s18199_s12 + $0x1078] sm:$0x3] }
 0x15e   : > { %v3630_v16 = vadd.f32 %v3629_v4, %v3560_v8  ;;  %v1757_v4 = vcombine.high %v1755_v56, %v1755_v56  ;;  %v849_v8 = vld [vmem:[%s18199_s12 + $0x1020] sm:$0x3]  ;;  %v851_v10 = vld [vmem:[%s18199_s12 + $0x1030] sm:$0x3] }
 0x15f   : > { %v17076_v24 = vpack.c.bf16 %v851_v10, %v467_v9 }
 0x160   : > { %7338 = vmatmul.mubr.f32.vlgmr.msra.gmra.mrb[58].mxu0 %v1697_v42  ;;  %v1739_v42 = vcombine.high %v1731_v27, %v1731_v27 }
 0x161   : > { %7408 = vmatmul.mubr.f32.vlgmr.msra.gmra.mrb[58].mxu1 %v1704_v47  ;;  %17049 = vmatpush1.bf16.xpose.msra.mxu0 %v17048_v14  ;;  %v461_v47 = vld [vmem:[%s18199_s12 + $0x400] sm:$0xff]  ;;  %v470_v14 = vld [vmem:[%s18199_s12 + $0x448] sm:$0xff] }
 0x162   : > { %17053 = vmatpush1.bf16.xpose.msra.mxu1 %v17052_v15  ;;  %7477 = vmatprep.mubr.f32.mxu0 %v1722_v17  ;;  %v17064_v63 = vpack.c.bf16 %v845_v48, %v461_v47  ;;  %v854_v15 = vld [vmem:[%s18199_s12 + $0x1048] sm:$0x3]  ;;  %v272_v47 = vld [vmem:[%s18193_s21 + $0x118] sm:$0xff] }
 0x163   : > { %17055 = vmatprep.subr.bf16.mxu0 %v17054_v18  ;;  %v3699_v28 = vpop.f32.mrb[6].mxu0  ;;  %7547 = vmatprep.mubr.f32.mxu1 %v1723_v19  ;;  %v1792_v55 = vcombine.high %v272_v47, %v272_v47  ;;  %v1799_v60 = vrot.slane %v272_v47, %v18225_v25 }
 0x164   : > { %v3769_v29 = vpop.f32.mrb[6].mxu1  ;;  %17059 = vmatprep.subr.bf16.mxu1 %v17058_v20  ;;  %v3700_v33 = vadd.f32 %v3699_v28, %v3630_v16  ;;  %v3701_v34 = vpop.f32.mrb[7].mxu0  ;;  %v1772_v16 = vrot.slane %v1758_v6, %v18225_v25  ;;  %v472_v20 = vld [vmem:[%s18199_s12 + $0x458] sm:$0xff]  ;;  %v17078_v28 = vpack.c.bf16 %v854_v15, %v470_v14 }
 0x165   : > { %v3771_v35 = vpop.f32.mrb[7].mxu1  ;;  %v17082_v30 = vpack.c.bf16 %v856_v21, %v472_v20  ;;  %v471_v34 = vld [vmem:[%s18199_s12 + $0x450] sm:$0xff]  ;;  %v864_v6 = vld [vmem:[%s18199_s12 + $0x1098] sm:$0x3] }
 0x166   : > { %v3770_v41 = vadd.f32 %v3769_v29, %v3700_v33  ;;  %v1774_v29 = vcombine.high %v1772_v16, %v1772_v16  ;;  %v853_v33 = vld [vmem:[%s18199_s12 + $0x1040] sm:$0x3]  ;;  %v855_v35 = vld [vmem:[%s18199_s12 + $0x1050] sm:$0x3] }
 0x167   : > { %v17084_v49 = vpack.c.bf16 %v855_v35, %v471_v34 }
 0x168   : > { %7478 = vmatmul.mubr.f32.vlgmr.msra.gmra.mrb[60].mxu0 %v1714_v2  ;;  %v1756_v2 = vcombine.high %v1748_v51, %v1748_v51 }
 0x169   : > { %7548 = vmatmul.mubr.f32.vlgmr.msra.gmra.mrb[60].mxu1 %v1721_v7  ;;  %17057 = vmatpush1.bf16.xpose.msra.mxu0 %v17056_v39  ;;  %v465_v7 = vld [vmem:[%s18199_s12 + $0x420] sm:$0xff]  ;;  %v474_v39 = vld [vmem:[%s18199_s12 + $0x468] sm:$0xff] }
 0x16a   : > { %17061 = vmatpush1.bf16.xpose.msra.mxu1 %v17060_v40  ;;  %7617 = vmatprep.mubr.f32.mxu0 %v1739_v42  ;;  %v17072_v23 = vpack.c.bf16 %v849_v8, %v465_v7  ;;  %v858_v40 = vld [vmem:[%s18199_s12 + $0x1068] sm:$0x3]  ;;  %v273_v7 = vld [vmem:[%s18193_s21 + $0x120] sm:$0xff] }
 0x16b   : > { %17063 = vmatprep.subr.bf16.mxu0 %v17062_v43  ;;  %v3839_v52 = vpop.f32.mrb[8].mxu0  ;;  %7687 = vmatprep.mubr.f32.mxu1 %v1740_v44  ;;  %v1809_v15 = vcombine.high %v273_v7, %v273_v7  ;;  %v1816_v20 = vrot.slane %v273_v7, %v18225_v25 }
 0x16c   : > { %v3909_v53 = vpop.f32.mrb[8].mxu1  ;;  %17067 = vmatprep.subr.bf16.mxu1 %v17066_v45  ;;  %v3840_v57 = vadd.f32 %v3839_v52, %v3770_v41  ;;  %v3841_v58 = vpop.f32.mrb[9].mxu0  ;;  %v1789_v41 = vrot.slane %v1775_v31, %v18225_v25  ;;  %v476_v45 = vld [vmem:[%s18199_s12 + $0x478] sm:$0xff]  ;;  %v17086_v52 = vpack.c.bf16 %v858_v40, %v474_v39 }
 0x16d   : > { %v3911_v59 = vpop.f32.mrb[9].mxu1  ;;  %v17090_v54 = vpack.c.bf16 %v860_v46, %v476_v45  ;;  %v475_v58 = vld [vmem:[%s18199_s12 + $0x470] sm:$0xff]  ;;  %v868_v31 = vld [vmem:[%s18199_s12 + $0x10b8] sm:$0x3] }
 0x16e   : > { %v3910_v1 = vadd.f32 %v3909_v53, %v3840_v57  ;;  %v1791_v53 = vcombine.high %v1789_v41, %v1789_v41  ;;  %v857_v57 = vld [vmem:[%s18199_s12 + $0x1060] sm:$0x3]  ;;  %v859_v59 = vld [vmem:[%s18199_s12 + $0x1070] sm:$0x3] }
 0x16f   : > { %v17092_v9 = vpack.c.bf16 %v859_v59, %v475_v58 }
 0x170   : > { %7618 = vmatmul.mubr.f32.vlgmr.msra.gmra.mrb[62].mxu0 %v1731_v27  ;;  %v1773_v27 = vcombine.high %v1765_v11, %v1765_v11 }
 0x171   : > { %7688 = vmatmul.mubr.f32.vlgmr.msra.gmra.mrb[62].mxu1 %v1738_v32  ;;  %17065 = vmatpush1.bf16.xpose.msra.mxu0 %v17064_v63  ;;  %v469_v32 = vld [vmem:[%s18199_s12 + $0x440] sm:$0xff]  ;;  %v478_v63 = vld [vmem:[%s18199_s12 + $0x488] sm:$0xff] }
 0x172   : > { %17069 = vmatpush1.bf16.xpose.msra.mxu1 %v17068_v0  ;;  %7757 = vmatprep.mubr.f32.mxu0 %v1756_v2  ;;  %v17080_v48 = vpack.c.bf16 %v853_v33, %v469_v32  ;;  %v862_v0 = vld [vmem:[%s18199_s12 + $0x1088] sm:$0x3] }
 0x173   : > { %17071 = vmatprep.subr.bf16.mxu0 %v17070_v3  ;;  %v3979_v12 = vpop.f32.mrb[10].mxu0  ;;  %7827 = vmatprep.mubr.f32.mxu1 %v1757_v4  ;;  %v274_v32 = vld [vmem:[%s18193_s21 + $0x128] sm:$0xff] }
 0x174   : > { %v4049_v13 = vpop.f32.mrb[10].mxu1  ;;  %17075 = vmatprep.subr.bf16.mxu1 %v17074_v5  ;;  %v3980_v17 = vadd.f32 %v3979_v12, %v3910_v1  ;;  %v3981_v18 = vpop.f32.mrb[11].mxu0  ;;  %v1806_v1 = vrot.slane %v1792_v55, %v18225_v25  ;;  %v480_v5 = vld [vmem:[%s18199_s12 + $0x498] sm:$0xff]  ;;  %v17094_v12 = vpack.c.bf16 %v862_v0, %v478_v63  ;;  %v1826_v40 = vcombine.high %v274_v32, %v274_v32 }
 0x175   : > { %v4051_v19 = vpop.f32.mrb[11].mxu1  ;;  %v17098_v14 = vpack.c.bf16 %v864_v6, %v480_v5  ;;  %v479_v18 = vld [vmem:[%s18199_s12 + $0x490] sm:$0xff]  ;;  %v1833_v45 = vrot.slane %v274_v32, %v18225_v25  ;;  %v872_v55 = vld [vmem:[%s18199_s12 + $0x10d8] sm:$0x3] }
 0x176   : > { %v4050_v26 = vadd.f32 %v4049_v13, %v3980_v17  ;;  %v1808_v13 = vcombine.high %v1806_v1, %v1806_v1  ;;  %v861_v17 = vld [vmem:[%s18199_s12 + $0x1080] sm:$0x3]  ;;  %v863_v19 = vld [vmem:[%s18199_s12 + $0x1090] sm:$0x3] }
 0x177   : > { %v17100_v34 = vpack.c.bf16 %v863_v19, %v479_v18 }
 0x178   : > { %7758 = vmatmul.mubr.f32.vlgmr.msra.gmra.mrb[64].mxu0 %v1748_v51  ;;  %v1790_v51 = vcombine.high %v1782_v36, %v1782_v36 }
 0x179   : > { %7828 = vmatmul.mubr.f32.vlgmr.msra.gmra.mrb[64].mxu1 %v1755_v56  ;;  %17073 = vmatpush1.bf16.xpose.msra.mxu0 %v17072_v23  ;;  %v473_v56 = vld [vmem:[%s18199_s12 + $0x460] sm:$0xff]  ;;  %v482_v23 = vld [vmem:[%s18199_s12 + $0x4a8] sm:$0xff] }
 0x17a   : > { %17077 = vmatpush1.bf16.xpose.msra.mxu1 %v17076_v24  ;;  %7897 = vmatprep.mubr.f32.mxu0 %v1773_v27  ;;  %v17088_v8 = vpack.c.bf16 %v857_v57, %v473_v56  ;;  %v866_v24 = vld [vmem:[%s18199_s12 + $0x10a8] sm:$0x3]  ;;  %v275_v56 = vld [vmem:[%s18193_s21 + $0x130] sm:$0xff] }
 0x17b   : > { %17079 = vmatprep.subr.bf16.mxu0 %v17078_v28  ;;  %v4119_v37 = vpop.f32.mrb[12].mxu0  ;;  %7967 = vmatprep.mubr.f32.mxu1 %v1774_v29  ;;  %v1843_v0 = vcombine.high %v275_v56, %v275_v56  ;;  %v1850_v5 = vrot.slane %v275_v56, %v18225_v25 }
 0x17c   : > { %v4189_v38 = vpop.f32.mrb[12].mxu1  ;;  %17083 = vmatprep.subr.bf16.mxu1 %v17082_v30  ;;  %v4120_v42 = vadd.f32 %v4119_v37, %v4050_v26  ;;  %v4121_v43 = vpop.f32.mrb[13].mxu0  ;;  %v1823_v26 = vrot.slane %v1809_v15, %v18225_v25  ;;  %v484_v30 = vld [vmem:[%s18199_s12 + $0x4b8] sm:$0xff]  ;;  %v17102_v37 = vpack.c.bf16 %v866_v24, %v482_v23 }
 0x17d   : > { %v4191_v44 = vpop.f32.mrb[13].mxu1  ;;  %v17106_v39 = vpack.c.bf16 %v868_v31, %v484_v30  ;;  %v483_v43 = vld [vmem:[%s18199_s12 + $0x4b0] sm:$0xff]  ;;  %v876_v15 = vld [vmem:[%s18199_s12 + $0x10f8] sm:$0x3] }
 0x17e   : > { %v4190_v50 = vadd.f32 %v4189_v38, %v4120_v42  ;;  %v1825_v38 = vcombine.high %v1823_v26, %v1823_v26  ;;  %v865_v42 = vld [vmem:[%s18199_s12 + $0x10a0] sm:$0x3]  ;;  %v867_v44 = vld [vmem:[%s18199_s12 + $0x10b0] sm:$0x3] }
 0x17f   : > { %v17108_v58 = vpack.c.bf16 %v867_v44, %v483_v43 }
 0x180   : > { %7898 = vmatmul.mubr.f32.vlgmr.msra.gmra.mrb[66].mxu0 %v1765_v11  ;;  %v1807_v11 = vcombine.high %v1799_v60, %v1799_v60 }
 0x181   : > { %7968 = vmatmul.mubr.f32.vlgmr.msra.gmra.mrb[66].mxu1 %v1772_v16  ;;  %17081 = vmatpush1.bf16.xpose.msra.mxu0 %v17080_v48  ;;  %v477_v16 = vld [vmem:[%s18199_s12 + $0x480] sm:$0xff]  ;;  %v486_v48 = vld [vmem:[%s18199_s12 + $0x4c8] sm:$0xff] }
 0x182   : > { %17085 = vmatpush1.bf16.xpose.msra.mxu1 %v17084_v49  ;;  %8037 = vmatprep.mubr.f32.mxu0 %v1790_v51  ;;  %v17096_v33 = vpack.c.bf16 %v861_v17, %v477_v16  ;;  %v870_v49 = vld [vmem:[%s18199_s12 + $0x10c8] sm:$0x3]  ;;  %v276_v16 = vld [vmem:[%s18193_s21 + $0x138] sm:$0xff] }
 0x183   : > { %17087 = vmatprep.subr.bf16.mxu0 %v17086_v52  ;;  %v4259_v61 = vpop.f32.mrb[14].mxu0  ;;  %8107 = vmatprep.mubr.f32.mxu1 %v1791_v53  ;;  %v1860_v24 = vcombine.high %v276_v16, %v276_v16  ;;  %v1867_v30 = vrot.slane %v276_v16, %v18225_v25 }
 0x184   : > { %v4329_v62 = vpop.f32.mrb[14].mxu1  ;;  %17091 = vmatprep.subr.bf16.mxu1 %v17090_v54  ;;  %v4260_v2 = vadd.f32 %v4259_v61, %v4190_v50  ;;  %v4261_v3 = vpop.f32.mrb[15].mxu0  ;;  %v1840_v50 = vrot.slane %v1826_v40, %v18225_v25  ;;  %v488_v54 = vld [vmem:[%s18199_s12 + $0x4d8] sm:$0xff]  ;;  %v17110_v61 = vpack.c.bf16 %v870_v49, %v486_v48 }
 0x185   : > { %v4331_v4 = vpop.f32.mrb[15].mxu1  ;;  %v17114_v63 = vpack.c.bf16 %v872_v55, %v488_v54  ;;  %v487_v3 = vld [vmem:[%s18199_s12 + $0x4d0] sm:$0xff]  ;;  %v880_v40 = vld [vmem:[%s18199_s12 + $0x1118] sm:$0x3] }
 0x186   : > { %v4330_v10 = vadd.f32 %v4329_v62, %v4260_v2  ;;  %v1842_v62 = vcombine.high %v1840_v50, %v1840_v50  ;;  %v869_v2 = vld [vmem:[%s18199_s12 + $0x10c0] sm:$0x3]  ;;  %v871_v4 = vld [vmem:[%s18199_s12 + $0x10d0] sm:$0x3] }
 0x187   : > { %v17116_v18 = vpack.c.bf16 %v871_v4, %v487_v3 }
 0x188   : > { %8038 = vmatmul.mubr.f32.vlgmr.msra.gmra.mrb[68].mxu0 %v1782_v36  ;;  %v1824_v36 = vcombine.high %v1816_v20, %v1816_v20 }
 0x189   : > { %8108 = vmatmul.mubr.f32.vlgmr.msra.gmra.mrb[68].mxu1 %v1789_v41  ;;  %17089 = vmatpush1.bf16.xpose.msra.mxu0 %v17088_v8  ;;  %v481_v41 = vld [vmem:[%s18199_s12 + $0x4a0] sm:$0xff]  ;;  %v490_v8 = vld [vmem:[%s18199_s12 + $0x4e8] sm:$0xff] }
 0x18a   : > { %17093 = vmatpush1.bf16.xpose.msra.mxu1 %v17092_v9  ;;  %8177 = vmatprep.mubr.f32.mxu0 %v1807_v11  ;;  %v17104_v57 = vpack.c.bf16 %v865_v42, %v481_v41  ;;  %v874_v9 = vld [vmem:[%s18199_s12 + $0x10e8] sm:$0x3]  ;;  %v277_v41 = vld [vmem:[%s18193_s21 + $0x140] sm:$0xff] }
 0x18b   : > { %17095 = vmatprep.subr.bf16.mxu0 %v17094_v12  ;;  %v4399_v21 = vpop.f32.mrb[16].mxu0  ;;  %8247 = vmatprep.mubr.f32.mxu1 %v1808_v13  ;;  %v1877_v49 = vcombine.high %v277_v41, %v277_v41  ;;  %v1884_v54 = vrot.slane %v277_v41, %v18225_v25 }
 0x18c   : > { %v4469_v22 = vpop.f32.mrb[16].mxu1  ;;  %17099 = vmatprep.subr.bf16.mxu1 %v17098_v14  ;;  %v4400_v27 = vadd.f32 %v4399_v21, %v4330_v10  ;;  %v4401_v28 = vpop.f32.mrb[17].mxu0  ;;  %v1857_v10 = vrot.slane %v1843_v0, %v18225_v25  ;;  %v492_v14 = vld [vmem:[%s18199_s12 + $0x4f8] sm:$0xff]  ;;  %v17118_v21 = vpack.c.bf16 %v874_v9, %v490_v8 }
 0x18d   : > { %v4471_v29 = vpop.f32.mrb[17].mxu1  ;;  %v17122_v23 = vpack.c.bf16 %v876_v15, %v492_v14  ;;  %v491_v28 = vld [vmem:[%s18199_s12 + $0x4f0] sm:$0xff]  ;;  %v884_v0 = vld [vmem:[%s18199_s12 + $0x1138] sm:$0x3] }
 0x18e   : > { %v4470_v35 = vadd.f32 %v4469_v22, %v4400_v27  ;;  %v1859_v22 = vcombine.high %v1857_v10, %v1857_v10  ;;  %v873_v27 = vld [vmem:[%s18199_s12 + $0x10e0] sm:$0x3]  ;;  %v875_v29 = vld [vmem:[%s18199_s12 + $0x10f0] sm:$0x3] }
 0x18f   : > { %v17124_v43 = vpack.c.bf16 %v875_v29, %v491_v28 }
 0x190   : > { %8178 = vmatmul.mubr.f32.vlgmr.msra.gmra.mrb[70].mxu0 %v1799_v60  ;;  %v1841_v60 = vcombine.high %v1833_v45, %v1833_v45 }
 0x191   : > { %8248 = vmatmul.mubr.f32.vlgmr.msra.gmra.mrb[70].mxu1 %v1806_v1  ;;  %17097 = vmatpush1.bf16.xpose.msra.mxu0 %v17096_v33  ;;  %v485_v1 = vld [vmem:[%s18199_s12 + $0x4c0] sm:$0xff]  ;;  %v494_v33 = vld [vmem:[%s18199_s12 + $0x508] sm:$0xff] }
 0x192   : > { %17101 = vmatpush1.bf16.xpose.msra.mxu1 %v17100_v34  ;;  %8317 = vmatprep.mubr.f32.mxu0 %v1824_v36  ;;  %v17112_v17 = vpack.c.bf16 %v869_v2, %v485_v1  ;;  %v878_v34 = vld [vmem:[%s18199_s12 + $0x1108] sm:$0x3] }
 0x193   : > { %17103 = vmatprep.subr.bf16.mxu0 %v17102_v37  ;;  %v4539_v46 = vpop.f32.mrb[18].mxu0  ;;  %8387 = vmatprep.mubr.f32.mxu1 %v1825_v38  ;;  %v278_v1 = vld [vmem:[%s18193_s21 + $0x148] sm:$0xff] }
 0x194   : > { %v4609_v47 = vpop.f32.mrb[18].mxu1  ;;  %17107 = vmatprep.subr.bf16.mxu1 %v17106_v39  ;;  %v4540_v51 = vadd.f32 %v4539_v46, %v4470_v35  ;;  %v4541_v52 = vpop.f32.mrb[19].mxu0  ;;  %v1874_v35 = vrot.slane %v1860_v24, %v18225_v25  ;;  %v496_v39 = vld [vmem:[%s18199_s12 + $0x518] sm:$0xff]  ;;  %v17126_v46 = vpack.c.bf16 %v878_v34, %v494_v33  ;;  %v1894_v9 = vcombine.high %v278_v1, %v278_v1 }
 0x195   : > { %v4611_v53 = vpop.f32.mrb[19].mxu1  ;;  %v17130_v48 = vpack.c.bf16 %v880_v40, %v496_v39  ;;  %v495_v52 = vld [vmem:[%s18199_s12 + $0x510] sm:$0xff]  ;;  %v1901_v14 = vrot.slane %v278_v1, %v18225_v25  ;;  %v888_v24 = vld [vmem:[%s18199_s12 + $0x1158] sm:$0x3] }
 0x196   : > { %v4610_v59 = vadd.f32 %v4609_v47, %v4540_v51  ;;  %v1876_v47 = vcombine.high %v1874_v35, %v1874_v35  ;;  %v877_v51 = vld [vmem:[%s18199_s12 + $0x1100] sm:$0x3]  ;;  %v879_v53 = vld [vmem:[%s18199_s12 + $0x1110] sm:$0x3] }
 0x197   : > { %v17132_v3 = vpack.c.bf16 %v879_v53, %v495_v52 }
 0x198   : > { %8318 = vmatmul.mubr.f32.vlgmr.msra.gmra.mrb[72].mxu0 %v1816_v20  ;;  %v1858_v20 = vcombine.high %v1850_v5, %v1850_v5 }
 0x199   : > { %8388 = vmatmul.mubr.f32.vlgmr.msra.gmra.mrb[72].mxu1 %v1823_v26  ;;  %17105 = vmatpush1.bf16.xpose.msra.mxu0 %v17104_v57  ;;  %v489_v26 = vld [vmem:[%s18199_s12 + $0x4e0] sm:$0xff]  ;;  %v498_v57 = vld [vmem:[%s18199_s12 + $0x528] sm:$0xff] }
 0x19a   : > { %17109 = vmatpush1.bf16.xpose.msra.mxu1 %v17108_v58  ;;  %8457 = vmatprep.mubr.f32.mxu0 %v1841_v60  ;;  %v17120_v42 = vpack.c.bf16 %v873_v27, %v489_v26  ;;  %v882_v58 = vld [vmem:[%s18199_s12 + $0x1128] sm:$0x3]  ;;  %v279_v26 = vld [vmem:[%s18193_s21 + $0x150] sm:$0xff] }
 0x19b   : > { %17111 = vmatprep.subr.bf16.mxu0 %v17110_v61  ;;  %v4679_v6 = vpop.f32.mrb[20].mxu0  ;;  %8527 = vmatprep.mubr.f32.mxu1 %v1842_v62  ;;  %v1911_v34 = vcombine.high %v279_v26, %v279_v26  ;;  %v1918_v39 = vrot.slane %v279_v26, %v18225_v25 }
 0x19c   : > { %v4749_v7 = vpop.f32.mrb[20].mxu1  ;;  %17115 = vmatprep.subr.bf16.mxu1 %v17114_v63  ;;  %v4680_v11 = vadd.f32 %v4679_v6, %v4610_v59  ;;  %v4681_v12 = vpop.f32.mrb[21].mxu0  ;;  %v1891_v59 = vrot.slane %v1877_v49, %v18225_v25  ;;  %v500_v63 = vld [vmem:[%s18199_s12 + $0x538] sm:$0xff]  ;;  %v17134_v6 = vpack.c.bf16 %v882_v58, %v498_v57 }
 0x19d   : > { %v4751_v13 = vpop.f32.mrb[21].mxu1  ;;  %v17138_v8 = vpack.c.bf16 %v884_v0, %v500_v63  ;;  %v499_v12 = vld [vmem:[%s18199_s12 + $0x530] sm:$0xff]  ;;  %v892_v49 = vld [vmem:[%s18199_s12 + $0x1178] sm:$0x3] }
 0x19e   : > { %v4750_v19 = vadd.f32 %v4749_v7, %v4680_v11  ;;  %v1893_v7 = vcombine.high %v1891_v59, %v1891_v59  ;;  %v881_v11 = vld [vmem:[%s18199_s12 + $0x1120] sm:$0x3]  ;;  %v883_v13 = vld [vmem:[%s18199_s12 + $0x1130] sm:$0x3] }
 0x19f   : > { %v17140_v28 = vpack.c.bf16 %v883_v13, %v499_v12 }
 0x1a0   : > { %8458 = vmatmul.mubr.f32.vlgmr.msra.gmra.mrb[74].mxu0 %v1833_v45  ;;  %v1875_v45 = vcombine.high %v1867_v30, %v1867_v30 }
 0x1a1   : > { %8528 = vmatmul.mubr.f32.vlgmr.msra.gmra.mrb[74].mxu1 %v1840_v50  ;;  %17113 = vmatpush1.bf16.xpose.msra.mxu0 %v17112_v17  ;;  %v493_v50 = vld [vmem:[%s18199_s12 + $0x500] sm:$0xff]  ;;  %v502_v17 = vld [vmem:[%s18199_s12 + $0x548] sm:$0xff] }
 0x1a2   : > { %17117 = vmatpush1.bf16.xpose.msra.mxu1 %v17116_v18  ;;  %8597 = vmatprep.mubr.f32.mxu0 %v1858_v20  ;;  %v17128_v2 = vpack.c.bf16 %v877_v51, %v493_v50  ;;  %v886_v18 = vld [vmem:[%s18199_s12 + $0x1148] sm:$0x3]  ;;  %v280_v50 = vld [vmem:[%s18193_s21 + $0x158] sm:$0xff] }
 0x1a3   : > { %17119 = vmatprep.subr.bf16.mxu0 %v17118_v21  ;;  %v4819_v31 = vpop.f32.mrb[22].mxu0  ;;  %8667 = vmatprep.mubr.f32.mxu1 %v1859_v22  ;;  %v1928_v58 = vcombine.high %v280_v50, %v280_v50  ;;  %v1935_v63 = vrot.slane %v280_v50, %v18225_v25 }
 0x1a4   : > { %v4889_v32 = vpop.f32.mrb[22].mxu1  ;;  %17123 = vmatprep.subr.bf16.mxu1 %v17122_v23  ;;  %v4820_v36 = vadd.f32 %v4819_v31, %v4750_v19  ;;  %v4821_v37 = vpop.f32.mrb[23].mxu0  ;;  %v1908_v19 = vrot.slane %v1894_v9, %v18225_v25  ;;  %v504_v23 = vld [vmem:[%s18199_s12 + $0x558] sm:$0xff]  ;;  %v17142_v31 = vpack.c.bf16 %v886_v18, %v502_v17 }
 0x1a5   : > { %v4891_v38 = vpop.f32.mrb[23].mxu1  ;;  %v17146_v33 = vpack.c.bf16 %v888_v24, %v504_v23  ;;  %v503_v37 = vld [vmem:[%s18199_s12 + $0x550] sm:$0xff]  ;;  %v896_v9 = vld [vmem:[%s18199_s12 + $0x1198] sm:$0x3] }
 0x1a6   : > { %v4890_v44 = vadd.f32 %v4889_v32, %v4820_v36  ;;  %v1910_v32 = vcombine.high %v1908_v19, %v1908_v19  ;;  %v885_v36 = vld [vmem:[%s18199_s12 + $0x1140] sm:$0x3]  ;;  %v887_v38 = vld [vmem:[%s18199_s12 + $0x1150] sm:$0x3] }
 0x1a7   : > { %v17148_v52 = vpack.c.bf16 %v887_v38, %v503_v37 }
 0x1a8   : > { %8598 = vmatmul.mubr.f32.vlgmr.msra.gmra.mrb[76].mxu0 %v1850_v5  ;;  %v1892_v5 = vcombine.high %v1884_v54, %v1884_v54 }
 0x1a9   : > { %8668 = vmatmul.mubr.f32.vlgmr.msra.gmra.mrb[76].mxu1 %v1857_v10  ;;  %17121 = vmatpush1.bf16.xpose.msra.mxu0 %v17120_v42  ;;  %v497_v10 = vld [vmem:[%s18199_s12 + $0x520] sm:$0xff]  ;;  %v506_v42 = vld [vmem:[%s18199_s12 + $0x568] sm:$0xff] }
 0x1aa   : > { %17125 = vmatpush1.bf16.xpose.msra.mxu1 %v17124_v43  ;;  %8737 = vmatprep.mubr.f32.mxu0 %v1875_v45  ;;  %v17136_v27 = vpack.c.bf16 %v881_v11, %v497_v10  ;;  %v890_v43 = vld [vmem:[%s18199_s12 + $0x1168] sm:$0x3]  ;;  %v281_v10 = vld [vmem:[%s18193_s21 + $0x160] sm:$0xff] }
 0x1ab   : > { %17127 = vmatprep.subr.bf16.mxu0 %v17126_v46  ;;  %v4959_v55 = vpop.f32.mrb[24].mxu0  ;;  %8807 = vmatprep.mubr.f32.mxu1 %v1876_v47  ;;  %v1945_v18 = vcombine.high %v281_v10, %v281_v10  ;;  %v1952_v23 = vrot.slane %v281_v10, %v18225_v25 }
 0x1ac   : > { %v5029_v56 = vpop.f32.mrb[24].mxu1  ;;  %17131 = vmatprep.subr.bf16.mxu1 %v17130_v48  ;;  %v4960_v60 = vadd.f32 %v4959_v55, %v4890_v44  ;;  %v4961_v61 = vpop.f32.mrb[25].mxu0  ;;  %v1925_v44 = vrot.slane %v1911_v34, %v18225_v25  ;;  %v508_v48 = vld [vmem:[%s18199_s12 + $0x578] sm:$0xff]  ;;  %v17150_v55 = vpack.c.bf16 %v890_v43, %v506_v42 }
 0x1ad   : > { %v5031_v62 = vpop.f32.mrb[25].mxu1  ;;  %v17154_v57 = vpack.c.bf16 %v892_v49, %v508_v48  ;;  %v507_v61 = vld [vmem:[%s18199_s12 + $0x570] sm:$0xff]  ;;  %v900_v34 = vld [vmem:[%s18199_s12 + $0x11b8] sm:$0x3] }
 0x1ae   : > { %v5030_v4 = vadd.f32 %v5029_v56, %v4960_v60  ;;  %v1927_v56 = vcombine.high %v1925_v44, %v1925_v44  ;;  %v889_v60 = vld [vmem:[%s18199_s12 + $0x1160] sm:$0x3]  ;;  %v891_v62 = vld [vmem:[%s18199_s12 + $0x1170] sm:$0x3] }
 0x1af   : > { %v17156_v12 = vpack.c.bf16 %v891_v62, %v507_v61 }
 0x1b0   : > { %8738 = vmatmul.mubr.f32.vlgmr.msra.gmra.mrb[78].mxu0 %v1867_v30  ;;  %v1909_v30 = vcombine.high %v1901_v14, %v1901_v14 }
 0x1b1   : > { %8808 = vmatmul.mubr.f32.vlgmr.msra.gmra.mrb[78].mxu1 %v1874_v35  ;;  %17129 = vmatpush1.bf16.xpose.msra.mxu0 %v17128_v2  ;;  %v501_v35 = vld [vmem:[%s18199_s12 + $0x540] sm:$0xff]  ;;  %v510_v2 = vld [vmem:[%s18199_s12 + $0x588] sm:$0xff] }
 0x1b2   : > { %17133 = vmatpush1.bf16.xpose.msra.mxu1 %v17132_v3  ;;  %8877 = vmatprep.mubr.f32.mxu0 %v1892_v5  ;;  %v17144_v51 = vpack.c.bf16 %v885_v36, %v501_v35  ;;  %v894_v3 = vld [vmem:[%s18199_s12 + $0x1188] sm:$0x3] }
 0x1b3   : > { %17135 = vmatprep.subr.bf16.mxu0 %v17134_v6  ;;  %v5099_v15 = vpop.f32.mrb[26].mxu0  ;;  %8947 = vmatprep.mubr.f32.mxu1 %v1893_v7  ;;  %v282_v35 = vld [vmem:[%s18193_s21 + $0x168] sm:$0xff] }
 0x1b4   : > { %v5169_v16 = vpop.f32.mrb[26].mxu1  ;;  %17139 = vmatprep.subr.bf16.mxu1 %v17138_v8  ;;  %v5100_v20 = vadd.f32 %v5099_v15, %v5030_v4  ;;  %v5101_v21 = vpop.f32.mrb[27].mxu0  ;;  %v1942_v4 = vrot.slane %v1928_v58, %v18225_v25  ;;  %v512_v8 = vld [vmem:[%s18199_s12 + $0x598] sm:$0xff]  ;;  %v17158_v15 = vpack.c.bf16 %v894_v3, %v510_v2  ;;  %v1962_v43 = vcombine.high %v282_v35, %v282_v35 }
 0x1b5   : > { %v5171_v22 = vpop.f32.mrb[27].mxu1  ;;  %v17162_v17 = vpack.c.bf16 %v896_v9, %v512_v8  ;;  %v511_v21 = vld [vmem:[%s18199_s12 + $0x590] sm:$0xff]  ;;  %v1969_v48 = vrot.slane %v282_v35, %v18225_v25  ;;  %v904_v58 = vld [vmem:[%s18199_s12 + $0x11d8] sm:$0x3] }
 0x1b6   : > { %v5170_v29 = vadd.f32 %v5169_v16, %v5100_v20  ;;  %v1944_v16 = vcombine.high %v1942_v4, %v1942_v4  ;;  %v893_v20 = vld [vmem:[%s18199_s12 + $0x1180] sm:$0x3]  ;;  %v895_v22 = vld [vmem:[%s18199_s12 + $0x1190] sm:$0x3] }
 0x1b7   : > { %v17164_v37 = vpack.c.bf16 %v895_v22, %v511_v21 }
 0x1b8   : > { %8878 = vmatmul.mubr.f32.vlgmr.msra.gmra.mrb[80].mxu0 %v1884_v54  ;;  %v1926_v54 = vcombine.high %v1918_v39, %v1918_v39 }
 0x1b9   : > { %8948 = vmatmul.mubr.f32.vlgmr.msra.gmra.mrb[80].mxu1 %v1891_v59  ;;  %17137 = vmatpush1.bf16.xpose.msra.mxu0 %v17136_v27  ;;  %v505_v59 = vld [vmem:[%s18199_s12 + $0x560] sm:$0xff]  ;;  %v514_v27 = vld [vmem:[%s18199_s12 + $0x5a8] sm:$0xff] }
 0x1ba   : > { %17141 = vmatpush1.bf16.xpose.msra.mxu1 %v17140_v28  ;;  %9017 = vmatprep.mubr.f32.mxu0 %v1909_v30  ;;  %v17152_v11 = vpack.c.bf16 %v889_v60, %v505_v59  ;;  %v898_v28 = vld [vmem:[%s18199_s12 + $0x11a8] sm:$0x3]  ;;  %v283_v59 = vld [vmem:[%s18193_s21 + $0x170] sm:$0xff] }
 0x1bb   : > { %17143 = vmatprep.subr.bf16.mxu0 %v17142_v31  ;;  %v5239_v40 = vpop.f32.mrb[28].mxu0  ;;  %9087 = vmatprep.mubr.f32.mxu1 %v1910_v32  ;;  %v1979_v3 = vcombine.high %v283_v59, %v283_v59  ;;  %v1986_v8 = vrot.slane %v283_v59, %v18225_v25 }
 0x1bc   : > { %v5309_v41 = vpop.f32.mrb[28].mxu1  ;;  %17147 = vmatprep.subr.bf16.mxu1 %v17146_v33  ;;  %v5240_v45 = vadd.f32 %v5239_v40, %v5170_v29  ;;  %v5241_v46 = vpop.f32.mrb[29].mxu0  ;;  %v1959_v29 = vrot.slane %v1945_v18, %v18225_v25  ;;  %v516_v33 = vld [vmem:[%s18199_s12 + $0x5b8] sm:$0xff]  ;;  %v17166_v40 = vpack.c.bf16 %v898_v28, %v514_v27 }
 0x1bd   : > { %v5311_v47 = vpop.f32.mrb[29].mxu1  ;;  %v17170_v42 = vpack.c.bf16 %v900_v34, %v516_v33  ;;  %v515_v46 = vld [vmem:[%s18199_s12 + $0x5b0] sm:$0xff]  ;;  %v908_v18 = vld [vmem:[%s18199_s12 + $0x11f8] sm:$0x3] }
 0x1be   : > { %v5310_v53 = vadd.f32 %v5309_v41, %v5240_v45  ;;  %v1961_v41 = vcombine.high %v1959_v29, %v1959_v29  ;;  %v897_v45 = vld [vmem:[%s18199_s12 + $0x11a0] sm:$0x3]  ;;  %v899_v47 = vld [vmem:[%s18199_s12 + $0x11b0] sm:$0x3] }
 0x1bf   : > { %v17172_v61 = vpack.c.bf16 %v899_v47, %v515_v46 }
 0x1c0   : > { %9018 = vmatmul.mubr.f32.vlgmr.msra.gmra.mrb[82].mxu0 %v1901_v14  ;;  %v1943_v14 = vcombine.high %v1935_v63, %v1935_v63 }
 0x1c1   : > { %9088 = vmatmul.mubr.f32.vlgmr.msra.gmra.mrb[82].mxu1 %v1908_v19  ;;  %17145 = vmatpush1.bf16.xpose.msra.mxu0 %v17144_v51  ;;  %v509_v19 = vld [vmem:[%s18199_s12 + $0x580] sm:$0xff]  ;;  %v518_v51 = vld [vmem:[%s18199_s12 + $0x5c8] sm:$0xff] }
 0x1c2   : > { %17149 = vmatpush1.bf16.xpose.msra.mxu1 %v17148_v52  ;;  %9157 = vmatprep.mubr.f32.mxu0 %v1926_v54  ;;  %v17160_v36 = vpack.c.bf16 %v893_v20, %v509_v19  ;;  %v902_v52 = vld [vmem:[%s18199_s12 + $0x11c8] sm:$0x3]  ;;  %v284_v19 = vld [vmem:[%s18193_s21 + $0x178] sm:$0xff] }
 0x1c3   : > { %17151 = vmatprep.subr.bf16.mxu0 %v17150_v55  ;;  %v5379_v0 = vpop.f32.mrb[30].mxu0  ;;  %9227 = vmatprep.mubr.f32.mxu1 %v1927_v56  ;;  %v1996_v28 = vcombine.high %v284_v19, %v284_v19  ;;  %v2003_v33 = vrot.slane %v284_v19, %v18225_v25 }
 0x1c4   : > { %v5449_v1 = vpop.f32.mrb[30].mxu1  ;;  %17155 = vmatprep.subr.bf16.mxu1 %v17154_v57  ;;  %v5380_v5 = vadd.f32 %v5379_v0, %v5310_v53  ;;  %v5381_v6 = vpop.f32.mrb[31].mxu0  ;;  %v1976_v53 = vrot.slane %v1962_v43, %v18225_v25  ;;  %v520_v57 = vld [vmem:[%s18199_s12 + $0x5d8] sm:$0xff]  ;;  %v17174_v0 = vpack.c.bf16 %v902_v52, %v518_v51 }
 0x1c5   : > { %v5451_v7 = vpop.f32.mrb[31].mxu1  ;;  %v17178_v2 = vpack.c.bf16 %v904_v58, %v520_v57  ;;  %v519_v6 = vld [vmem:[%s18199_s12 + $0x5d0] sm:$0xff]  ;;  %v912_v43 = vld [vmem:[%s18199_s12 + $0x1218] sm:$0x3] }
 0x1c6   : > { %v5450_v13 = vadd.f32 %v5449_v1, %v5380_v5  ;;  %v1978_v1 = vcombine.high %v1976_v53, %v1976_v53  ;;  %v901_v5 = vld [vmem:[%s18199_s12 + $0x11c0] sm:$0x3]  ;;  %v903_v7 = vld [vmem:[%s18199_s12 + $0x11d0] sm:$0x3] }
 0x1c7   : > { %v17180_v21 = vpack.c.bf16 %v903_v7, %v519_v6 }
 0x1c8   : > { %9158 = vmatmul.mubr.f32.vlgmr.msra.gmra.mrb[84].mxu0 %v1918_v39  ;;  %v1960_v39 = vcombine.high %v1952_v23, %v1952_v23 }
 0x1c9   : > { %9228 = vmatmul.mubr.f32.vlgmr.msra.gmra.mrb[84].mxu1 %v1925_v44  ;;  %17153 = vmatpush1.bf16.xpose.msra.mxu0 %v17152_v11  ;;  %v513_v44 = vld [vmem:[%s18199_s12 + $0x5a0] sm:$0xff]  ;;  %v522_v11 = vld [vmem:[%s18199_s12 + $0x5e8] sm:$0xff] }
 0x1ca   : > { %17157 = vmatpush1.bf16.xpose.msra.mxu1 %v17156_v12  ;;  %9297 = vmatprep.mubr.f32.mxu0 %v1943_v14  ;;  %v17168_v60 = vpack.c.bf16 %v897_v45, %v513_v44  ;;  %v906_v12 = vld [vmem:[%s18199_s12 + $0x11e8] sm:$0x3]  ;;  %v285_v44 = vld [vmem:[%s18193_s21 + $0x180] sm:$0xff] }
 0x1cb   : > { %17159 = vmatprep.subr.bf16.mxu0 %v17158_v15  ;;  %v5519_v24 = vpop.f32.mrb[32].mxu0  ;;  %9367 = vmatprep.mubr.f32.mxu1 %v1944_v16  ;;  %v2013_v52 = vcombine.high %v285_v44, %v285_v44  ;;  %v2020_v57 = vrot.slane %v285_v44, %v18225_v25 }
 0x1cc   : > { %v5589_v26 = vpop.f32.mrb[32].mxu1  ;;  %17163 = vmatprep.subr.bf16.mxu1 %v17162_v17  ;;  %v5520_v30 = vadd.f32 %v5519_v24, %v5450_v13  ;;  %v5521_v31 = vpop.f32.mrb[33].mxu0  ;;  %v1993_v13 = vrot.slane %v1979_v3, %v18225_v25  ;;  %v524_v17 = vld [vmem:[%s18199_s12 + $0x5f8] sm:$0xff]  ;;  %v17182_v24 = vpack.c.bf16 %v906_v12, %v522_v11 }
 0x1cd   : > { %v5591_v32 = vpop.f32.mrb[33].mxu1  ;;  %v17186_v27 = vpack.c.bf16 %v908_v18, %v524_v17  ;;  %v523_v31 = vld [vmem:[%s18199_s12 + $0x5f0] sm:$0xff]  ;;  %v916_v3 = vld [vmem:[%s18199_s12 + $0x1238] sm:$0x3] }
 0x1ce   : > { %v5590_v38 = vadd.f32 %v5589_v26, %v5520_v30  ;;  %v1995_v26 = vcombine.high %v1993_v13, %v1993_v13  ;;  %v905_v30 = vld [vmem:[%s18199_s12 + $0x11e0] sm:$0x3]  ;;  %v907_v32 = vld [vmem:[%s18199_s12 + $0x11f0] sm:$0x3] }
 0x1cf   : > { %v17188_v46 = vpack.c.bf16 %v907_v32, %v523_v31 }
 0x1d0   : > { %9298 = vmatmul.mubr.f32.vlgmr.msra.gmra.mrb[86].mxu0 %v1935_v63  ;;  %v1977_v63 = vcombine.high %v1969_v48, %v1969_v48 }
 0x1d1   : > { %9368 = vmatmul.mubr.f32.vlgmr.msra.gmra.mrb[86].mxu1 %v1942_v4  ;;  %17161 = vmatpush1.bf16.xpose.msra.mxu0 %v17160_v36  ;;  %v517_v4 = vld [vmem:[%s18199_s12 + $0x5c0] sm:$0xff]  ;;  %v526_v36 = vld [vmem:[%s18199_s12 + $0x608] sm:$0xff] }
 0x1d2   : > { %17165 = vmatpush1.bf16.xpose.msra.mxu1 %v17164_v37  ;;  %9437 = vmatprep.mubr.f32.mxu0 %v1960_v39  ;;  %v17176_v20 = vpack.c.bf16 %v901_v5, %v517_v4  ;;  %v910_v37 = vld [vmem:[%s18199_s12 + $0x1208] sm:$0x3] }
 0x1d3   : > { %17167 = vmatprep.subr.bf16.mxu0 %v17166_v40  ;;  %v5659_v49 = vpop.f32.mrb[34].mxu0  ;;  %9507 = vmatprep.mubr.f32.mxu1 %v1961_v41  ;;  %v286_v4 = vld [vmem:[%s18193_s21 + $0x188] sm:$0xff] }
 0x1d4   : > { %v5729_v50 = vpop.f32.mrb[34].mxu1  ;;  %17171 = vmatprep.subr.bf16.mxu1 %v17170_v42  ;;  %v5660_v54 = vadd.f32 %v5659_v49, %v5590_v38  ;;  %v5661_v55 = vpop.f32.mrb[35].mxu0  ;;  %v2010_v38 = vrot.slane %v1996_v28, %v18225_v25  ;;  %v528_v42 = vld [vmem:[%s18199_s12 + $0x618] sm:$0xff]  ;;  %v17190_v49 = vpack.c.bf16 %v910_v37, %v526_v36  ;;  %v2030_v12 = vcombine.high %v286_v4, %v286_v4 }
 0x1d5   : > { %v5731_v56 = vpop.f32.mrb[35].mxu1  ;;  %v17194_v51 = vpack.c.bf16 %v912_v43, %v528_v42  ;;  %v527_v55 = vld [vmem:[%s18199_s12 + $0x610] sm:$0xff]  ;;  %v2037_v17 = vrot.slane %v286_v4, %v18225_v25  ;;  %v920_v28 = vld [vmem:[%s18199_s12 + $0x1258] sm:$0x3] }
 0x1d6   : > { %v5730_v62 = vadd.f32 %v5729_v50, %v5660_v54  ;;  %v2012_v50 = vcombine.high %v2010_v38, %v2010_v38  ;;  %v909_v54 = vld [vmem:[%s18199_s12 + $0x1200] sm:$0x3]  ;;  %v911_v56 = vld [vmem:[%s18199_s12 + $0x1210] sm:$0x3] }
 0x1d7   : > { %v17196_v6 = vpack.c.bf16 %v911_v56, %v527_v55 }
 0x1d8   : > { %9438 = vmatmul.mubr.f32.vlgmr.msra.gmra.mrb[88].mxu0 %v1952_v23  ;;  %v1994_v23 = vcombine.high %v1986_v8, %v1986_v8 }
 0x1d9   : > { %9508 = vmatmul.mubr.f32.vlgmr.msra.gmra.mrb[88].mxu1 %v1959_v29  ;;  %17169 = vmatpush1.bf16.xpose.msra.mxu0 %v17168_v60  ;;  %v521_v29 = vld [vmem:[%s18199_s12 + $0x5e0] sm:$0xff]  ;;  %v530_v60 = vld [vmem:[%s18199_s12 + $0x628] sm:$0xff] }
 0x1da   : > { %17173 = vmatpush1.bf16.xpose.msra.mxu1 %v17172_v61  ;;  %9577 = vmatprep.mubr.f32.mxu0 %v1977_v63  ;;  %v17184_v45 = vpack.c.bf16 %v905_v30, %v521_v29  ;;  %v914_v61 = vld [vmem:[%s18199_s12 + $0x1228] sm:$0x3]  ;;  %v287_v29 = vld [vmem:[%s18193_s21 + $0x190] sm:$0xff] }
 0x1db   : > { %17175 = vmatprep.subr.bf16.mxu0 %v17174_v0  ;;  %v5799_v9 = vpop.f32.mrb[36].mxu0  ;;  %9647 = vmatprep.mubr.f32.mxu1 %v1978_v1  ;;  %v2047_v37 = vcombine.high %v287_v29, %v287_v29  ;;  %v2054_v42 = vrot.slane %v287_v29, %v18225_v25 }
 0x1dc   : > { %v5869_v10 = vpop.f32.mrb[36].mxu1  ;;  %17179 = vmatprep.subr.bf16.mxu1 %v17178_v2  ;;  %v5800_v14 = vadd.f32 %v5799_v9, %v5730_v62  ;;  %v5801_v15 = vpop.f32.mrb[37].mxu0  ;;  %v2027_v62 = vrot.slane %v2013_v52, %v18225_v25  ;;  %v532_v2 = vld [vmem:[%s18199_s12 + $0x638] sm:$0xff]  ;;  %v17198_v9 = vpack.c.bf16 %v914_v61, %v530_v60 }
 0x1dd   : > { %v5871_v16 = vpop.f32.mrb[37].mxu1  ;;  %v17202_v11 = vpack.c.bf16 %v916_v3, %v532_v2  ;;  %v531_v15 = vld [vmem:[%s18199_s12 + $0x630] sm:$0xff]  ;;  %v924_v52 = vld [vmem:[%s18199_s12 + $0x1278] sm:$0x3] }
 0x1de   : > { %v5870_v22 = vadd.f32 %v5869_v10, %v5800_v14  ;;  %v2029_v10 = vcombine.high %v2027_v62, %v2027_v62  ;;  %v913_v14 = vld [vmem:[%s18199_s12 + $0x1220] sm:$0x3]  ;;  %v915_v16 = vld [vmem:[%s18199_s12 + $0x1230] sm:$0x3] }
 0x1df   : > { %v17204_v31 = vpack.c.bf16 %v915_v16, %v531_v15 }
 0x1e0   : > { %9578 = vmatmul.mubr.f32.vlgmr.msra.gmra.mrb[90].mxu0 %v1969_v48  ;;  %v2011_v48 = vcombine.high %v2003_v33, %v2003_v33 }
 0x1e1   : > { %9648 = vmatmul.mubr.f32.vlgmr.msra.gmra.mrb[90].mxu1 %v1976_v53  ;;  %17177 = vmatpush1.bf16.xpose.msra.mxu0 %v17176_v20  ;;  %v525_v53 = vld [vmem:[%s18199_s12 + $0x600] sm:$0xff]  ;;  %v534_v20 = vld [vmem:[%s18199_s12 + $0x648] sm:$0xff] }
 0x1e2   : > { %17181 = vmatpush1.bf16.xpose.msra.mxu1 %v17180_v21  ;;  %9717 = vmatprep.mubr.f32.mxu0 %v1994_v23  ;;  %v17192_v5 = vpack.c.bf16 %v909_v54, %v525_v53  ;;  %v918_v21 = vld [vmem:[%s18199_s12 + $0x1248] sm:$0x3]  ;;  %v288_v53 = vld [vmem:[%s18193_s21 + $0x198] sm:$0xff] }
 0x1e3   : > { %17183 = vmatprep.subr.bf16.mxu0 %v17182_v24  ;;  %v5939_v34 = vpop.f32.mrb[38].mxu0  ;;  %9787 = vmatprep.mubr.f32.mxu1 %v1995_v26  ;;  %v2064_v61 = vcombine.high %v288_v53, %v288_v53  ;;  %v2071_v2 = vrot.slane %v288_v53, %v18225_v25 }
 0x1e4   : > { %v6009_v35 = vpop.f32.mrb[38].mxu1  ;;  %17187 = vmatprep.subr.bf16.mxu1 %v17186_v27  ;;  %v5940_v39 = vadd.f32 %v5939_v34, %v5870_v22  ;;  %v5941_v40 = vpop.f32.mrb[39].mxu0  ;;  %v2044_v22 = vrot.slane %v2030_v12, %v18225_v25  ;;  %v536_v27 = vld [vmem:[%s18199_s12 + $0x658] sm:$0xff]  ;;  %v17206_v34 = vpack.c.bf16 %v918_v21, %v534_v20 }
 0x1e5   : > { %v6011_v41 = vpop.f32.mrb[39].mxu1  ;;  %v17210_v36 = vpack.c.bf16 %v920_v28, %v536_v27  ;;  %v535_v40 = vld [vmem:[%s18199_s12 + $0x650] sm:$0xff]  ;;  %v928_v12 = vld [vmem:[%s18199_s12 + $0x1298] sm:$0x3] }
 0x1e6   : > { %v6010_v47 = vadd.f32 %v6009_v35, %v5940_v39  ;;  %v2046_v35 = vcombine.high %v2044_v22, %v2044_v22  ;;  %v917_v39 = vld [vmem:[%s18199_s12 + $0x1240] sm:$0x3]  ;;  %v919_v41 = vld [vmem:[%s18199_s12 + $0x1250] sm:$0x3] }
 0x1e7   : > { %v17212_v55 = vpack.c.bf16 %v919_v41, %v535_v40 }
 0x1e8   : > { %9718 = vmatmul.mubr.f32.vlgmr.msra.gmra.mrb[92].mxu0 %v1986_v8  ;;  %v2028_v8 = vcombine.high %v2020_v57, %v2020_v57 }
 0x1e9   : > { %9788 = vmatmul.mubr.f32.vlgmr.msra.gmra.mrb[92].mxu1 %v1993_v13  ;;  %17185 = vmatpush1.bf16.xpose.msra.mxu0 %v17184_v45  ;;  %v529_v13 = vld [vmem:[%s18199_s12 + $0x620] sm:$0xff]  ;;  %v538_v45 = vld [vmem:[%s18199_s12 + $0x668] sm:$0xff] }
 0x1ea   : > { %17189 = vmatpush1.bf16.xpose.msra.mxu1 %v17188_v46  ;;  %9857 = vmatprep.mubr.f32.mxu0 %v2011_v48  ;;  %v17200_v30 = vpack.c.bf16 %v913_v14, %v529_v13  ;;  %v922_v46 = vld [vmem:[%s18199_s12 + $0x1268] sm:$0x3]  ;;  %v289_v13 = vld [vmem:[%s18193_s21 + $0x1a0] sm:$0xff] }
 0x1eb   : > { %17191 = vmatprep.subr.bf16.mxu0 %v17190_v49  ;;  %v6079_v58 = vpop.f32.mrb[40].mxu0  ;;  %9927 = vmatprep.mubr.f32.mxu1 %v2012_v50  ;;  %v2081_v21 = vcombine.high %v289_v13, %v289_v13  ;;  %v2088_v27 = vrot.slane %v289_v13, %v18225_v25 }
 0x1ec   : > { %v6149_v59 = vpop.f32.mrb[40].mxu1  ;;  %17195 = vmatprep.subr.bf16.mxu1 %v17194_v51  ;;  %v6080_v63 = vadd.f32 %v6079_v58, %v6010_v47  ;;  %v6081_v0 = vpop.f32.mrb[41].mxu0  ;;  %v2061_v47 = vrot.slane %v2047_v37, %v18225_v25  ;;  %v540_v51 = vld [vmem:[%s18199_s12 + $0x678] sm:$0xff]  ;;  %v17214_v58 = vpack.c.bf16 %v922_v46, %v538_v45 }
 0x1ed   : > { %v6151_v1 = vpop.f32.mrb[41].mxu1  ;;  %v17218_v60 = vpack.c.bf16 %v924_v52, %v540_v51  ;;  %v539_v0 = vld [vmem:[%s18199_s12 + $0x670] sm:$0xff]  ;;  %v932_v37 = vld [vmem:[%s18199_s12 + $0x12b8] sm:$0x3] }
 0x1ee   : > { %v6150_v7 = vadd.f32 %v6149_v59, %v6080_v63  ;;  %v2063_v59 = vcombine.high %v2061_v47, %v2061_v47  ;;  %v921_v63 = vld [vmem:[%s18199_s12 + $0x1260] sm:$0x3]  ;;  %v923_v1 = vld [vmem:[%s18199_s12 + $0x1270] sm:$0x3] }
 0x1ef   : > { %v17220_v15 = vpack.c.bf16 %v923_v1, %v539_v0 }
 0x1f0   : > { %9858 = vmatmul.mubr.f32.vlgmr.msra.gmra.mrb[94].mxu0 %v2003_v33  ;;  %v2045_v33 = vcombine.high %v2037_v17, %v2037_v17 }
 0x1f1   : > { %9928 = vmatmul.mubr.f32.vlgmr.msra.gmra.mrb[94].mxu1 %v2010_v38  ;;  %17193 = vmatpush1.bf16.xpose.msra.mxu0 %v17192_v5  ;;  %v533_v38 = vld [vmem:[%s18199_s12 + $0x640] sm:$0xff]  ;;  %v542_v5 = vld [vmem:[%s18199_s12 + $0x688] sm:$0xff] }
 0x1f2   : > { %17197 = vmatpush1.bf16.xpose.msra.mxu1 %v17196_v6  ;;  %9997 = vmatprep.mubr.f32.mxu0 %v2028_v8  ;;  %v17208_v54 = vpack.c.bf16 %v917_v39, %v533_v38  ;;  %v926_v6 = vld [vmem:[%s18199_s12 + $0x1288] sm:$0x3] }
 0x1f3   : > { %17199 = vmatprep.subr.bf16.mxu0 %v17198_v9  ;;  %v6219_v18 = vpop.f32.mrb[42].mxu0  ;;  %10067 = vmatprep.mubr.f32.mxu1 %v2029_v10  ;;  %v290_v38 = vld [vmem:[%s18193_s21 + $0x1a8] sm:$0xff] }
 0x1f4   : > { %v6289_v19 = vpop.f32.mrb[42].mxu1  ;;  %17203 = vmatprep.subr.bf16.mxu1 %v17202_v11  ;;  %v6220_v23 = vadd.f32 %v6219_v18, %v6150_v7  ;;  %v6221_v24 = vpop.f32.mrb[43].mxu0  ;;  %v2078_v7 = vrot.slane %v2064_v61, %v18225_v25  ;;  %v544_v11 = vld [vmem:[%s18199_s12 + $0x698] sm:$0xff]  ;;  %v17222_v18 = vpack.c.bf16 %v926_v6, %v542_v5  ;;  %v2098_v46 = vcombine.high %v290_v38, %v290_v38 }
 0x1f5   : > { %v6291_v26 = vpop.f32.mrb[43].mxu1  ;;  %v17226_v20 = vpack.c.bf16 %v928_v12, %v544_v11  ;;  %v543_v24 = vld [vmem:[%s18199_s12 + $0x690] sm:$0xff]  ;;  %v2105_v51 = vrot.slane %v290_v38, %v18225_v25  ;;  %v936_v61 = vld [vmem:[%s18199_s12 + $0x12d8] sm:$0x3] }
 0x1f6   : > { %v6290_v32 = vadd.f32 %v6289_v19, %v6220_v23  ;;  %v2080_v19 = vcombine.high %v2078_v7, %v2078_v7  ;;  %v925_v23 = vld [vmem:[%s18199_s12 + $0x1280] sm:$0x3]  ;;  %v927_v26 = vld [vmem:[%s18199_s12 + $0x1290] sm:$0x3] }
 0x1f7   : > { %v17228_v40 = vpack.c.bf16 %v927_v26, %v543_v24 }
 0x1f8   : > { %9998 = vmatmul.mubr.f32.vlgmr.msra.gmra.mrb[96].mxu0 %v2020_v57  ;;  %v2062_v57 = vcombine.high %v2054_v42, %v2054_v42 }
 0x1f9   : > { %10068 = vmatmul.mubr.f32.vlgmr.msra.gmra.mrb[96].mxu1 %v2027_v62  ;;  %17201 = vmatpush1.bf16.xpose.msra.mxu0 %v17200_v30  ;;  %v537_v62 = vld [vmem:[%s18199_s12 + $0x660] sm:$0xff]  ;;  %v546_v30 = vld [vmem:[%s18199_s12 + $0x6a8] sm:$0xff] }
 0x1fa   : > { %17205 = vmatpush1.bf16.xpose.msra.mxu1 %v17204_v31  ;;  %10137 = vmatprep.mubr.f32.mxu0 %v2045_v33  ;;  %v17216_v14 = vpack.c.bf16 %v921_v63, %v537_v62  ;;  %v930_v31 = vld [vmem:[%s18199_s12 + $0x12a8] sm:$0x3]  ;;  %v291_v62 = vld [vmem:[%s18193_s21 + $0x1b0] sm:$0xff] }
 0x1fb   : > { %17207 = vmatprep.subr.bf16.mxu0 %v17206_v34  ;;  %v6359_v43 = vpop.f32.mrb[44].mxu0  ;;  %10207 = vmatprep.mubr.f32.mxu1 %v2046_v35  ;;  %v2115_v6 = vcombine.high %v291_v62, %v291_v62  ;;  %v2122_v11 = vrot.slane %v291_v62, %v18225_v25 }
 0x1fc   : > { %v6429_v44 = vpop.f32.mrb[44].mxu1  ;;  %17211 = vmatprep.subr.bf16.mxu1 %v17210_v36  ;;  %v6360_v48 = vadd.f32 %v6359_v43, %v6290_v32  ;;  %v6361_v49 = vpop.f32.mrb[45].mxu0  ;;  %v2095_v32 = vrot.slane %v2081_v21, %v18225_v25  ;;  %v548_v36 = vld [vmem:[%s18199_s12 + $0x6b8] sm:$0xff]  ;;  %v17230_v43 = vpack.c.bf16 %v930_v31, %v546_v30 }
 0x1fd   : > { %v6431_v50 = vpop.f32.mrb[45].mxu1  ;;  %v17234_v45 = vpack.c.bf16 %v932_v37, %v548_v36  ;;  %v547_v49 = vld [vmem:[%s18199_s12 + $0x6b0] sm:$0xff]  ;;  %v940_v21 = vld [vmem:[%s18199_s12 + $0x12f8] sm:$0x3] }
 0x1fe   : > { %v6430_v56 = vadd.f32 %v6429_v44, %v6360_v48  ;;  %v2097_v44 = vcombine.high %v2095_v32, %v2095_v32  ;;  %v929_v48 = vld [vmem:[%s18199_s12 + $0x12a0] sm:$0x3]  ;;  %v931_v50 = vld [vmem:[%s18199_s12 + $0x12b0] sm:$0x3] }
 0x1ff   : > { %v17236_v0 = vpack.c.bf16 %v931_v50, %v547_v49 }
 0x200   : > { %10138 = vmatmul.mubr.f32.vlgmr.msra.gmra.mrb[98].mxu0 %v2037_v17  ;;  %v2079_v17 = vcombine.high %v2071_v2, %v2071_v2 }
 0x201   : > { %10208 = vmatmul.mubr.f32.vlgmr.msra.gmra.mrb[98].mxu1 %v2044_v22  ;;  %17209 = vmatpush1.bf16.xpose.msra.mxu0 %v17208_v54  ;;  %v541_v22 = vld [vmem:[%s18199_s12 + $0x680] sm:$0xff]  ;;  %v550_v54 = vld [vmem:[%s18199_s12 + $0x6c8] sm:$0xff] }
 0x202   : > { %17213 = vmatpush1.bf16.xpose.msra.mxu1 %v17212_v55  ;;  %10277 = vmatprep.mubr.f32.mxu0 %v2062_v57  ;;  %v17224_v39 = vpack.c.bf16 %v925_v23, %v541_v22  ;;  %v934_v55 = vld [vmem:[%s18199_s12 + $0x12c8] sm:$0x3]  ;;  %v292_v22 = vld [vmem:[%s18193_s21 + $0x1b8] sm:$0xff] }
 0x203   : > { %17215 = vmatprep.subr.bf16.mxu0 %v17214_v58  ;;  %v6499_v3 = vpop.f32.mrb[46].mxu0  ;;  %10347 = vmatprep.mubr.f32.mxu1 %v2063_v59  ;;  %v2132_v31 = vcombine.high %v292_v22, %v292_v22  ;;  %v2139_v36 = vrot.slane %v292_v22, %v18225_v25 }
 0x204   : > { %v6569_v4 = vpop.f32.mrb[46].mxu1  ;;  %17219 = vmatprep.subr.bf16.mxu1 %v17218_v60  ;;  %v6500_v8 = vadd.f32 %v6499_v3, %v6430_v56  ;;  %v6501_v9 = vpop.f32.mrb[47].mxu0  ;;  %v2112_v56 = vrot.slane %v2098_v46, %v18225_v25  ;;  %v552_v60 = vld [vmem:[%s18199_s12 + $0x6d8] sm:$0xff]  ;;  %v17238_v3 = vpack.c.bf16 %v934_v55, %v550_v54 }
 0x205   : > { %v6571_v10 = vpop.f32.mrb[47].mxu1  ;;  %v17242_v5 = vpack.c.bf16 %v936_v61, %v552_v60  ;;  %v551_v9 = vld [vmem:[%s18199_s12 + $0x6d0] sm:$0xff]  ;;  %v944_v46 = vld [vmem:[%s18199_s12 + $0x1318] sm:$0x3] }
 0x206   : > { %v6570_v16 = vadd.f32 %v6569_v4, %v6500_v8  ;;  %v2114_v4 = vcombine.high %v2112_v56, %v2112_v56  ;;  %v933_v8 = vld [vmem:[%s18199_s12 + $0x12c0] sm:$0x3]  ;;  %v935_v10 = vld [vmem:[%s18199_s12 + $0x12d0] sm:$0x3] }
 0x207   : > { %v17244_v24 = vpack.c.bf16 %v935_v10, %v551_v9 }
 0x208   : > { %10278 = vmatmul.mubr.f32.vlgmr.msra.gmra.mrb[100].mxu0 %v2054_v42  ;;  %v2096_v42 = vcombine.high %v2088_v27, %v2088_v27 }
 0x209   : > { %10348 = vmatmul.mubr.f32.vlgmr.msra.gmra.mrb[100].mxu1 %v2061_v47  ;;  %17217 = vmatpush1.bf16.xpose.msra.mxu0 %v17216_v14  ;;  %v545_v47 = vld [vmem:[%s18199_s12 + $0x6a0] sm:$0xff]  ;;  %v554_v14 = vld [vmem:[%s18199_s12 + $0x6e8] sm:$0xff] }
 0x20a   : > { %17221 = vmatpush1.bf16.xpose.msra.mxu1 %v17220_v15  ;;  %10417 = vmatprep.mubr.f32.mxu0 %v2079_v17  ;;  %v17232_v63 = vpack.c.bf16 %v929_v48, %v545_v47  ;;  %v938_v15 = vld [vmem:[%s18199_s12 + $0x12e8] sm:$0x3]  ;;  %v293_v47 = vld [vmem:[%s18193_s21 + $0x1c0] sm:$0xff] }
 0x20b   : > { %17223 = vmatprep.subr.bf16.mxu0 %v17222_v18  ;;  %v6639_v28 = vpop.f32.mrb[48].mxu0  ;;  %10487 = vmatprep.mubr.f32.mxu1 %v2080_v19  ;;  %v2149_v55 = vcombine.high %v293_v47, %v293_v47  ;;  %v2156_v60 = vrot.slane %v293_v47, %v18225_v25 }
 0x20c   : > { %v6709_v29 = vpop.f32.mrb[48].mxu1  ;;  %17227 = vmatprep.subr.bf16.mxu1 %v17226_v20  ;;  %v6640_v33 = vadd.f32 %v6639_v28, %v6570_v16  ;;  %v6641_v34 = vpop.f32.mrb[49].mxu0  ;;  %v2129_v16 = vrot.slane %v2115_v6, %v18225_v25  ;;  %v556_v20 = vld [vmem:[%s18199_s12 + $0x6f8] sm:$0xff]  ;;  %v17246_v28 = vpack.c.bf16 %v938_v15, %v554_v14 }
 0x20d   : > { %v6711_v35 = vpop.f32.mrb[49].mxu1  ;;  %v17250_v30 = vpack.c.bf16 %v940_v21, %v556_v20  ;;  %v555_v34 = vld [vmem:[%s18199_s12 + $0x6f0] sm:$0xff]  ;;  %v948_v6 = vld [vmem:[%s18199_s12 + $0x1338] sm:$0x3] }
 0x20e   : > { %v6710_v41 = vadd.f32 %v6709_v29, %v6640_v33  ;;  %v2131_v29 = vcombine.high %v2129_v16, %v2129_v16  ;;  %v937_v33 = vld [vmem:[%s18199_s12 + $0x12e0] sm:$0x3]  ;;  %v939_v35 = vld [vmem:[%s18199_s12 + $0x12f0] sm:$0x3] }
 0x20f   : > { %v17252_v49 = vpack.c.bf16 %v939_v35, %v555_v34 }
 0x210   : > { %10418 = vmatmul.mubr.f32.vlgmr.msra.gmra.mrb[102].mxu0 %v2071_v2  ;;  %v2113_v2 = vcombine.high %v2105_v51, %v2105_v51 }
 0x211   : > { %10488 = vmatmul.mubr.f32.vlgmr.msra.gmra.mrb[102].mxu1 %v2078_v7  ;;  %17225 = vmatpush1.bf16.xpose.msra.mxu0 %v17224_v39  ;;  %v549_v7 = vld [vmem:[%s18199_s12 + $0x6c0] sm:$0xff]  ;;  %v558_v39 = vld [vmem:[%s18199_s12 + $0x708] sm:$0xff] }
 0x212   : > { %17229 = vmatpush1.bf16.xpose.msra.mxu1 %v17228_v40  ;;  %10557 = vmatprep.mubr.f32.mxu0 %v2096_v42  ;;  %v17240_v23 = vpack.c.bf16 %v933_v8, %v549_v7  ;;  %v942_v40 = vld [vmem:[%s18199_s12 + $0x1308] sm:$0x3] }
 0x213   : > { %17231 = vmatprep.subr.bf16.mxu0 %v17230_v43  ;;  %v6779_v52 = vpop.f32.mrb[50].mxu0  ;;  %10627 = vmatprep.mubr.f32.mxu1 %v2097_v44  ;;  %v294_v7 = vld [vmem:[%s18193_s21 + $0x1c8] sm:$0xff] }
 0x214   : > { %v6849_v53 = vpop.f32.mrb[50].mxu1  ;;  %17235 = vmatprep.subr.bf16.mxu1 %v17234_v45  ;;  %v6780_v57 = vadd.f32 %v6779_v52, %v6710_v41  ;;  %v6781_v58 = vpop.f32.mrb[51].mxu0  ;;  %v2146_v41 = vrot.slane %v2132_v31, %v18225_v25  ;;  %v560_v45 = vld [vmem:[%s18199_s12 + $0x718] sm:$0xff]  ;;  %v17254_v52 = vpack.c.bf16 %v942_v40, %v558_v39  ;;  %v2166_v15 = vcombine.high %v294_v7, %v294_v7 }
 0x215   : > { %v6851_v59 = vpop.f32.mrb[51].mxu1  ;;  %v17258_v54 = vpack.c.bf16 %v944_v46, %v560_v45  ;;  %v559_v58 = vld [vmem:[%s18199_s12 + $0x710] sm:$0xff]  ;;  %v2173_v20 = vrot.slane %v294_v7, %v18225_v25  ;;  %v952_v31 = vld [vmem:[%s18199_s12 + $0x1358] sm:$0x3] }
 0x216   : > { %v6850_v1 = vadd.f32 %v6849_v53, %v6780_v57  ;;  %v2148_v53 = vcombine.high %v2146_v41, %v2146_v41  ;;  %v941_v57 = vld [vmem:[%s18199_s12 + $0x1300] sm:$0x3]  ;;  %v943_v59 = vld [vmem:[%s18199_s12 + $0x1310] sm:$0x3] }
 0x217   : > { %v17260_v9 = vpack.c.bf16 %v943_v59, %v559_v58 }
 0x218   : > { %10558 = vmatmul.mubr.f32.vlgmr.msra.gmra.mrb[104].mxu0 %v2088_v27  ;;  %v2130_v27 = vcombine.high %v2122_v11, %v2122_v11 }
 0x219   : > { %10628 = vmatmul.mubr.f32.vlgmr.msra.gmra.mrb[104].mxu1 %v2095_v32  ;;  %17233 = vmatpush1.bf16.xpose.msra.mxu0 %v17232_v63  ;;  %v553_v32 = vld [vmem:[%s18199_s12 + $0x6e0] sm:$0xff]  ;;  %v562_v63 = vld [vmem:[%s18199_s12 + $0x728] sm:$0xff] }
 0x21a   : > { %17237 = vmatpush1.bf16.xpose.msra.mxu1 %v17236_v0  ;;  %10697 = vmatprep.mubr.f32.mxu0 %v2113_v2  ;;  %v17248_v48 = vpack.c.bf16 %v937_v33, %v553_v32  ;;  %v946_v0 = vld [vmem:[%s18199_s12 + $0x1328] sm:$0x3]  ;;  %v295_v32 = vld [vmem:[%s18193_s21 + $0x1d0] sm:$0xff] }
 0x21b   : > { %17239 = vmatprep.subr.bf16.mxu0 %v17238_v3  ;;  %v6919_v12 = vpop.f32.mrb[52].mxu0  ;;  %10767 = vmatprep.mubr.f32.mxu1 %v2114_v4  ;;  %v2183_v40 = vcombine.high %v295_v32, %v295_v32  ;;  %v2190_v45 = vrot.slane %v295_v32, %v18225_v25 }
 0x21c   : > { %v6989_v13 = vpop.f32.mrb[52].mxu1  ;;  %17243 = vmatprep.subr.bf16.mxu1 %v17242_v5  ;;  %v6920_v17 = vadd.f32 %v6919_v12, %v6850_v1  ;;  %v6921_v18 = vpop.f32.mrb[53].mxu0  ;;  %v2163_v1 = vrot.slane %v2149_v55, %v18225_v25  ;;  %v564_v5 = vld [vmem:[%s18199_s12 + $0x738] sm:$0xff]  ;;  %v17262_v12 = vpack.c.bf16 %v946_v0, %v562_v63 }
 0x21d   : > { %v6991_v19 = vpop.f32.mrb[53].mxu1  ;;  %v17266_v14 = vpack.c.bf16 %v948_v6, %v564_v5  ;;  %v563_v18 = vld [vmem:[%s18199_s12 + $0x730] sm:$0xff]  ;;  %v956_v55 = vld [vmem:[%s18199_s12 + $0x1378] sm:$0x3] }
 0x21e   : > { %v6990_v26 = vadd.f32 %v6989_v13, %v6920_v17  ;;  %v2165_v13 = vcombine.high %v2163_v1, %v2163_v1  ;;  %v945_v17 = vld [vmem:[%s18199_s12 + $0x1320] sm:$0x3]  ;;  %v947_v19 = vld [vmem:[%s18199_s12 + $0x1330] sm:$0x3] }
 0x21f   : > { %v17268_v34 = vpack.c.bf16 %v947_v19, %v563_v18 }
 0x220   : > { %10698 = vmatmul.mubr.f32.vlgmr.msra.gmra.mrb[106].mxu0 %v2105_v51  ;;  %v2147_v51 = vcombine.high %v2139_v36, %v2139_v36 }
 0x221   : > { %10768 = vmatmul.mubr.f32.vlgmr.msra.gmra.mrb[106].mxu1 %v2112_v56  ;;  %17241 = vmatpush1.bf16.xpose.msra.mxu0 %v17240_v23  ;;  %v557_v56 = vld [vmem:[%s18199_s12 + $0x700] sm:$0xff]  ;;  %v566_v23 = vld [vmem:[%s18199_s12 + $0x748] sm:$0xff] }
 0x222   : > { %17245 = vmatpush1.bf16.xpose.msra.mxu1 %v17244_v24  ;;  %10837 = vmatprep.mubr.f32.mxu0 %v2130_v27  ;;  %v17256_v8 = vpack.c.bf16 %v941_v57, %v557_v56  ;;  %v950_v24 = vld [vmem:[%s18199_s12 + $0x1348] sm:$0x3]  ;;  %v296_v56 = vld [vmem:[%s18193_s21 + $0x1d8] sm:$0xff] }
 0x223   : > { %17247 = vmatprep.subr.bf16.mxu0 %v17246_v28  ;;  %v7059_v37 = vpop.f32.mrb[54].mxu0  ;;  %10907 = vmatprep.mubr.f32.mxu1 %v2131_v29  ;;  %v2200_v0 = vcombine.high %v296_v56, %v296_v56  ;;  %v2207_v5 = vrot.slane %v296_v56, %v18225_v25 }
 0x224   : > { %v7129_v38 = vpop.f32.mrb[54].mxu1  ;;  %17251 = vmatprep.subr.bf16.mxu1 %v17250_v30  ;;  %v7060_v42 = vadd.f32 %v7059_v37, %v6990_v26  ;;  %v7061_v43 = vpop.f32.mrb[55].mxu0  ;;  %v2180_v26 = vrot.slane %v2166_v15, %v18225_v25  ;;  %v568_v30 = vld [vmem:[%s18199_s12 + $0x758] sm:$0xff]  ;;  %v17270_v37 = vpack.c.bf16 %v950_v24, %v566_v23 }
 0x225   : > { %v7131_v44 = vpop.f32.mrb[55].mxu1  ;;  %v17274_v39 = vpack.c.bf16 %v952_v31, %v568_v30  ;;  %v567_v43 = vld [vmem:[%s18199_s12 + $0x750] sm:$0xff]  ;;  %v960_v15 = vld [vmem:[%s18199_s12 + $0x1398] sm:$0x3] }
 0x226   : > { %v7130_v50 = vadd.f32 %v7129_v38, %v7060_v42  ;;  %v2182_v38 = vcombine.high %v2180_v26, %v2180_v26  ;;  %v949_v42 = vld [vmem:[%s18199_s12 + $0x1340] sm:$0x3]  ;;  %v951_v44 = vld [vmem:[%s18199_s12 + $0x1350] sm:$0x3] }
 0x227   : > { %v17276_v58 = vpack.c.bf16 %v951_v44, %v567_v43 }
 0x228   : > { %10838 = vmatmul.mubr.f32.vlgmr.msra.gmra.mrb[108].mxu0 %v2122_v11  ;;  %v2164_v11 = vcombine.high %v2156_v60, %v2156_v60 }
 0x229   : > { %10908 = vmatmul.mubr.f32.vlgmr.msra.gmra.mrb[108].mxu1 %v2129_v16  ;;  %17249 = vmatpush1.bf16.xpose.msra.mxu0 %v17248_v48  ;;  %v561_v16 = vld [vmem:[%s18199_s12 + $0x720] sm:$0xff]  ;;  %v570_v48 = vld [vmem:[%s18199_s12 + $0x768] sm:$0xff] }
 0x22a   : > { %17253 = vmatpush1.bf16.xpose.msra.mxu1 %v17252_v49  ;;  %10977 = vmatprep.mubr.f32.mxu0 %v2147_v51  ;;  %v17264_v33 = vpack.c.bf16 %v945_v17, %v561_v16  ;;  %v954_v49 = vld [vmem:[%s18199_s12 + $0x1368] sm:$0x3]  ;;  %v297_v16 = vld [vmem:[%s18193_s21 + $0x1e0] sm:$0xff] }
 0x22b   : > { %17255 = vmatprep.subr.bf16.mxu0 %v17254_v52  ;;  %v7199_v61 = vpop.f32.mrb[56].mxu0  ;;  %11047 = vmatprep.mubr.f32.mxu1 %v2148_v53  ;;  %v2217_v24 = vcombine.high %v297_v16, %v297_v16  ;;  %v2224_v30 = vrot.slane %v297_v16, %v18225_v25 }
 0x22c   : > { %v7269_v62 = vpop.f32.mrb[56].mxu1  ;;  %17259 = vmatprep.subr.bf16.mxu1 %v17258_v54  ;;  %v7200_v2 = vadd.f32 %v7199_v61, %v7130_v50  ;;  %v7201_v3 = vpop.f32.mrb[57].mxu0  ;;  %v2197_v50 = vrot.slane %v2183_v40, %v18225_v25  ;;  %v572_v54 = vld [vmem:[%s18199_s12 + $0x778] sm:$0xff]  ;;  %v17278_v61 = vpack.c.bf16 %v954_v49, %v570_v48 }
 0x22d   : > { %v7271_v4 = vpop.f32.mrb[57].mxu1  ;;  %v17282_v63 = vpack.c.bf16 %v956_v55, %v572_v54  ;;  %v571_v3 = vld [vmem:[%s18199_s12 + $0x770] sm:$0xff]  ;;  %v964_v40 = vld [vmem:[%s18199_s12 + $0x13b8] sm:$0x3] }
 0x22e   : > { %v7270_v10 = vadd.f32 %v7269_v62, %v7200_v2  ;;  %v2199_v62 = vcombine.high %v2197_v50, %v2197_v50  ;;  %v953_v2 = vld [vmem:[%s18199_s12 + $0x1360] sm:$0x3]  ;;  %v955_v4 = vld [vmem:[%s18199_s12 + $0x1370] sm:$0x3] }
 0x22f   : > { %v17284_v18 = vpack.c.bf16 %v955_v4, %v571_v3 }
 0x230   : > { %10978 = vmatmul.mubr.f32.vlgmr.msra.gmra.mrb[110].mxu0 %v2139_v36  ;;  %v2181_v36 = vcombine.high %v2173_v20, %v2173_v20 }
 0x231   : > { %11048 = vmatmul.mubr.f32.vlgmr.msra.gmra.mrb[110].mxu1 %v2146_v41  ;;  %17257 = vmatpush1.bf16.xpose.msra.mxu0 %v17256_v8  ;;  %v565_v41 = vld [vmem:[%s18199_s12 + $0x740] sm:$0xff]  ;;  %v574_v8 = vld [vmem:[%s18199_s12 + $0x788] sm:$0xff] }
 0x232   : > { %17261 = vmatpush1.bf16.xpose.msra.mxu1 %v17260_v9  ;;  %11117 = vmatprep.mubr.f32.mxu0 %v2164_v11  ;;  %v17272_v57 = vpack.c.bf16 %v949_v42, %v565_v41  ;;  %v958_v9 = vld [vmem:[%s18199_s12 + $0x1388] sm:$0x3] }
 0x233   : > { %17263 = vmatprep.subr.bf16.mxu0 %v17262_v12  ;;  %v7339_v21 = vpop.f32.mrb[58].mxu0  ;;  %11187 = vmatprep.mubr.f32.mxu1 %v2165_v13  ;;  %v298_v41 = vld [vmem:[%s18193_s21 + $0x1e8] sm:$0xff] }
 0x234   : > { %v7409_v22 = vpop.f32.mrb[58].mxu1  ;;  %17267 = vmatprep.subr.bf16.mxu1 %v17266_v14  ;;  %v7340_v27 = vadd.f32 %v7339_v21, %v7270_v10  ;;  %v7341_v28 = vpop.f32.mrb[59].mxu0  ;;  %v2214_v10 = vrot.slane %v2200_v0, %v18225_v25  ;;  %v576_v14 = vld [vmem:[%s18199_s12 + $0x798] sm:$0xff]  ;;  %v17286_v21 = vpack.c.bf16 %v958_v9, %v574_v8  ;;  %v2234_v49 = vcombine.high %v298_v41, %v298_v41 }
 0x235   : > { %v7411_v29 = vpop.f32.mrb[59].mxu1  ;;  %v17290_v23 = vpack.c.bf16 %v960_v15, %v576_v14  ;;  %v575_v28 = vld [vmem:[%s18199_s12 + $0x790] sm:$0xff]  ;;  %v2241_v54 = vrot.slane %v298_v41, %v18225_v25  ;;  %v968_v0 = vld [vmem:[%s18199_s12 + $0x13d8] sm:$0x3] }
 0x236   : > { %v7410_v35 = vadd.f32 %v7409_v22, %v7340_v27  ;;  %v2216_v22 = vcombine.high %v2214_v10, %v2214_v10  ;;  %v957_v27 = vld [vmem:[%s18199_s12 + $0x1380] sm:$0x3]  ;;  %v959_v29 = vld [vmem:[%s18199_s12 + $0x1390] sm:$0x3] }
 0x237   : > { %v17292_v43 = vpack.c.bf16 %v959_v29, %v575_v28 }
 0x238   : > { %11118 = vmatmul.mubr.f32.vlgmr.msra.gmra.mrb[112].mxu0 %v2156_v60  ;;  %v2198_v60 = vcombine.high %v2190_v45, %v2190_v45 }
 0x239   : > { %11188 = vmatmul.mubr.f32.vlgmr.msra.gmra.mrb[112].mxu1 %v2163_v1  ;;  %17265 = vmatpush1.bf16.xpose.msra.mxu0 %v17264_v33  ;;  %v569_v1 = vld [vmem:[%s18199_s12 + $0x760] sm:$0xff]  ;;  %v578_v33 = vld [vmem:[%s18199_s12 + $0x7a8] sm:$0xff] }
 0x23a   : > { %17269 = vmatpush1.bf16.xpose.msra.mxu1 %v17268_v34  ;;  %11257 = vmatprep.mubr.f32.mxu0 %v2181_v36  ;;  %v17280_v17 = vpack.c.bf16 %v953_v2, %v569_v1  ;;  %v962_v34 = vld [vmem:[%s18199_s12 + $0x13a8] sm:$0x3]  ;;  %v299_v1 = vld [vmem:[%s18193_s21 + $0x1f0] sm:$0xff] }
 0x23b   : > { %17271 = vmatprep.subr.bf16.mxu0 %v17270_v37  ;;  %v7479_v46 = vpop.f32.mrb[60].mxu0  ;;  %11327 = vmatprep.mubr.f32.mxu1 %v2182_v38  ;;  %v2251_v9 = vcombine.high %v299_v1, %v299_v1  ;;  %v2258_v14 = vrot.slane %v299_v1, %v18225_v25 }
 0x23c   : > { %v7549_v47 = vpop.f32.mrb[60].mxu1  ;;  %17275 = vmatprep.subr.bf16.mxu1 %v17274_v39  ;;  %v7480_v51 = vadd.f32 %v7479_v46, %v7410_v35  ;;  %v7481_v52 = vpop.f32.mrb[61].mxu0  ;;  %v2231_v35 = vrot.slane %v2217_v24, %v18225_v25  ;;  %v580_v39 = vld [vmem:[%s18199_s12 + $0x7b8] sm:$0xff]  ;;  %v17294_v46 = vpack.c.bf16 %v962_v34, %v578_v33 }
 0x23d   : > { %v7551_v53 = vpop.f32.mrb[61].mxu1  ;;  %v17298_v48 = vpack.c.bf16 %v964_v40, %v580_v39  ;;  %v579_v52 = vld [vmem:[%s18199_s12 + $0x7b0] sm:$0xff]  ;;  %v972_v24 = vld [vmem:[%s18199_s12 + $0x13f8] sm:$0x3] }
 0x23e   : > { %v7550_v59 = vadd.f32 %v7549_v47, %v7480_v51  ;;  %v2233_v47 = vcombine.high %v2231_v35, %v2231_v35  ;;  %v961_v51 = vld [vmem:[%s18199_s12 + $0x13a0] sm:$0x3]  ;;  %v963_v53 = vld [vmem:[%s18199_s12 + $0x13b0] sm:$0x3] }
 0x23f   : > { %v17300_v3 = vpack.c.bf16 %v963_v53, %v579_v52 }
 0x240   : > { %11258 = vmatmul.mubr.f32.vlgmr.msra.gmra.mrb[114].mxu0 %v2173_v20  ;;  %v2215_v20 = vcombine.high %v2207_v5, %v2207_v5 }
 0x241   : > { %11328 = vmatmul.mubr.f32.vlgmr.msra.gmra.mrb[114].mxu1 %v2180_v26  ;;  %17273 = vmatpush1.bf16.xpose.msra.mxu0 %v17272_v57  ;;  %v573_v26 = vld [vmem:[%s18199_s12 + $0x780] sm:$0xff]  ;;  %v582_v57 = vld [vmem:[%s18199_s12 + $0x7c8] sm:$0xff] }
 0x242   : > { %17277 = vmatpush1.bf16.xpose.msra.mxu1 %v17276_v58  ;;  %11397 = vmatprep.mubr.f32.mxu0 %v2198_v60  ;;  %v17288_v42 = vpack.c.bf16 %v957_v27, %v573_v26  ;;  %v966_v58 = vld [vmem:[%s18199_s12 + $0x13c8] sm:$0x3]  ;;  %v300_v26 = vld [vmem:[%s18193_s21 + $0x1f8] sm:$0xff] }
 0x243   : > { %17279 = vmatprep.subr.bf16.mxu0 %v17278_v61  ;;  %v7619_v6 = vpop.f32.mrb[62].mxu0  ;;  %11467 = vmatprep.mubr.f32.mxu1 %v2199_v62  ;;  %v2268_v34 = vcombine.high %v300_v26, %v300_v26  ;;  %v2275_v39 = vrot.slane %v300_v26, %v18225_v25 }
 0x244   : > { %v7689_v7 = vpop.f32.mrb[62].mxu1  ;;  %17283 = vmatprep.subr.bf16.mxu1 %v17282_v63  ;;  %v7620_v11 = vadd.f32 %v7619_v6, %v7550_v59  ;;  %v7621_v12 = vpop.f32.mrb[63].mxu0  ;;  %v2248_v59 = vrot.slane %v2234_v49, %v18225_v25  ;;  %v584_v63 = vld [vmem:[%s18199_s12 + $0x7d8] sm:$0xff]  ;;  %v17302_v6 = vpack.c.bf16 %v966_v58, %v582_v57 }
 0x245   : > { %v7691_v13 = vpop.f32.mrb[63].mxu1  ;;  %v17306_v8 = vpack.c.bf16 %v968_v0, %v584_v63  ;;  %v583_v12 = vld [vmem:[%s18199_s12 + $0x7d0] sm:$0xff]  ;;  %v976_v49 = vld [vmem:[%s18199_s12 + $0x1418] sm:$0x3] }
 0x246   : > { %v7690_v19 = vadd.f32 %v7689_v7, %v7620_v11  ;;  %v2250_v7 = vcombine.high %v2248_v59, %v2248_v59  ;;  %v965_v11 = vld [vmem:[%s18199_s12 + $0x13c0] sm:$0x3]  ;;  %v967_v13 = vld [vmem:[%s18199_s12 + $0x13d0] sm:$0x3] }
 0x247   : > { %v17308_v28 = vpack.c.bf16 %v967_v13, %v583_v12 }
 0x248   : > { %11398 = vmatmul.mubr.f32.vlgmr.msra.gmra.mrb[116].mxu0 %v2190_v45  ;;  %v2232_v45 = vcombine.high %v2224_v30, %v2224_v30 }
 0x249   : > { %11468 = vmatmul.mubr.f32.vlgmr.msra.gmra.mrb[116].mxu1 %v2197_v50  ;;  %17281 = vmatpush1.bf16.xpose.msra.mxu0 %v17280_v17  ;;  %v577_v50 = vld [vmem:[%s18199_s12 + $0x7a0] sm:$0xff]  ;;  %v586_v17 = vld [vmem:[%s18199_s12 + $0x7e8] sm:$0xff] }
 0x24a   : > { %17285 = vmatpush1.bf16.xpose.msra.mxu1 %v17284_v18  ;;  %11537 = vmatprep.mubr.f32.mxu0 %v2215_v20  ;;  %v17296_v2 = vpack.c.bf16 %v961_v51, %v577_v50  ;;  %v970_v18 = vld [vmem:[%s18199_s12 + $0x13e8] sm:$0x3]  ;;  %v301_v50 = vld [vmem:[%s18193_s21 + $0x200] sm:$0xff] }
 0x24b   : > { %17287 = vmatprep.subr.bf16.mxu0 %v17286_v21  ;;  %v7759_v31 = vpop.f32.mrb[64].mxu0  ;;  %11607 = vmatprep.mubr.f32.mxu1 %v2216_v22  ;;  %v2285_v58 = vcombine.high %v301_v50, %v301_v50  ;;  %v2292_v63 = vrot.slane %v301_v50, %v18225_v25 }
 0x24c   : > { %v7829_v32 = vpop.f32.mrb[64].mxu1  ;;  %17291 = vmatprep.subr.bf16.mxu1 %v17290_v23  ;;  %v7760_v36 = vadd.f32 %v7759_v31, %v7690_v19  ;;  %v7761_v37 = vpop.f32.mrb[65].mxu0  ;;  %v2265_v19 = vrot.slane %v2251_v9, %v18225_v25  ;;  %v588_v23 = vld [vmem:[%s18199_s12 + $0x7f8] sm:$0xff]  ;;  %v17310_v31 = vpack.c.bf16 %v970_v18, %v586_v17 }
 0x24d   : > { %v7831_v38 = vpop.f32.mrb[65].mxu1  ;;  %v17314_v33 = vpack.c.bf16 %v972_v24, %v588_v23  ;;  %v587_v37 = vld [vmem:[%s18199_s12 + $0x7f0] sm:$0xff]  ;;  %v980_v9 = vld [vmem:[%s18199_s12 + $0x1438] sm:$0x3] }
 0x24e   : > { %v7830_v44 = vadd.f32 %v7829_v32, %v7760_v36  ;;  %v2267_v32 = vcombine.high %v2265_v19, %v2265_v19  ;;  %v969_v36 = vld [vmem:[%s18199_s12 + $0x13e0] sm:$0x3]  ;;  %v971_v38 = vld [vmem:[%s18199_s12 + $0x13f0] sm:$0x3] }
 0x24f   : > { %v17316_v52 = vpack.c.bf16 %v971_v38, %v587_v37 }
 0x250   : > { %11538 = vmatmul.mubr.f32.vlgmr.msra.gmra.mrb[118].mxu0 %v2207_v5  ;;  %v2249_v5 = vcombine.high %v2241_v54, %v2241_v54 }
 0x251   : > { %11608 = vmatmul.mubr.f32.vlgmr.msra.gmra.mrb[118].mxu1 %v2214_v10  ;;  %17289 = vmatpush1.bf16.xpose.msra.mxu0 %v17288_v42  ;;  %v581_v10 = vld [vmem:[%s18199_s12 + $0x7c0] sm:$0xff]  ;;  %v590_v42 = vld [vmem:[%s18199_s12 + $0x808] sm:$0xff] }
 0x252   : > { %17293 = vmatpush1.bf16.xpose.msra.mxu1 %v17292_v43  ;;  %11677 = vmatprep.mubr.f32.mxu0 %v2232_v45  ;;  %v17304_v27 = vpack.c.bf16 %v965_v11, %v581_v10  ;;  %v974_v43 = vld [vmem:[%s18199_s12 + $0x1408] sm:$0x3] }
 0x253   : > { %17295 = vmatprep.subr.bf16.mxu0 %v17294_v46  ;;  %v7899_v55 = vpop.f32.mrb[66].mxu0  ;;  %11747 = vmatprep.mubr.f32.mxu1 %v2233_v47  ;;  %v302_v10 = vld [vmem:[%s18193_s21 + $0x208] sm:$0xff] }
 0x254   : > { %v7969_v56 = vpop.f32.mrb[66].mxu1  ;;  %17299 = vmatprep.subr.bf16.mxu1 %v17298_v48  ;;  %v7900_v60 = vadd.f32 %v7899_v55, %v7830_v44  ;;  %v7901_v61 = vpop.f32.mrb[67].mxu0  ;;  %v2282_v44 = vrot.slane %v2268_v34, %v18225_v25  ;;  %v592_v48 = vld [vmem:[%s18199_s12 + $0x818] sm:$0xff]  ;;  %v17318_v55 = vpack.c.bf16 %v974_v43, %v590_v42  ;;  %v2302_v18 = vcombine.high %v302_v10, %v302_v10 }
 0x255   : > { %v7971_v62 = vpop.f32.mrb[67].mxu1  ;;  %v17322_v57 = vpack.c.bf16 %v976_v49, %v592_v48  ;;  %v591_v61 = vld [vmem:[%s18199_s12 + $0x810] sm:$0xff]  ;;  %v2309_v23 = vrot.slane %v302_v10, %v18225_v25  ;;  %v984_v34 = vld [vmem:[%s18199_s12 + $0x1458] sm:$0x3] }
 0x256   : > { %v7970_v4 = vadd.f32 %v7969_v56, %v7900_v60  ;;  %v2284_v56 = vcombine.high %v2282_v44, %v2282_v44  ;;  %v973_v60 = vld [vmem:[%s18199_s12 + $0x1400] sm:$0x3]  ;;  %v975_v62 = vld [vmem:[%s18199_s12 + $0x1410] sm:$0x3] }
 0x257   : > { %v17324_v12 = vpack.c.bf16 %v975_v62, %v591_v61 }
 0x258   : > { %11678 = vmatmul.mubr.f32.vlgmr.msra.gmra.mrb[120].mxu0 %v2224_v30  ;;  %v2266_v30 = vcombine.high %v2258_v14, %v2258_v14 }
 0x259   : > { %11748 = vmatmul.mubr.f32.vlgmr.msra.gmra.mrb[120].mxu1 %v2231_v35  ;;  %17297 = vmatpush1.bf16.xpose.msra.mxu0 %v17296_v2  ;;  %v585_v35 = vld [vmem:[%s18199_s12 + $0x7e0] sm:$0xff]  ;;  %v594_v2 = vld [vmem:[%s18199_s12 + $0x828] sm:$0xff] }
 0x25a   : > { %17301 = vmatpush1.bf16.xpose.msra.mxu1 %v17300_v3  ;;  %11817 = vmatprep.mubr.f32.mxu0 %v2249_v5  ;;  %v17312_v51 = vpack.c.bf16 %v969_v36, %v585_v35  ;;  %v978_v3 = vld [vmem:[%s18199_s12 + $0x1428] sm:$0x3]  ;;  %v303_v35 = vld [vmem:[%s18193_s21 + $0x210] sm:$0xff] }
 0x25b   : > { %17303 = vmatprep.subr.bf16.mxu0 %v17302_v6  ;;  %v8039_v15 = vpop.f32.mrb[68].mxu0  ;;  %11887 = vmatprep.mubr.f32.mxu1 %v2250_v7  ;;  %v2319_v43 = vcombine.high %v303_v35, %v303_v35  ;;  %v2326_v48 = vrot.slane %v303_v35, %v18225_v25 }
 0x25c   : > { %v8109_v16 = vpop.f32.mrb[68].mxu1  ;;  %17307 = vmatprep.subr.bf16.mxu1 %v17306_v8  ;;  %v8040_v20 = vadd.f32 %v8039_v15, %v7970_v4  ;;  %v8041_v21 = vpop.f32.mrb[69].mxu0  ;;  %v2299_v4 = vrot.slane %v2285_v58, %v18225_v25  ;;  %v596_v8 = vld [vmem:[%s18199_s12 + $0x838] sm:$0xff]  ;;  %v17326_v15 = vpack.c.bf16 %v978_v3, %v594_v2 }
 0x25d   : > { %v8111_v22 = vpop.f32.mrb[69].mxu1  ;;  %v17330_v17 = vpack.c.bf16 %v980_v9, %v596_v8  ;;  %v595_v21 = vld [vmem:[%s18199_s12 + $0x830] sm:$0xff]  ;;  %v988_v58 = vld [vmem:[%s18199_s12 + $0x1478] sm:$0x3] }
 0x25e   : > { %v8110_v29 = vadd.f32 %v8109_v16, %v8040_v20  ;;  %v2301_v16 = vcombine.high %v2299_v4, %v2299_v4  ;;  %v977_v20 = vld [vmem:[%s18199_s12 + $0x1420] sm:$0x3]  ;;  %v979_v22 = vld [vmem:[%s18199_s12 + $0x1430] sm:$0x3] }
 0x25f   : > { %v17332_v37 = vpack.c.bf16 %v979_v22, %v595_v21 }
 0x260   : > { %11818 = vmatmul.mubr.f32.vlgmr.msra.gmra.mrb[122].mxu0 %v2241_v54  ;;  %v2283_v54 = vcombine.high %v2275_v39, %v2275_v39 }
 0x261   : > { %11888 = vmatmul.mubr.f32.vlgmr.msra.gmra.mrb[122].mxu1 %v2248_v59  ;;  %17305 = vmatpush1.bf16.xpose.msra.mxu0 %v17304_v27  ;;  %v589_v59 = vld [vmem:[%s18199_s12 + $0x800] sm:$0xff]  ;;  %v598_v27 = vld [vmem:[%s18199_s12 + $0x848] sm:$0xff] }
 0x262   : > { %17309 = vmatpush1.bf16.xpose.msra.mxu1 %v17308_v28  ;;  %11957 = vmatprep.mubr.f32.mxu0 %v2266_v30  ;;  %v17320_v11 = vpack.c.bf16 %v973_v60, %v589_v59  ;;  %v982_v28 = vld [vmem:[%s18199_s12 + $0x1448] sm:$0x3]  ;;  %v304_v59 = vld [vmem:[%s18193_s21 + $0x218] sm:$0xff] }
 0x263   : > { %17311 = vmatprep.subr.bf16.mxu0 %v17310_v31  ;;  %v8179_v40 = vpop.f32.mrb[70].mxu0  ;;  %12027 = vmatprep.mubr.f32.mxu1 %v2267_v32  ;;  %v2336_v3 = vcombine.high %v304_v59, %v304_v59  ;;  %v2343_v8 = vrot.slane %v304_v59, %v18225_v25 }
 0x264   : > { %v8249_v41 = vpop.f32.mrb[70].mxu1  ;;  %17315 = vmatprep.subr.bf16.mxu1 %v17314_v33  ;;  %v8180_v45 = vadd.f32 %v8179_v40, %v8110_v29  ;;  %v8181_v46 = vpop.f32.mrb[71].mxu0  ;;  %v2316_v29 = vrot.slane %v2302_v18, %v18225_v25  ;;  %v600_v33 = vld [vmem:[%s18199_s12 + $0x858] sm:$0xff]  ;;  %v17334_v40 = vpack.c.bf16 %v982_v28, %v598_v27 }
 0x265   : > { %v8251_v47 = vpop.f32.mrb[71].mxu1  ;;  %v17338_v42 = vpack.c.bf16 %v984_v34, %v600_v33  ;;  %v599_v46 = vld [vmem:[%s18199_s12 + $0x850] sm:$0xff]  ;;  %v992_v18 = vld [vmem:[%s18199_s12 + $0x1498] sm:$0x3] }
 0x266   : > { %v8250_v53 = vadd.f32 %v8249_v41, %v8180_v45  ;;  %v2318_v41 = vcombine.high %v2316_v29, %v2316_v29  ;;  %v981_v45 = vld [vmem:[%s18199_s12 + $0x1440] sm:$0x3]  ;;  %v983_v47 = vld [vmem:[%s18199_s12 + $0x1450] sm:$0x3] }
 0x267   : > { %v17340_v61 = vpack.c.bf16 %v983_v47, %v599_v46 }
 0x268   : > { %11958 = vmatmul.mubr.f32.vlgmr.msra.gmra.mrb[124].mxu0 %v2258_v14  ;;  %v2300_v14 = vcombine.high %v2292_v63, %v2292_v63 }
 0x269   : > { %12028 = vmatmul.mubr.f32.vlgmr.msra.gmra.mrb[124].mxu1 %v2265_v19  ;;  %17313 = vmatpush1.bf16.xpose.msra.mxu0 %v17312_v51  ;;  %v593_v19 = vld [vmem:[%s18199_s12 + $0x820] sm:$0xff]  ;;  %v602_v51 = vld [vmem:[%s18199_s12 + $0x868] sm:$0xff] }
 0x26a   : > { %17317 = vmatpush1.bf16.xpose.msra.mxu1 %v17316_v52  ;;  %12097 = vmatprep.mubr.f32.mxu0 %v2283_v54  ;;  %v17328_v36 = vpack.c.bf16 %v977_v20, %v593_v19  ;;  %v986_v52 = vld [vmem:[%s18199_s12 + $0x1468] sm:$0x3]  ;;  %v305_v19 = vld [vmem:[%s18193_s21 + $0x220] sm:$0xff] }
 0x26b   : > { %17319 = vmatprep.subr.bf16.mxu0 %v17318_v55  ;;  %v8319_v0 = vpop.f32.mrb[72].mxu0  ;;  %12167 = vmatprep.mubr.f32.mxu1 %v2284_v56  ;;  %v2353_v28 = vcombine.high %v305_v19, %v305_v19  ;;  %v2360_v33 = vrot.slane %v305_v19, %v18225_v25 }
 0x26c   : > { %v8389_v1 = vpop.f32.mrb[72].mxu1  ;;  %17323 = vmatprep.subr.bf16.mxu1 %v17322_v57  ;;  %v8320_v5 = vadd.f32 %v8319_v0, %v8250_v53  ;;  %v8321_v6 = vpop.f32.mrb[73].mxu0  ;;  %v2333_v53 = vrot.slane %v2319_v43, %v18225_v25  ;;  %v604_v57 = vld [vmem:[%s18199_s12 + $0x878] sm:$0xff]  ;;  %v17342_v0 = vpack.c.bf16 %v986_v52, %v602_v51 }
 0x26d   : > { %v8391_v7 = vpop.f32.mrb[73].mxu1  ;;  %v17346_v2 = vpack.c.bf16 %v988_v58, %v604_v57  ;;  %v603_v6 = vld [vmem:[%s18199_s12 + $0x870] sm:$0xff]  ;;  %v996_v43 = vld [vmem:[%s18199_s12 + $0x14b8] sm:$0x3] }
 0x26e   : > { %v8390_v13 = vadd.f32 %v8389_v1, %v8320_v5  ;;  %v2335_v1 = vcombine.high %v2333_v53, %v2333_v53  ;;  %v985_v5 = vld [vmem:[%s18199_s12 + $0x1460] sm:$0x3]  ;;  %v987_v7 = vld [vmem:[%s18199_s12 + $0x1470] sm:$0x3] }
 0x26f   : > { %v17348_v21 = vpack.c.bf16 %v987_v7, %v603_v6 }
 0x270   : > { %12098 = vmatmul.mubr.f32.vlgmr.msra.gmra.mrb[126].mxu0 %v2275_v39  ;;  %v2317_v39 = vcombine.high %v2309_v23, %v2309_v23 }
 0x271   : > { %12168 = vmatmul.mubr.f32.vlgmr.msra.gmra.mrb[126].mxu1 %v2282_v44  ;;  %17321 = vmatpush1.bf16.xpose.msra.mxu0 %v17320_v11  ;;  %v597_v44 = vld [vmem:[%s18199_s12 + $0x840] sm:$0xff]  ;;  %v606_v11 = vld [vmem:[%s18199_s12 + $0x888] sm:$0xff] }
 0x272   : > { %17325 = vmatpush1.bf16.xpose.msra.mxu1 %v17324_v12  ;;  %12237 = vmatprep.mubr.f32.mxu0 %v2300_v14  ;;  %v17336_v60 = vpack.c.bf16 %v981_v45, %v597_v44  ;;  %v990_v12 = vld [vmem:[%s18199_s12 + $0x1488] sm:$0x3] }
 0x273   : > { %17327 = vmatprep.subr.bf16.mxu0 %v17326_v15  ;;  %v8459_v24 = vpop.f32.mrb[74].mxu0  ;;  %12307 = vmatprep.mubr.f32.mxu1 %v2301_v16  ;;  %v306_v44 = vld [vmem:[%s18193_s21 + $0x228] sm:$0xff] }
 0x274   : > { %v8529_v26 = vpop.f32.mrb[74].mxu1  ;;  %17331 = vmatprep.subr.bf16.mxu1 %v17330_v17  ;;  %v8460_v30 = vadd.f32 %v8459_v24, %v8390_v13  ;;  %v8461_v31 = vpop.f32.mrb[75].mxu0  ;;  %v2350_v13 = vrot.slane %v2336_v3, %v18225_v25  ;;  %v608_v17 = vld [vmem:[%s18199_s12 + $0x898] sm:$0xff]  ;;  %v17350_v24 = vpack.c.bf16 %v990_v12, %v606_v11  ;;  %v2370_v52 = vcombine.high %v306_v44, %v306_v44 }
 0x275   : > { %v8531_v32 = vpop.f32.mrb[75].mxu1  ;;  %v17354_v27 = vpack.c.bf16 %v992_v18, %v608_v17  ;;  %v607_v31 = vld [vmem:[%s18199_s12 + $0x890] sm:$0xff]  ;;  %v2377_v57 = vrot.slane %v306_v44, %v18225_v25  ;;  %v1000_v3 = vld [vmem:[%s18199_s12 + $0x14d8] sm:$0x3] }
 0x276   : > { %v8530_v38 = vadd.f32 %v8529_v26, %v8460_v30  ;;  %v2352_v26 = vcombine.high %v2350_v13, %v2350_v13  ;;  %v989_v30 = vld [vmem:[%s18199_s12 + $0x1480] sm:$0x3]  ;;  %v991_v32 = vld [vmem:[%s18199_s12 + $0x1490] sm:$0x3] }
 0x277   : > { %v17356_v46 = vpack.c.bf16 %v991_v32, %v607_v31 }
 0x278   : > { %12238 = vmatmul.mubr.f32.vlgmr.msra.gmra.mrb[128].mxu0 %v2292_v63  ;;  %v2334_v63 = vcombine.high %v2326_v48, %v2326_v48 }
 0x279   : > { %12308 = vmatmul.mubr.f32.vlgmr.msra.gmra.mrb[128].mxu1 %v2299_v4  ;;  %17329 = vmatpush1.bf16.xpose.msra.mxu0 %v17328_v36  ;;  %v601_v4 = vld [vmem:[%s18199_s12 + $0x860] sm:$0xff]  ;;  %v610_v36 = vld [vmem:[%s18199_s12 + $0x8a8] sm:$0xff] }
 0x27a   : > { %17333 = vmatpush1.bf16.xpose.msra.mxu1 %v17332_v37  ;;  %12377 = vmatprep.mubr.f32.mxu0 %v2317_v39  ;;  %v17344_v20 = vpack.c.bf16 %v985_v5, %v601_v4  ;;  %v994_v37 = vld [vmem:[%s18199_s12 + $0x14a8] sm:$0x3]  ;;  %v307_v4 = vld [vmem:[%s18193_s21 + $0x230] sm:$0xff] }
 0x27b   : > { %17335 = vmatprep.subr.bf16.mxu0 %v17334_v40  ;;  %v8599_v49 = vpop.f32.mrb[76].mxu0  ;;  %12447 = vmatprep.mubr.f32.mxu1 %v2318_v41  ;;  %v2387_v12 = vcombine.high %v307_v4, %v307_v4  ;;  %v2394_v17 = vrot.slane %v307_v4, %v18225_v25 }
 0x27c   : > { %v8669_v50 = vpop.f32.mrb[76].mxu1  ;;  %17339 = vmatprep.subr.bf16.mxu1 %v17338_v42  ;;  %v8600_v54 = vadd.f32 %v8599_v49, %v8530_v38  ;;  %v8601_v55 = vpop.f32.mrb[77].mxu0  ;;  %v2367_v38 = vrot.slane %v2353_v28, %v18225_v25  ;;  %v612_v42 = vld [vmem:[%s18199_s12 + $0x8b8] sm:$0xff]  ;;  %v17358_v49 = vpack.c.bf16 %v994_v37, %v610_v36 }
 0x27d   : > { %v8671_v56 = vpop.f32.mrb[77].mxu1  ;;  %v17362_v51 = vpack.c.bf16 %v996_v43, %v612_v42  ;;  %v611_v55 = vld [vmem:[%s18199_s12 + $0x8b0] sm:$0xff]  ;;  %v1004_v28 = vld [vmem:[%s18199_s12 + $0x14f8] sm:$0x3] }
 0x27e   : > { %v8670_v62 = vadd.f32 %v8669_v50, %v8600_v54  ;;  %v2369_v50 = vcombine.high %v2367_v38, %v2367_v38  ;;  %v993_v54 = vld [vmem:[%s18199_s12 + $0x14a0] sm:$0x3]  ;;  %v995_v56 = vld [vmem:[%s18199_s12 + $0x14b0] sm:$0x3] }
 0x27f   : > { %v17364_v6 = vpack.c.bf16 %v995_v56, %v611_v55 }
 0x280   : > { %12378 = vmatmul.mubr.f32.vlgmr.msra.gmra.mrb[130].mxu0 %v2309_v23  ;;  %v2351_v23 = vcombine.high %v2343_v8, %v2343_v8 }
 0x281   : > { %12448 = vmatmul.mubr.f32.vlgmr.msra.gmra.mrb[130].mxu1 %v2316_v29  ;;  %17337 = vmatpush1.bf16.xpose.msra.mxu0 %v17336_v60  ;;  %v605_v29 = vld [vmem:[%s18199_s12 + $0x880] sm:$0xff]  ;;  %v614_v60 = vld [vmem:[%s18199_s12 + $0x8c8] sm:$0xff] }
 0x282   : > { %17341 = vmatpush1.bf16.xpose.msra.mxu1 %v17340_v61  ;;  %12517 = vmatprep.mubr.f32.mxu0 %v2334_v63  ;;  %v17352_v45 = vpack.c.bf16 %v989_v30, %v605_v29  ;;  %v998_v61 = vld [vmem:[%s18199_s12 + $0x14c8] sm:$0x3]  ;;  %v308_v29 = vld [vmem:[%s18193_s21 + $0x238] sm:$0xff] }
 0x283   : > { %17343 = vmatprep.subr.bf16.mxu0 %v17342_v0  ;;  %v8739_v9 = vpop.f32.mrb[78].mxu0  ;;  %12587 = vmatprep.mubr.f32.mxu1 %v2335_v1  ;;  %v2404_v37 = vcombine.high %v308_v29, %v308_v29  ;;  %v2411_v42 = vrot.slane %v308_v29, %v18225_v25 }
 0x284   : > { %v8809_v10 = vpop.f32.mrb[78].mxu1  ;;  %17347 = vmatprep.subr.bf16.mxu1 %v17346_v2  ;;  %v8740_v14 = vadd.f32 %v8739_v9, %v8670_v62  ;;  %v8741_v15 = vpop.f32.mrb[79].mxu0  ;;  %v2384_v62 = vrot.slane %v2370_v52, %v18225_v25  ;;  %v616_v2 = vld [vmem:[%s18199_s12 + $0x8d8] sm:$0xff]  ;;  %v17366_v9 = vpack.c.bf16 %v998_v61, %v614_v60 }
 0x285   : > { %v8811_v16 = vpop.f32.mrb[79].mxu1  ;;  %v17370_v11 = vpack.c.bf16 %v1000_v3, %v616_v2  ;;  %v615_v15 = vld [vmem:[%s18199_s12 + $0x8d0] sm:$0xff]  ;;  %v1008_v52 = vld [vmem:[%s18199_s12 + $0x1518] sm:$0x3] }
 0x286   : > { %v8810_v22 = vadd.f32 %v8809_v10, %v8740_v14  ;;  %v2386_v10 = vcombine.high %v2384_v62, %v2384_v62  ;;  %v997_v14 = vld [vmem:[%s18199_s12 + $0x14c0] sm:$0x3]  ;;  %v999_v16 = vld [vmem:[%s18199_s12 + $0x14d0] sm:$0x3] }
 0x287   : > { %v17372_v31 = vpack.c.bf16 %v999_v16, %v615_v15 }
 0x288   : > { %12518 = vmatmul.mubr.f32.vlgmr.msra.gmra.mrb[132].mxu0 %v2326_v48  ;;  %v2368_v48 = vcombine.high %v2360_v33, %v2360_v33 }
 0x289   : > { %12588 = vmatmul.mubr.f32.vlgmr.msra.gmra.mrb[132].mxu1 %v2333_v53  ;;  %17345 = vmatpush1.bf16.xpose.msra.mxu0 %v17344_v20  ;;  %v609_v53 = vld [vmem:[%s18199_s12 + $0x8a0] sm:$0xff]  ;;  %v618_v20 = vld [vmem:[%s18199_s12 + $0x8e8] sm:$0xff] }
 0x28a   : > { %17349 = vmatpush1.bf16.xpose.msra.mxu1 %v17348_v21  ;;  %12657 = vmatprep.mubr.f32.mxu0 %v2351_v23  ;;  %v17360_v5 = vpack.c.bf16 %v993_v54, %v609_v53  ;;  %v1002_v21 = vld [vmem:[%s18199_s12 + $0x14e8] sm:$0x3]  ;;  %v309_v53 = vld [vmem:[%s18193_s21 + $0x240] sm:$0xff] }
 0x28b   : > { %17351 = vmatprep.subr.bf16.mxu0 %v17350_v24  ;;  %v8879_v34 = vpop.f32.mrb[80].mxu0  ;;  %12727 = vmatprep.mubr.f32.mxu1 %v2352_v26  ;;  %v2421_v61 = vcombine.high %v309_v53, %v309_v53  ;;  %v2428_v2 = vrot.slane %v309_v53, %v18225_v25 }
 0x28c   : > { %v8949_v35 = vpop.f32.mrb[80].mxu1  ;;  %17355 = vmatprep.subr.bf16.mxu1 %v17354_v27  ;;  %v8880_v39 = vadd.f32 %v8879_v34, %v8810_v22  ;;  %v8881_v40 = vpop.f32.mrb[81].mxu0  ;;  %v2401_v22 = vrot.slane %v2387_v12, %v18225_v25  ;;  %v620_v27 = vld [vmem:[%s18199_s12 + $0x8f8] sm:$0xff]  ;;  %v17374_v34 = vpack.c.bf16 %v1002_v21, %v618_v20 }
 0x28d   : > { %v8951_v41 = vpop.f32.mrb[81].mxu1  ;;  %v17378_v36 = vpack.c.bf16 %v1004_v28, %v620_v27  ;;  %v619_v40 = vld [vmem:[%s18199_s12 + $0x8f0] sm:$0xff]  ;;  %v1012_v12 = vld [vmem:[%s18199_s12 + $0x1538] sm:$0x3] }
 0x28e   : > { %v8950_v47 = vadd.f32 %v8949_v35, %v8880_v39  ;;  %v2403_v35 = vcombine.high %v2401_v22, %v2401_v22  ;;  %v1001_v39 = vld [vmem:[%s18199_s12 + $0x14e0] sm:$0x3]  ;;  %v1003_v41 = vld [vmem:[%s18199_s12 + $0x14f0] sm:$0x3] }
 0x28f   : > { %v17380_v55 = vpack.c.bf16 %v1003_v41, %v619_v40 }
 0x290   : > { %12658 = vmatmul.mubr.f32.vlgmr.msra.gmra.mrb[134].mxu0 %v2343_v8  ;;  %v2385_v8 = vcombine.high %v2377_v57, %v2377_v57 }
 0x291   : > { %12728 = vmatmul.mubr.f32.vlgmr.msra.gmra.mrb[134].mxu1 %v2350_v13  ;;  %17353 = vmatpush1.bf16.xpose.msra.mxu0 %v17352_v45  ;;  %v613_v13 = vld [vmem:[%s18199_s12 + $0x8c0] sm:$0xff]  ;;  %v622_v45 = vld [vmem:[%s18199_s12 + $0x908] sm:$0xff] }
 0x292   : > { %17357 = vmatpush1.bf16.xpose.msra.mxu1 %v17356_v46  ;;  %12797 = vmatprep.mubr.f32.mxu0 %v2368_v48  ;;  %v17368_v30 = vpack.c.bf16 %v997_v14, %v613_v13  ;;  %v1006_v46 = vld [vmem:[%s18199_s12 + $0x1508] sm:$0x3] }
 0x293   : > { %17359 = vmatprep.subr.bf16.mxu0 %v17358_v49  ;;  %v9019_v58 = vpop.f32.mrb[82].mxu0  ;;  %12867 = vmatprep.mubr.f32.mxu1 %v2369_v50  ;;  %v310_v13 = vld [vmem:[%s18193_s21 + $0x248] sm:$0xff] }
 0x294   : > { %v9089_v59 = vpop.f32.mrb[82].mxu1  ;;  %17363 = vmatprep.subr.bf16.mxu1 %v17362_v51  ;;  %v9020_v63 = vadd.f32 %v9019_v58, %v8950_v47  ;;  %v9021_v0 = vpop.f32.mrb[83].mxu0  ;;  %v2418_v47 = vrot.slane %v2404_v37, %v18225_v25  ;;  %v624_v51 = vld [vmem:[%s18199_s12 + $0x918] sm:$0xff]  ;;  %v17382_v58 = vpack.c.bf16 %v1006_v46, %v622_v45  ;;  %v2438_v21 = vcombine.high %v310_v13, %v310_v13 }
 0x295   : > { %v9091_v1 = vpop.f32.mrb[83].mxu1  ;;  %v17386_v60 = vpack.c.bf16 %v1008_v52, %v624_v51  ;;  %v623_v0 = vld [vmem:[%s18199_s12 + $0x910] sm:$0xff]  ;;  %v2445_v27 = vrot.slane %v310_v13, %v18225_v25  ;;  %v1016_v37 = vld [vmem:[%s18199_s12 + $0x1558] sm:$0x3] }
 0x296   : > { %v9090_v7 = vadd.f32 %v9089_v59, %v9020_v63  ;;  %v2420_v59 = vcombine.high %v2418_v47, %v2418_v47  ;;  %v1005_v63 = vld [vmem:[%s18199_s12 + $0x1500] sm:$0x3]  ;;  %v1007_v1 = vld [vmem:[%s18199_s12 + $0x1510] sm:$0x3] }
 0x297   : > { %v17388_v15 = vpack.c.bf16 %v1007_v1, %v623_v0 }
 0x298   : > { %12798 = vmatmul.mubr.f32.vlgmr.msra.gmra.mrb[136].mxu0 %v2360_v33  ;;  %v2402_v33 = vcombine.high %v2394_v17, %v2394_v17 }
 0x299   : > { %12868 = vmatmul.mubr.f32.vlgmr.msra.gmra.mrb[136].mxu1 %v2367_v38  ;;  %17361 = vmatpush1.bf16.xpose.msra.mxu0 %v17360_v5  ;;  %v617_v38 = vld [vmem:[%s18199_s12 + $0x8e0] sm:$0xff]  ;;  %v626_v5 = vld [vmem:[%s18199_s12 + $0x928] sm:$0xff] }
 0x29a   : > { %17365 = vmatpush1.bf16.xpose.msra.mxu1 %v17364_v6  ;;  %12937 = vmatprep.mubr.f32.mxu0 %v2385_v8  ;;  %v17376_v54 = vpack.c.bf16 %v1001_v39, %v617_v38  ;;  %v1010_v6 = vld [vmem:[%s18199_s12 + $0x1528] sm:$0x3]  ;;  %v311_v38 = vld [vmem:[%s18193_s21 + $0x250] sm:$0xff] }
 0x29b   : > { %17367 = vmatprep.subr.bf16.mxu0 %v17366_v9  ;;  %v9159_v18 = vpop.f32.mrb[84].mxu0  ;;  %13007 = vmatprep.mubr.f32.mxu1 %v2386_v10  ;;  %v2455_v46 = vcombine.high %v311_v38, %v311_v38  ;;  %v2462_v51 = vrot.slane %v311_v38, %v18225_v25 }
 0x29c   : > { %v9229_v19 = vpop.f32.mrb[84].mxu1  ;;  %17371 = vmatprep.subr.bf16.mxu1 %v17370_v11  ;;  %v9160_v23 = vadd.f32 %v9159_v18, %v9090_v7  ;;  %v9161_v24 = vpop.f32.mrb[85].mxu0  ;;  %v2435_v7 = vrot.slane %v2421_v61, %v18225_v25  ;;  %v628_v11 = vld [vmem:[%s18199_s12 + $0x938] sm:$0xff]  ;;  %v17390_v18 = vpack.c.bf16 %v1010_v6, %v626_v5 }
 0x29d   : > { %v9231_v26 = vpop.f32.mrb[85].mxu1  ;;  %v17394_v20 = vpack.c.bf16 %v1012_v12, %v628_v11  ;;  %v627_v24 = vld [vmem:[%s18199_s12 + $0x930] sm:$0xff]  ;;  %v1020_v61 = vld [vmem:[%s18199_s12 + $0x1578] sm:$0x3] }
 0x29e   : > { %v9230_v32 = vadd.f32 %v9229_v19, %v9160_v23  ;;  %v2437_v19 = vcombine.high %v2435_v7, %v2435_v7  ;;  %v1009_v23 = vld [vmem:[%s18199_s12 + $0x1520] sm:$0x3]  ;;  %v1011_v26 = vld [vmem:[%s18199_s12 + $0x1530] sm:$0x3] }
 0x29f   : > { %v17396_v40 = vpack.c.bf16 %v1011_v26, %v627_v24 }
 0x2a0   : > { %12938 = vmatmul.mubr.f32.vlgmr.msra.gmra.mrb[138].mxu0 %v2377_v57  ;;  %v2419_v57 = vcombine.high %v2411_v42, %v2411_v42 }
 0x2a1   : > { %13008 = vmatmul.mubr.f32.vlgmr.msra.gmra.mrb[138].mxu1 %v2384_v62  ;;  %17369 = vmatpush1.bf16.xpose.msra.mxu0 %v17368_v30  ;;  %v621_v62 = vld [vmem:[%s18199_s12 + $0x900] sm:$0xff]  ;;  %v630_v30 = vld [vmem:[%s18199_s12 + $0x948] sm:$0xff] }
 0x2a2   : > { %17373 = vmatpush1.bf16.xpose.msra.mxu1 %v17372_v31  ;;  %13077 = vmatprep.mubr.f32.mxu0 %v2402_v33  ;;  %v17384_v14 = vpack.c.bf16 %v1005_v63, %v621_v62  ;;  %v1014_v31 = vld [vmem:[%s18199_s12 + $0x1548] sm:$0x3]  ;;  %v312_v62 = vld [vmem:[%s18193_s21 + $0x258] sm:$0xff] }
 0x2a3   : > { %17375 = vmatprep.subr.bf16.mxu0 %v17374_v34  ;;  %v9299_v43 = vpop.f32.mrb[86].mxu0  ;;  %13147 = vmatprep.mubr.f32.mxu1 %v2403_v35  ;;  %v2472_v6 = vcombine.high %v312_v62, %v312_v62  ;;  %v2479_v11 = vrot.slane %v312_v62, %v18225_v25 }
 0x2a4   : > { %v9369_v44 = vpop.f32.mrb[86].mxu1  ;;  %17379 = vmatprep.subr.bf16.mxu1 %v17378_v36  ;;  %v9300_v48 = vadd.f32 %v9299_v43, %v9230_v32  ;;  %v9301_v49 = vpop.f32.mrb[87].mxu0  ;;  %v2452_v32 = vrot.slane %v2438_v21, %v18225_v25  ;;  %v632_v36 = vld [vmem:[%s18199_s12 + $0x958] sm:$0xff]  ;;  %v17398_v43 = vpack.c.bf16 %v1014_v31, %v630_v30 }
 0x2a5   : > { %v9371_v50 = vpop.f32.mrb[87].mxu1  ;;  %v17402_v45 = vpack.c.bf16 %v1016_v37, %v632_v36  ;;  %v631_v49 = vld [vmem:[%s18199_s12 + $0x950] sm:$0xff]  ;;  %v1024_v21 = vld [vmem:[%s18199_s12 + $0x1598] sm:$0x3] }
 0x2a6   : > { %v9370_v56 = vadd.f32 %v9369_v44, %v9300_v48  ;;  %v2454_v44 = vcombine.high %v2452_v32, %v2452_v32  ;;  %v1013_v48 = vld [vmem:[%s18199_s12 + $0x1540] sm:$0x3]  ;;  %v1015_v50 = vld [vmem:[%s18199_s12 + $0x1550] sm:$0x3] }
 0x2a7   : > { %v17404_v0 = vpack.c.bf16 %v1015_v50, %v631_v49 }
 0x2a8   : > { %13078 = vmatmul.mubr.f32.vlgmr.msra.gmra.mrb[140].mxu0 %v2394_v17  ;;  %v2436_v17 = vcombine.high %v2428_v2, %v2428_v2 }
 0x2a9   : > { %13148 = vmatmul.mubr.f32.vlgmr.msra.gmra.mrb[140].mxu1 %v2401_v22  ;;  %17377 = vmatpush1.bf16.xpose.msra.mxu0 %v17376_v54  ;;  %v625_v22 = vld [vmem:[%s18199_s12 + $0x920] sm:$0xff]  ;;  %v634_v54 = vld [vmem:[%s18199_s12 + $0x968] sm:$0xff] }
 0x2aa   : > { %17381 = vmatpush1.bf16.xpose.msra.mxu1 %v17380_v55  ;;  %13217 = vmatprep.mubr.f32.mxu0 %v2419_v57  ;;  %v17392_v39 = vpack.c.bf16 %v1009_v23, %v625_v22  ;;  %v1018_v55 = vld [vmem:[%s18199_s12 + $0x1568] sm:$0x3]  ;;  %v313_v22 = vld [vmem:[%s18193_s21 + $0x260] sm:$0xff] }
 0x2ab   : > { %17383 = vmatprep.subr.bf16.mxu0 %v17382_v58  ;;  %v9439_v3 = vpop.f32.mrb[88].mxu0  ;;  %13287 = vmatprep.mubr.f32.mxu1 %v2420_v59  ;;  %v2489_v31 = vcombine.high %v313_v22, %v313_v22  ;;  %v2496_v36 = vrot.slane %v313_v22, %v18225_v25 }
 0x2ac   : > { %v9509_v4 = vpop.f32.mrb[88].mxu1  ;;  %17387 = vmatprep.subr.bf16.mxu1 %v17386_v60  ;;  %v9440_v8 = vadd.f32 %v9439_v3, %v9370_v56  ;;  %v9441_v9 = vpop.f32.mrb[89].mxu0  ;;  %v2469_v56 = vrot.slane %v2455_v46, %v18225_v25  ;;  %v636_v60 = vld [vmem:[%s18199_s12 + $0x978] sm:$0xff]  ;;  %v17406_v3 = vpack.c.bf16 %v1018_v55, %v634_v54 }
 0x2ad   : > { %v9511_v10 = vpop.f32.mrb[89].mxu1  ;;  %v17410_v5 = vpack.c.bf16 %v1020_v61, %v636_v60  ;;  %v635_v9 = vld [vmem:[%s18199_s12 + $0x970] sm:$0xff]  ;;  %v1028_v46 = vld [vmem:[%s18199_s12 + $0x15b8] sm:$0x3] }
 0x2ae   : > { %v9510_v16 = vadd.f32 %v9509_v4, %v9440_v8  ;;  %v2471_v4 = vcombine.high %v2469_v56, %v2469_v56  ;;  %v1017_v8 = vld [vmem:[%s18199_s12 + $0x1560] sm:$0x3]  ;;  %v1019_v10 = vld [vmem:[%s18199_s12 + $0x1570] sm:$0x3] }
 0x2af   : > { %v17412_v24 = vpack.c.bf16 %v1019_v10, %v635_v9 }
 0x2b0   : > { %13218 = vmatmul.mubr.f32.vlgmr.msra.gmra.mrb[142].mxu0 %v2411_v42  ;;  %v2453_v42 = vcombine.high %v2445_v27, %v2445_v27 }
 0x2b1   : > { %13288 = vmatmul.mubr.f32.vlgmr.msra.gmra.mrb[142].mxu1 %v2418_v47  ;;  %17385 = vmatpush1.bf16.xpose.msra.mxu0 %v17384_v14  ;;  %v629_v47 = vld [vmem:[%s18199_s12 + $0x940] sm:$0xff]  ;;  %v638_v14 = vld [vmem:[%s18199_s12 + $0x988] sm:$0xff] }
 0x2b2   : > { %17389 = vmatpush1.bf16.xpose.msra.mxu1 %v17388_v15  ;;  %13357 = vmatprep.mubr.f32.mxu0 %v2436_v17  ;;  %v17400_v63 = vpack.c.bf16 %v1013_v48, %v629_v47  ;;  %v1022_v15 = vld [vmem:[%s18199_s12 + $0x1588] sm:$0x3] }
 0x2b3   : > { %17391 = vmatprep.subr.bf16.mxu0 %v17390_v18  ;;  %v9579_v28 = vpop.f32.mrb[90].mxu0  ;;  %13427 = vmatprep.mubr.f32.mxu1 %v2437_v19  ;;  %v314_v47 = vld [vmem:[%s18193_s21 + $0x268] sm:$0xff] }
 0x2b4   : > { %v9649_v29 = vpop.f32.mrb[90].mxu1  ;;  %17395 = vmatprep.subr.bf16.mxu1 %v17394_v20  ;;  %v9580_v33 = vadd.f32 %v9579_v28, %v9510_v16  ;;  %v9581_v34 = vpop.f32.mrb[91].mxu0  ;;  %v2486_v16 = vrot.slane %v2472_v6, %v18225_v25  ;;  %v640_v20 = vld [vmem:[%s18199_s12 + $0x998] sm:$0xff]  ;;  %v17414_v28 = vpack.c.bf16 %v1022_v15, %v638_v14  ;;  %v2506_v55 = vcombine.high %v314_v47, %v314_v47 }
 0x2b5   : > { %v9651_v35 = vpop.f32.mrb[91].mxu1  ;;  %v17418_v30 = vpack.c.bf16 %v1024_v21, %v640_v20  ;;  %v639_v34 = vld [vmem:[%s18199_s12 + $0x990] sm:$0xff]  ;;  %v2513_v60 = vrot.slane %v314_v47, %v18225_v25  ;;  %v1032_v6 = vld [vmem:[%s18199_s12 + $0x15d8] sm:$0x3] }
 0x2b6   : > { %v9650_v41 = vadd.f32 %v9649_v29, %v9580_v33  ;;  %v2488_v29 = vcombine.high %v2486_v16, %v2486_v16  ;;  %v1021_v33 = vld [vmem:[%s18199_s12 + $0x1580] sm:$0x3]  ;;  %v1023_v35 = vld [vmem:[%s18199_s12 + $0x1590] sm:$0x3] }
 0x2b7   : > { %v17420_v49 = vpack.c.bf16 %v1023_v35, %v639_v34 }
 0x2b8   : > { %13358 = vmatmul.mubr.f32.vlgmr.msra.gmra.mrb[144].mxu0 %v2428_v2  ;;  %v2470_v2 = vcombine.high %v2462_v51, %v2462_v51 }
 0x2b9   : > { %13428 = vmatmul.mubr.f32.vlgmr.msra.gmra.mrb[144].mxu1 %v2435_v7  ;;  %17393 = vmatpush1.bf16.xpose.msra.mxu0 %v17392_v39  ;;  %v633_v7 = vld [vmem:[%s18199_s12 + $0x960] sm:$0xff]  ;;  %v642_v39 = vld [vmem:[%s18199_s12 + $0x9a8] sm:$0xff] }
 0x2ba   : > { %17397 = vmatpush1.bf16.xpose.msra.mxu1 %v17396_v40  ;;  %13497 = vmatprep.mubr.f32.mxu0 %v2453_v42  ;;  %v17408_v23 = vpack.c.bf16 %v1017_v8, %v633_v7  ;;  %v1026_v40 = vld [vmem:[%s18199_s12 + $0x15a8] sm:$0x3]  ;;  %v315_v7 = vld [vmem:[%s18193_s21 + $0x270] sm:$0xff] }
 0x2bb   : > { %17399 = vmatprep.subr.bf16.mxu0 %v17398_v43  ;;  %v9719_v52 = vpop.f32.mrb[92].mxu0  ;;  %13567 = vmatprep.mubr.f32.mxu1 %v2454_v44  ;;  %v2523_v15 = vcombine.high %v315_v7, %v315_v7  ;;  %v2530_v20 = vrot.slane %v315_v7, %v18225_v25 }
 0x2bc   : > { %v9789_v53 = vpop.f32.mrb[92].mxu1  ;;  %17403 = vmatprep.subr.bf16.mxu1 %v17402_v45  ;;  %v9720_v57 = vadd.f32 %v9719_v52, %v9650_v41  ;;  %v9721_v58 = vpop.f32.mrb[93].mxu0  ;;  %v2503_v41 = vrot.slane %v2489_v31, %v18225_v25  ;;  %v644_v45 = vld [vmem:[%s18199_s12 + $0x9b8] sm:$0xff]  ;;  %v17422_v52 = vpack.c.bf16 %v1026_v40, %v642_v39 }
 0x2bd   : > { %v9791_v59 = vpop.f32.mrb[93].mxu1  ;;  %v17426_v54 = vpack.c.bf16 %v1028_v46, %v644_v45  ;;  %v643_v58 = vld [vmem:[%s18199_s12 + $0x9b0] sm:$0xff]  ;;  %v1036_v31 = vld [vmem:[%s18199_s12 + $0x15f8] sm:$0x3] }
 0x2be   : > { %v9790_v1 = vadd.f32 %v9789_v53, %v9720_v57  ;;  %v2505_v53 = vcombine.high %v2503_v41, %v2503_v41  ;;  %v1025_v57 = vld [vmem:[%s18199_s12 + $0x15a0] sm:$0x3]  ;;  %v1027_v59 = vld [vmem:[%s18199_s12 + $0x15b0] sm:$0x3] }
 0x2bf   : > { %v17428_v9 = vpack.c.bf16 %v1027_v59, %v643_v58 }
 0x2c0   : > { %13498 = vmatmul.mubr.f32.vlgmr.msra.gmra.mrb[146].mxu0 %v2445_v27  ;;  %v2487_v27 = vcombine.high %v2479_v11, %v2479_v11 }
 0x2c1   : > { %13568 = vmatmul.mubr.f32.vlgmr.msra.gmra.mrb[146].mxu1 %v2452_v32  ;;  %17401 = vmatpush1.bf16.xpose.msra.mxu0 %v17400_v63  ;;  %v637_v32 = vld [vmem:[%s18199_s12 + $0x980] sm:$0xff]  ;;  %v646_v63 = vld [vmem:[%s18199_s12 + $0x9c8] sm:$0xff] }
 0x2c2   : > { %17405 = vmatpush1.bf16.xpose.msra.mxu1 %v17404_v0  ;;  %13637 = vmatprep.mubr.f32.mxu0 %v2470_v2  ;;  %v17416_v48 = vpack.c.bf16 %v1021_v33, %v637_v32  ;;  %v1030_v0 = vld [vmem:[%s18199_s12 + $0x15c8] sm:$0x3]  ;;  %v316_v32 = vld [vmem:[%s18193_s21 + $0x278] sm:$0xff] }
 0x2c3   : > { %17407 = vmatprep.subr.bf16.mxu0 %v17406_v3  ;;  %v9859_v12 = vpop.f32.mrb[94].mxu0  ;;  %13707 = vmatprep.mubr.f32.mxu1 %v2471_v4  ;;  %v2540_v40 = vcombine.high %v316_v32, %v316_v32  ;;  %v2547_v45 = vrot.slane %v316_v32, %v18225_v25 }
 0x2c4   : > { %v9929_v13 = vpop.f32.mrb[94].mxu1  ;;  %17411 = vmatprep.subr.bf16.mxu1 %v17410_v5  ;;  %v9860_v17 = vadd.f32 %v9859_v12, %v9790_v1  ;;  %v9861_v18 = vpop.f32.mrb[95].mxu0  ;;  %v2520_v1 = vrot.slane %v2506_v55, %v18225_v25  ;;  %v648_v5 = vld [vmem:[%s18199_s12 + $0x9d8] sm:$0xff]  ;;  %v17430_v12 = vpack.c.bf16 %v1030_v0, %v646_v63 }
 0x2c5   : > { %v9931_v19 = vpop.f32.mrb[95].mxu1  ;;  %v17434_v14 = vpack.c.bf16 %v1032_v6, %v648_v5  ;;  %v647_v18 = vld [vmem:[%s18199_s12 + $0x9d0] sm:$0xff]  ;;  %v1040_v55 = vld [vmem:[%s18199_s12 + $0x1618] sm:$0x3] }
 0x2c6   : > { %v9930_v26 = vadd.f32 %v9929_v13, %v9860_v17  ;;  %v2522_v13 = vcombine.high %v2520_v1, %v2520_v1  ;;  %v1029_v17 = vld [vmem:[%s18199_s12 + $0x15c0] sm:$0x3]  ;;  %v1031_v19 = vld [vmem:[%s18199_s12 + $0x15d0] sm:$0x3] }
 0x2c7   : > { %v17436_v34 = vpack.c.bf16 %v1031_v19, %v647_v18 }
 0x2c8   : > { %13638 = vmatmul.mubr.f32.vlgmr.msra.gmra.mrb[148].mxu0 %v2462_v51  ;;  %v2504_v51 = vcombine.high %v2496_v36, %v2496_v36 }
 0x2c9   : > { %13708 = vmatmul.mubr.f32.vlgmr.msra.gmra.mrb[148].mxu1 %v2469_v56  ;;  %17409 = vmatpush1.bf16.xpose.msra.mxu0 %v17408_v23  ;;  %v641_v56 = vld [vmem:[%s18199_s12 + $0x9a0] sm:$0xff]  ;;  %v650_v23 = vld [vmem:[%s18199_s12 + $0x9e8] sm:$0xff] }
 0x2ca   : > { %17413 = vmatpush1.bf16.xpose.msra.mxu1 %v17412_v24  ;;  %13777 = vmatprep.mubr.f32.mxu0 %v2487_v27  ;;  %v17424_v8 = vpack.c.bf16 %v1025_v57, %v641_v56  ;;  %v1034_v24 = vld [vmem:[%s18199_s12 + $0x15e8] sm:$0x3]  ;;  %v317_v56 = vld [vmem:[%s18193_s21 + $0x280] sm:$0xff] }
 0x2cb   : > { %17415 = vmatprep.subr.bf16.mxu0 %v17414_v28  ;;  %v9999_v37 = vpop.f32.mrb[96].mxu0  ;;  %13847 = vmatprep.mubr.f32.mxu1 %v2488_v29  ;;  %v2557_v0 = vcombine.high %v317_v56, %v317_v56  ;;  %v2564_v5 = vrot.slane %v317_v56, %v18225_v25 }
 0x2cc   : > { %v10069_v38 = vpop.f32.mrb[96].mxu1  ;;  %17419 = vmatprep.subr.bf16.mxu1 %v17418_v30  ;;  %v10000_v42 = vadd.f32 %v9999_v37, %v9930_v26  ;;  %v10001_v43 = vpop.f32.mrb[97].mxu0  ;;  %v2537_v26 = vrot.slane %v2523_v15, %v18225_v25  ;;  %v652_v30 = vld [vmem:[%s18199_s12 + $0x9f8] sm:$0xff]  ;;  %v17438_v37 = vpack.c.bf16 %v1034_v24, %v650_v23 }
 0x2cd   : > { %v10071_v44 = vpop.f32.mrb[97].mxu1  ;;  %v17442_v39 = vpack.c.bf16 %v1036_v31, %v652_v30  ;;  %v651_v43 = vld [vmem:[%s18199_s12 + $0x9f0] sm:$0xff]  ;;  %v1044_v15 = vld [vmem:[%s18199_s12 + $0x1638] sm:$0x3] }
 0x2ce   : > { %v10070_v50 = vadd.f32 %v10069_v38, %v10000_v42  ;;  %v2539_v38 = vcombine.high %v2537_v26, %v2537_v26  ;;  %v1033_v42 = vld [vmem:[%s18199_s12 + $0x15e0] sm:$0x3]  ;;  %v1035_v44 = vld [vmem:[%s18199_s12 + $0x15f0] sm:$0x3] }
 0x2cf   : > { %v17444_v58 = vpack.c.bf16 %v1035_v44, %v651_v43 }
 0x2d0   : > { %13778 = vmatmul.mubr.f32.vlgmr.msra.gmra.mrb[150].mxu0 %v2479_v11  ;;  %v2521_v11 = vcombine.high %v2513_v60, %v2513_v60 }
 0x2d1   : > { %13848 = vmatmul.mubr.f32.vlgmr.msra.gmra.mrb[150].mxu1 %v2486_v16  ;;  %17417 = vmatpush1.bf16.xpose.msra.mxu0 %v17416_v48  ;;  %v645_v16 = vld [vmem:[%s18199_s12 + $0x9c0] sm:$0xff]  ;;  %v654_v48 = vld [vmem:[%s18199_s12 + $0xa08] sm:$0xff] }
 0x2d2   : > { %17421 = vmatpush1.bf16.xpose.msra.mxu1 %v17420_v49  ;;  %13917 = vmatprep.mubr.f32.mxu0 %v2504_v51  ;;  %v17432_v33 = vpack.c.bf16 %v1029_v17, %v645_v16  ;;  %v1038_v49 = vld [vmem:[%s18199_s12 + $0x1608] sm:$0x3] }
 0x2d3   : > { %17423 = vmatprep.subr.bf16.mxu0 %v17422_v52  ;;  %v10139_v61 = vpop.f32.mrb[98].mxu0  ;;  %13987 = vmatprep.mubr.f32.mxu1 %v2505_v53  ;;  %v318_v16 = vld [vmem:[%s18193_s21 + $0x288] sm:$0xff] }
 0x2d4   : > { %v10209_v62 = vpop.f32.mrb[98].mxu1  ;;  %17427 = vmatprep.subr.bf16.mxu1 %v17426_v54  ;;  %v10140_v2 = vadd.f32 %v10139_v61, %v10070_v50  ;;  %v10141_v3 = vpop.f32.mrb[99].mxu0  ;;  %v2554_v50 = vrot.slane %v2540_v40, %v18225_v25  ;;  %v656_v54 = vld [vmem:[%s18199_s12 + $0xa18] sm:$0xff]  ;;  %v17446_v61 = vpack.c.bf16 %v1038_v49, %v654_v48  ;;  %v2574_v24 = vcombine.high %v318_v16, %v318_v16 }
 0x2d5   : > { %v10211_v4 = vpop.f32.mrb[99].mxu1  ;;  %v17450_v63 = vpack.c.bf16 %v1040_v55, %v656_v54  ;;  %v655_v3 = vld [vmem:[%s18199_s12 + $0xa10] sm:$0xff]  ;;  %v2581_v30 = vrot.slane %v318_v16, %v18225_v25  ;;  %v1048_v40 = vld [vmem:[%s18199_s12 + $0x1658] sm:$0x3] }
 0x2d6   : > { %v10210_v10 = vadd.f32 %v10209_v62, %v10140_v2  ;;  %v2556_v62 = vcombine.high %v2554_v50, %v2554_v50  ;;  %v1037_v2 = vld [vmem:[%s18199_s12 + $0x1600] sm:$0x3]  ;;  %v1039_v4 = vld [vmem:[%s18199_s12 + $0x1610] sm:$0x3] }
 0x2d7   : > { %v17452_v18 = vpack.c.bf16 %v1039_v4, %v655_v3 }
 0x2d8   : > { %13918 = vmatmul.mubr.f32.vlgmr.msra.gmra.mrb[152].mxu0 %v2496_v36  ;;  %v2538_v36 = vcombine.high %v2530_v20, %v2530_v20 }
 0x2d9   : > { %13988 = vmatmul.mubr.f32.vlgmr.msra.gmra.mrb[152].mxu1 %v2503_v41  ;;  %17425 = vmatpush1.bf16.xpose.msra.mxu0 %v17424_v8  ;;  %v649_v41 = vld [vmem:[%s18199_s12 + $0x9e0] sm:$0xff]  ;;  %v658_v8 = vld [vmem:[%s18199_s12 + $0xa28] sm:$0xff] }
 0x2da   : > { %17429 = vmatpush1.bf16.xpose.msra.mxu1 %v17428_v9  ;;  %14057 = vmatprep.mubr.f32.mxu0 %v2521_v11  ;;  %v17440_v57 = vpack.c.bf16 %v1033_v42, %v649_v41  ;;  %v1042_v9 = vld [vmem:[%s18199_s12 + $0x1628] sm:$0x3]  ;;  %v319_v41 = vld [vmem:[%s18193_s21 + $0x290] sm:$0xff] }
 0x2db   : > { %17431 = vmatprep.subr.bf16.mxu0 %v17430_v12  ;;  %v10279_v21 = vpop.f32.mrb[100].mxu0  ;;  %14127 = vmatprep.mubr.f32.mxu1 %v2522_v13  ;;  %v2591_v49 = vcombine.high %v319_v41, %v319_v41  ;;  %v2598_v54 = vrot.slane %v319_v41, %v18225_v25 }
 0x2dc   : > { %v10349_v22 = vpop.f32.mrb[100].mxu1  ;;  %17435 = vmatprep.subr.bf16.mxu1 %v17434_v14  ;;  %v10280_v27 = vadd.f32 %v10279_v21, %v10210_v10  ;;  %v10281_v28 = vpop.f32.mrb[101].mxu0  ;;  %v2571_v10 = vrot.slane %v2557_v0, %v18225_v25  ;;  %v660_v14 = vld [vmem:[%s18199_s12 + $0xa38] sm:$0xff]  ;;  %v17454_v21 = vpack.c.bf16 %v1042_v9, %v658_v8 }
 0x2dd   : > { %v10351_v29 = vpop.f32.mrb[101].mxu1  ;;  %v17458_v23 = vpack.c.bf16 %v1044_v15, %v660_v14  ;;  %v659_v28 = vld [vmem:[%s18199_s12 + $0xa30] sm:$0xff]  ;;  %v1052_v0 = vld [vmem:[%s18199_s12 + $0x1678] sm:$0x3] }
 0x2de   : > { %v10350_v35 = vadd.f32 %v10349_v22, %v10280_v27  ;;  %v2573_v22 = vcombine.high %v2571_v10, %v2571_v10  ;;  %v1041_v27 = vld [vmem:[%s18199_s12 + $0x1620] sm:$0x3]  ;;  %v1043_v29 = vld [vmem:[%s18199_s12 + $0x1630] sm:$0x3] }
 0x2df   : > { %v17460_v43 = vpack.c.bf16 %v1043_v29, %v659_v28 }
 0x2e0   : > { %14058 = vmatmul.mubr.f32.vlgmr.msra.gmra.mrb[154].mxu0 %v2513_v60  ;;  %v2555_v60 = vcombine.high %v2547_v45, %v2547_v45 }
 0x2e1   : > { %14128 = vmatmul.mubr.f32.vlgmr.msra.gmra.mrb[154].mxu1 %v2520_v1  ;;  %17433 = vmatpush1.bf16.xpose.msra.mxu0 %v17432_v33  ;;  %v653_v1 = vld [vmem:[%s18199_s12 + $0xa00] sm:$0xff]  ;;  %v662_v33 = vld [vmem:[%s18199_s12 + $0xa48] sm:$0xff] }
 0x2e2   : > { %17437 = vmatpush1.bf16.xpose.msra.mxu1 %v17436_v34  ;;  %14197 = vmatprep.mubr.f32.mxu0 %v2538_v36  ;;  %v17448_v17 = vpack.c.bf16 %v1037_v2, %v653_v1  ;;  %v1046_v34 = vld [vmem:[%s18199_s12 + $0x1648] sm:$0x3]  ;;  %v320_v1 = vld [vmem:[%s18193_s21 + $0x298] sm:$0xff] }
 0x2e3   : > { %17439 = vmatprep.subr.bf16.mxu0 %v17438_v37  ;;  %v10419_v46 = vpop.f32.mrb[102].mxu0  ;;  %14267 = vmatprep.mubr.f32.mxu1 %v2539_v38  ;;  %v2608_v9 = vcombine.high %v320_v1, %v320_v1  ;;  %v2615_v14 = vrot.slane %v320_v1, %v18225_v25 }
 0x2e4   : > { %v10489_v47 = vpop.f32.mrb[102].mxu1  ;;  %17443 = vmatprep.subr.bf16.mxu1 %v17442_v39  ;;  %v10420_v51 = vadd.f32 %v10419_v46, %v10350_v35  ;;  %v10421_v52 = vpop.f32.mrb[103].mxu0  ;;  %v2588_v35 = vrot.slane %v2574_v24, %v18225_v25  ;;  %v664_v39 = vld [vmem:[%s18199_s12 + $0xa58] sm:$0xff]  ;;  %v17462_v46 = vpack.c.bf16 %v1046_v34, %v662_v33 }
 0x2e5   : > { %v10491_v53 = vpop.f32.mrb[103].mxu1  ;;  %v17466_v48 = vpack.c.bf16 %v1048_v40, %v664_v39  ;;  %v663_v52 = vld [vmem:[%s18199_s12 + $0xa50] sm:$0xff]  ;;  %v1056_v24 = vld [vmem:[%s18199_s12 + $0x1698] sm:$0x3] }
 0x2e6   : > { %v10490_v59 = vadd.f32 %v10489_v47, %v10420_v51  ;;  %v2590_v47 = vcombine.high %v2588_v35, %v2588_v35  ;;  %v1045_v51 = vld [vmem:[%s18199_s12 + $0x1640] sm:$0x3]  ;;  %v1047_v53 = vld [vmem:[%s18199_s12 + $0x1650] sm:$0x3] }
 0x2e7   : > { %v17468_v3 = vpack.c.bf16 %v1047_v53, %v663_v52 }
 0x2e8   : > { %14198 = vmatmul.mubr.f32.vlgmr.msra.gmra.mrb[156].mxu0 %v2530_v20  ;;  %v2572_v20 = vcombine.high %v2564_v5, %v2564_v5 }
 0x2e9   : > { %14268 = vmatmul.mubr.f32.vlgmr.msra.gmra.mrb[156].mxu1 %v2537_v26  ;;  %17441 = vmatpush1.bf16.xpose.msra.mxu0 %v17440_v57  ;;  %v657_v26 = vld [vmem:[%s18199_s12 + $0xa20] sm:$0xff]  ;;  %v666_v57 = vld [vmem:[%s18199_s12 + $0xa68] sm:$0xff] }
 0x2ea   : > { %17445 = vmatpush1.bf16.xpose.msra.mxu1 %v17444_v58  ;;  %14337 = vmatprep.mubr.f32.mxu0 %v2555_v60  ;;  %v17456_v42 = vpack.c.bf16 %v1041_v27, %v657_v26  ;;  %v1050_v58 = vld [vmem:[%s18199_s12 + $0x1668] sm:$0x3]  ;;  %v321_v26 = vld [vmem:[%s18193_s21 + $0x2a0] sm:$0xff] }
 0x2eb   : > { %17447 = vmatprep.subr.bf16.mxu0 %v17446_v61  ;;  %v10559_v6 = vpop.f32.mrb[104].mxu0  ;;  %14407 = vmatprep.mubr.f32.mxu1 %v2556_v62  ;;  %v2625_v34 = vcombine.high %v321_v26, %v321_v26  ;;  %v2632_v39 = vrot.slane %v321_v26, %v18225_v25 }
 0x2ec   : > { %v10629_v7 = vpop.f32.mrb[104].mxu1  ;;  %17451 = vmatprep.subr.bf16.mxu1 %v17450_v63  ;;  %v10560_v11 = vadd.f32 %v10559_v6, %v10490_v59  ;;  %v10561_v12 = vpop.f32.mrb[105].mxu0  ;;  %v2605_v59 = vrot.slane %v2591_v49, %v18225_v25  ;;  %v668_v63 = vld [vmem:[%s18199_s12 + $0xa78] sm:$0xff]  ;;  %v17470_v6 = vpack.c.bf16 %v1050_v58, %v666_v57 }
 0x2ed   : > { %v10631_v13 = vpop.f32.mrb[105].mxu1  ;;  %v17474_v8 = vpack.c.bf16 %v1052_v0, %v668_v63  ;;  %v667_v12 = vld [vmem:[%s18199_s12 + $0xa70] sm:$0xff]  ;;  %v1060_v49 = vld [vmem:[%s18199_s12 + $0x16b8] sm:$0x3] }
 0x2ee   : > { %v10630_v19 = vadd.f32 %v10629_v7, %v10560_v11  ;;  %v2607_v7 = vcombine.high %v2605_v59, %v2605_v59  ;;  %v1049_v11 = vld [vmem:[%s18199_s12 + $0x1660] sm:$0x3]  ;;  %v1051_v13 = vld [vmem:[%s18199_s12 + $0x1670] sm:$0x3] }
 0x2ef   : > { %v17476_v28 = vpack.c.bf16 %v1051_v13, %v667_v12 }
 0x2f0   : > { %14338 = vmatmul.mubr.f32.vlgmr.msra.gmra.mrb[158].mxu0 %v2547_v45  ;;  %v2589_v45 = vcombine.high %v2581_v30, %v2581_v30 }
 0x2f1   : > { %14408 = vmatmul.mubr.f32.vlgmr.msra.gmra.mrb[158].mxu1 %v2554_v50  ;;  %17449 = vmatpush1.bf16.xpose.msra.mxu0 %v17448_v17  ;;  %v661_v50 = vld [vmem:[%s18199_s12 + $0xa40] sm:$0xff]  ;;  %v670_v17 = vld [vmem:[%s18199_s12 + $0xa88] sm:$0xff] }
 0x2f2   : > { %17453 = vmatpush1.bf16.xpose.msra.mxu1 %v17452_v18  ;;  %14477 = vmatprep.mubr.f32.mxu0 %v2572_v20  ;;  %v17464_v2 = vpack.c.bf16 %v1045_v51, %v661_v50  ;;  %v1054_v18 = vld [vmem:[%s18199_s12 + $0x1688] sm:$0x3] }
 0x2f3   : > { %17455 = vmatprep.subr.bf16.mxu0 %v17454_v21  ;;  %v10699_v31 = vpop.f32.mrb[106].mxu0  ;;  %14547 = vmatprep.mubr.f32.mxu1 %v2573_v22  ;;  %v322_v50 = vld [vmem:[%s18193_s21 + $0x2a8] sm:$0xff] }
 0x2f4   : > { %v10769_v32 = vpop.f32.mrb[106].mxu1  ;;  %17459 = vmatprep.subr.bf16.mxu1 %v17458_v23  ;;  %v10700_v36 = vadd.f32 %v10699_v31, %v10630_v19  ;;  %v10701_v37 = vpop.f32.mrb[107].mxu0  ;;  %v2622_v19 = vrot.slane %v2608_v9, %v18225_v25  ;;  %v672_v23 = vld [vmem:[%s18199_s12 + $0xa98] sm:$0xff]  ;;  %v17478_v31 = vpack.c.bf16 %v1054_v18, %v670_v17  ;;  %v2642_v58 = vcombine.high %v322_v50, %v322_v50 }
 0x2f5   : > { %v10771_v38 = vpop.f32.mrb[107].mxu1  ;;  %v17482_v33 = vpack.c.bf16 %v1056_v24, %v672_v23  ;;  %v671_v37 = vld [vmem:[%s18199_s12 + $0xa90] sm:$0xff]  ;;  %v2649_v63 = vrot.slane %v322_v50, %v18225_v25  ;;  %v1064_v9 = vld [vmem:[%s18199_s12 + $0x16d8] sm:$0x3] }
 0x2f6   : > { %v10770_v44 = vadd.f32 %v10769_v32, %v10700_v36  ;;  %v2624_v32 = vcombine.high %v2622_v19, %v2622_v19  ;;  %v1053_v36 = vld [vmem:[%s18199_s12 + $0x1680] sm:$0x3]  ;;  %v1055_v38 = vld [vmem:[%s18199_s12 + $0x1690] sm:$0x3] }
 0x2f7   : > { %v17484_v52 = vpack.c.bf16 %v1055_v38, %v671_v37 }
 0x2f8   : > { %14478 = vmatmul.mubr.f32.vlgmr.msra.gmra.mrb[160].mxu0 %v2564_v5  ;;  %v2606_v5 = vcombine.high %v2598_v54, %v2598_v54 }
 0x2f9   : > { %14548 = vmatmul.mubr.f32.vlgmr.msra.gmra.mrb[160].mxu1 %v2571_v10  ;;  %17457 = vmatpush1.bf16.xpose.msra.mxu0 %v17456_v42  ;;  %v665_v10 = vld [vmem:[%s18199_s12 + $0xa60] sm:$0xff]  ;;  %v674_v42 = vld [vmem:[%s18199_s12 + $0xaa8] sm:$0xff] }
 0x2fa   : > { %17461 = vmatpush1.bf16.xpose.msra.mxu1 %v17460_v43  ;;  %14617 = vmatprep.mubr.f32.mxu0 %v2589_v45  ;;  %v17472_v27 = vpack.c.bf16 %v1049_v11, %v665_v10  ;;  %v1058_v43 = vld [vmem:[%s18199_s12 + $0x16a8] sm:$0x3]  ;;  %v323_v10 = vld [vmem:[%s18193_s21 + $0x2b0] sm:$0xff] }
 0x2fb   : > { %17463 = vmatprep.subr.bf16.mxu0 %v17462_v46  ;;  %v10839_v55 = vpop.f32.mrb[108].mxu0  ;;  %14687 = vmatprep.mubr.f32.mxu1 %v2590_v47  ;;  %v2659_v18 = vcombine.high %v323_v10, %v323_v10  ;;  %v2666_v23 = vrot.slane %v323_v10, %v18225_v25 }
 0x2fc   : > { %v10909_v56 = vpop.f32.mrb[108].mxu1  ;;  %17467 = vmatprep.subr.bf16.mxu1 %v17466_v48  ;;  %v10840_v60 = vadd.f32 %v10839_v55, %v10770_v44  ;;  %v10841_v61 = vpop.f32.mrb[109].mxu0  ;;  %v2639_v44 = vrot.slane %v2625_v34, %v18225_v25  ;;  %v676_v48 = vld [vmem:[%s18199_s12 + $0xab8] sm:$0xff]  ;;  %v17486_v55 = vpack.c.bf16 %v1058_v43, %v674_v42 }
 0x2fd   : > { %v10911_v62 = vpop.f32.mrb[109].mxu1  ;;  %v17490_v57 = vpack.c.bf16 %v1060_v49, %v676_v48  ;;  %v675_v61 = vld [vmem:[%s18199_s12 + $0xab0] sm:$0xff]  ;;  %v1068_v34 = vld [vmem:[%s18199_s12 + $0x16f8] sm:$0x3] }
 0x2fe   : > { %v10910_v4 = vadd.f32 %v10909_v56, %v10840_v60  ;;  %v2641_v56 = vcombine.high %v2639_v44, %v2639_v44  ;;  %v1057_v60 = vld [vmem:[%s18199_s12 + $0x16a0] sm:$0x3]  ;;  %v1059_v62 = vld [vmem:[%s18199_s12 + $0x16b0] sm:$0x3] }
 0x2ff   : > { %v17492_v12 = vpack.c.bf16 %v1059_v62, %v675_v61 }
 0x300   : > { %14618 = vmatmul.mubr.f32.vlgmr.msra.gmra.mrb[162].mxu0 %v2581_v30  ;;  %v2623_v30 = vcombine.high %v2615_v14, %v2615_v14 }
 0x301   : > { %14688 = vmatmul.mubr.f32.vlgmr.msra.gmra.mrb[162].mxu1 %v2588_v35  ;;  %17465 = vmatpush1.bf16.xpose.msra.mxu0 %v17464_v2  ;;  %v669_v35 = vld [vmem:[%s18199_s12 + $0xa80] sm:$0xff]  ;;  %v678_v2 = vld [vmem:[%s18199_s12 + $0xac8] sm:$0xff] }
 0x302   : > { %17469 = vmatpush1.bf16.xpose.msra.mxu1 %v17468_v3  ;;  %14757 = vmatprep.mubr.f32.mxu0 %v2606_v5  ;;  %v17480_v51 = vpack.c.bf16 %v1053_v36, %v669_v35  ;;  %v1062_v3 = vld [vmem:[%s18199_s12 + $0x16c8] sm:$0x3]  ;;  %v324_v35 = vld [vmem:[%s18193_s21 + $0x2b8] sm:$0xff] }
 0x303   : > { %17471 = vmatprep.subr.bf16.mxu0 %v17470_v6  ;;  %v10979_v15 = vpop.f32.mrb[110].mxu0  ;;  %14827 = vmatprep.mubr.f32.mxu1 %v2607_v7  ;;  %v2676_v43 = vcombine.high %v324_v35, %v324_v35  ;;  %v2683_v48 = vrot.slane %v324_v35, %v18225_v25 }
 0x304   : > { %v11049_v16 = vpop.f32.mrb[110].mxu1  ;;  %17475 = vmatprep.subr.bf16.mxu1 %v17474_v8  ;;  %v10980_v20 = vadd.f32 %v10979_v15, %v10910_v4  ;;  %v10981_v21 = vpop.f32.mrb[111].mxu0  ;;  %v2656_v4 = vrot.slane %v2642_v58, %v18225_v25  ;;  %v680_v8 = vld [vmem:[%s18199_s12 + $0xad8] sm:$0xff]  ;;  %v17494_v15 = vpack.c.bf16 %v1062_v3, %v678_v2 }
 0x305   : > { %v11051_v22 = vpop.f32.mrb[111].mxu1  ;;  %v17498_v17 = vpack.c.bf16 %v1064_v9, %v680_v8  ;;  %v679_v21 = vld [vmem:[%s18199_s12 + $0xad0] sm:$0xff]  ;;  %v1072_v58 = vld [vmem:[%s18199_s12 + $0x1718] sm:$0x3] }
 0x306   : > { %v11050_v29 = vadd.f32 %v11049_v16, %v10980_v20  ;;  %v2658_v16 = vcombine.high %v2656_v4, %v2656_v4  ;;  %v1061_v20 = vld [vmem:[%s18199_s12 + $0x16c0] sm:$0x3]  ;;  %v1063_v22 = vld [vmem:[%s18199_s12 + $0x16d0] sm:$0x3] }
 0x307   : > { %v17500_v37 = vpack.c.bf16 %v1063_v22, %v679_v21 }
 0x308   : > { %14758 = vmatmul.mubr.f32.vlgmr.msra.gmra.mrb[164].mxu0 %v2598_v54  ;;  %v2640_v54 = vcombine.high %v2632_v39, %v2632_v39 }
 0x309   : > { %14828 = vmatmul.mubr.f32.vlgmr.msra.gmra.mrb[164].mxu1 %v2605_v59  ;;  %17473 = vmatpush1.bf16.xpose.msra.mxu0 %v17472_v27  ;;  %v673_v59 = vld [vmem:[%s18199_s12 + $0xaa0] sm:$0xff]  ;;  %v682_v27 = vld [vmem:[%s18199_s12 + $0xae8] sm:$0xff] }
 0x30a   : > { %17477 = vmatpush1.bf16.xpose.msra.mxu1 %v17476_v28  ;;  %14897 = vmatprep.mubr.f32.mxu0 %v2623_v30  ;;  %v17488_v11 = vpack.c.bf16 %v1057_v60, %v673_v59  ;;  %v1066_v28 = vld [vmem:[%s18199_s12 + $0x16e8] sm:$0x3]  ;;  %v325_v59 = vld [vmem:[%s18193_s21 + $0x2c0] sm:$0xff] }
 0x30b   : > { %17479 = vmatprep.subr.bf16.mxu0 %v17478_v31  ;;  %v11119_v40 = vpop.f32.mrb[112].mxu0  ;;  %14967 = vmatprep.mubr.f32.mxu1 %v2624_v32  ;;  %v2693_v3 = vcombine.high %v325_v59, %v325_v59  ;;  %v2700_v8 = vrot.slane %v325_v59, %v18225_v25 }
 0x30c   : > { %v11189_v41 = vpop.f32.mrb[112].mxu1  ;;  %17483 = vmatprep.subr.bf16.mxu1 %v17482_v33  ;;  %v11120_v45 = vadd.f32 %v11119_v40, %v11050_v29  ;;  %v11121_v46 = vpop.f32.mrb[113].mxu0  ;;  %v2673_v29 = vrot.slane %v2659_v18, %v18225_v25  ;;  %v684_v33 = vld [vmem:[%s18199_s12 + $0xaf8] sm:$0xff]  ;;  %v17502_v40 = vpack.c.bf16 %v1066_v28, %v682_v27 }
 0x30d   : > { %v11191_v47 = vpop.f32.mrb[113].mxu1  ;;  %v17506_v42 = vpack.c.bf16 %v1068_v34, %v684_v33  ;;  %v683_v46 = vld [vmem:[%s18199_s12 + $0xaf0] sm:$0xff]  ;;  %v1076_v18 = vld [vmem:[%s18199_s12 + $0x1738] sm:$0x3] }
 0x30e   : > { %v11190_v53 = vadd.f32 %v11189_v41, %v11120_v45  ;;  %v2675_v41 = vcombine.high %v2673_v29, %v2673_v29  ;;  %v1065_v45 = vld [vmem:[%s18199_s12 + $0x16e0] sm:$0x3]  ;;  %v1067_v47 = vld [vmem:[%s18199_s12 + $0x16f0] sm:$0x3] }
 0x30f   : > { %v17508_v61 = vpack.c.bf16 %v1067_v47, %v683_v46 }
 0x310   : > { %14898 = vmatmul.mubr.f32.vlgmr.msra.gmra.mrb[166].mxu0 %v2615_v14  ;;  %v2657_v14 = vcombine.high %v2649_v63, %v2649_v63 }
 0x311   : > { %14968 = vmatmul.mubr.f32.vlgmr.msra.gmra.mrb[166].mxu1 %v2622_v19  ;;  %17481 = vmatpush1.bf16.xpose.msra.mxu0 %v17480_v51  ;;  %v677_v19 = vld [vmem:[%s18199_s12 + $0xac0] sm:$0xff]  ;;  %v686_v51 = vld [vmem:[%s18199_s12 + $0xb08] sm:$0xff] }
 0x312   : > { %17485 = vmatpush1.bf16.xpose.msra.mxu1 %v17484_v52  ;;  %15037 = vmatprep.mubr.f32.mxu0 %v2640_v54  ;;  %v17496_v36 = vpack.c.bf16 %v1061_v20, %v677_v19  ;;  %v1070_v52 = vld [vmem:[%s18199_s12 + $0x1708] sm:$0x3] }
 0x313   : > { %17487 = vmatprep.subr.bf16.mxu0 %v17486_v55  ;;  %v11259_v0 = vpop.f32.mrb[114].mxu0  ;;  %15107 = vmatprep.mubr.f32.mxu1 %v2641_v56  ;;  %v326_v19 = vld [vmem:[%s18193_s21 + $0x2c8] sm:$0xff] }
 0x314   : > { %v11329_v1 = vpop.f32.mrb[114].mxu1  ;;  %17491 = vmatprep.subr.bf16.mxu1 %v17490_v57  ;;  %v11260_v5 = vadd.f32 %v11259_v0, %v11190_v53  ;;  %v11261_v6 = vpop.f32.mrb[115].mxu0  ;;  %v2690_v53 = vrot.slane %v2676_v43, %v18225_v25  ;;  %v688_v57 = vld [vmem:[%s18199_s12 + $0xb18] sm:$0xff]  ;;  %v17510_v0 = vpack.c.bf16 %v1070_v52, %v686_v51  ;;  %v2710_v28 = vcombine.high %v326_v19, %v326_v19 }
 0x315   : > { %v11331_v7 = vpop.f32.mrb[115].mxu1  ;;  %v17514_v2 = vpack.c.bf16 %v1072_v58, %v688_v57  ;;  %v687_v6 = vld [vmem:[%s18199_s12 + $0xb10] sm:$0xff]  ;;  %v2717_v33 = vrot.slane %v326_v19, %v18225_v25  ;;  %v1080_v43 = vld [vmem:[%s18199_s12 + $0x1758] sm:$0x3] }
 0x316   : > { %v11330_v13 = vadd.f32 %v11329_v1, %v11260_v5  ;;  %v2692_v1 = vcombine.high %v2690_v53, %v2690_v53  ;;  %v1069_v5 = vld [vmem:[%s18199_s12 + $0x1700] sm:$0x3]  ;;  %v1071_v7 = vld [vmem:[%s18199_s12 + $0x1710] sm:$0x3] }
 0x317   : > { %v17516_v21 = vpack.c.bf16 %v1071_v7, %v687_v6 }
 0x318   : > { %15038 = vmatmul.mubr.f32.vlgmr.msra.gmra.mrb[168].mxu0 %v2632_v39  ;;  %v2674_v39 = vcombine.high %v2666_v23, %v2666_v23 }
 0x319   : > { %15108 = vmatmul.mubr.f32.vlgmr.msra.gmra.mrb[168].mxu1 %v2639_v44  ;;  %17489 = vmatpush1.bf16.xpose.msra.mxu0 %v17488_v11  ;;  %v681_v44 = vld [vmem:[%s18199_s12 + $0xae0] sm:$0xff]  ;;  %v690_v11 = vld [vmem:[%s18199_s12 + $0xb28] sm:$0xff] }
 0x31a   : > { %17493 = vmatpush1.bf16.xpose.msra.mxu1 %v17492_v12  ;;  %15177 = vmatprep.mubr.f32.mxu0 %v2657_v14  ;;  %v17504_v60 = vpack.c.bf16 %v1065_v45, %v681_v44  ;;  %v1074_v12 = vld [vmem:[%s18199_s12 + $0x1728] sm:$0x3]  ;;  %v327_v44 = vld [vmem:[%s18193_s21 + $0x2d0] sm:$0xff] }
 0x31b   : > { %17495 = vmatprep.subr.bf16.mxu0 %v17494_v15  ;;  %v11399_v24 = vpop.f32.mrb[116].mxu0  ;;  %15247 = vmatprep.mubr.f32.mxu1 %v2658_v16  ;;  %v2727_v52 = vcombine.high %v327_v44, %v327_v44  ;;  %v2734_v57 = vrot.slane %v327_v44, %v18225_v25 }
 0x31c   : > { %v11469_v26 = vpop.f32.mrb[116].mxu1  ;;  %17499 = vmatprep.subr.bf16.mxu1 %v17498_v17  ;;  %v11400_v30 = vadd.f32 %v11399_v24, %v11330_v13  ;;  %v11401_v31 = vpop.f32.mrb[117].mxu0  ;;  %v2707_v13 = vrot.slane %v2693_v3, %v18225_v25  ;;  %v692_v17 = vld [vmem:[%s18199_s12 + $0xb38] sm:$0xff]  ;;  %v17518_v24 = vpack.c.bf16 %v1074_v12, %v690_v11 }
 0x31d   : > { %v11471_v32 = vpop.f32.mrb[117].mxu1  ;;  %v17522_v27 = vpack.c.bf16 %v1076_v18, %v692_v17  ;;  %v691_v31 = vld [vmem:[%s18199_s12 + $0xb30] sm:$0xff]  ;;  %v1084_v3 = vld [vmem:[%s18199_s12 + $0x1778] sm:$0x3] }
 0x31e   : > { %v11470_v38 = vadd.f32 %v11469_v26, %v11400_v30  ;;  %v2709_v26 = vcombine.high %v2707_v13, %v2707_v13  ;;  %v1073_v30 = vld [vmem:[%s18199_s12 + $0x1720] sm:$0x3]  ;;  %v1075_v32 = vld [vmem:[%s18199_s12 + $0x1730] sm:$0x3] }
 0x31f   : > { %v17524_v46 = vpack.c.bf16 %v1075_v32, %v691_v31 }
 0x320   : > { %15178 = vmatmul.mubr.f32.vlgmr.msra.gmra.mrb[170].mxu0 %v2649_v63  ;;  %v2691_v63 = vcombine.high %v2683_v48, %v2683_v48 }
 0x321   : > { %15248 = vmatmul.mubr.f32.vlgmr.msra.gmra.mrb[170].mxu1 %v2656_v4  ;;  %17497 = vmatpush1.bf16.xpose.msra.mxu0 %v17496_v36  ;;  %v685_v4 = vld [vmem:[%s18199_s12 + $0xb00] sm:$0xff]  ;;  %v694_v36 = vld [vmem:[%s18199_s12 + $0xb48] sm:$0xff] }
 0x322   : > { %17501 = vmatpush1.bf16.xpose.msra.mxu1 %v17500_v37  ;;  %15317 = vmatprep.mubr.f32.mxu0 %v2674_v39  ;;  %v17512_v20 = vpack.c.bf16 %v1069_v5, %v685_v4  ;;  %v1078_v37 = vld [vmem:[%s18199_s12 + $0x1748] sm:$0x3]  ;;  %v328_v4 = vld [vmem:[%s18193_s21 + $0x2d8] sm:$0xff] }
 0x323   : > { %17503 = vmatprep.subr.bf16.mxu0 %v17502_v40  ;;  %v11539_v49 = vpop.f32.mrb[118].mxu0  ;;  %15387 = vmatprep.mubr.f32.mxu1 %v2675_v41  ;;  %v2744_v12 = vcombine.high %v328_v4, %v328_v4  ;;  %v2751_v17 = vrot.slane %v328_v4, %v18225_v25 }
 0x324   : > { %v11609_v50 = vpop.f32.mrb[118].mxu1  ;;  %17507 = vmatprep.subr.bf16.mxu1 %v17506_v42  ;;  %v11540_v54 = vadd.f32 %v11539_v49, %v11470_v38  ;;  %v11541_v55 = vpop.f32.mrb[119].mxu0  ;;  %v2724_v38 = vrot.slane %v2710_v28, %v18225_v25  ;;  %v696_v42 = vld [vmem:[%s18199_s12 + $0xb58] sm:$0xff]  ;;  %v17526_v49 = vpack.c.bf16 %v1078_v37, %v694_v36 }
 0x325   : > { %v11611_v56 = vpop.f32.mrb[119].mxu1  ;;  %v17530_v51 = vpack.c.bf16 %v1080_v43, %v696_v42  ;;  %v695_v55 = vld [vmem:[%s18199_s12 + $0xb50] sm:$0xff]  ;;  %v1088_v28 = vld [vmem:[%s18199_s12 + $0x1798] sm:$0x3] }
 0x326   : > { %v11610_v62 = vadd.f32 %v11609_v50, %v11540_v54  ;;  %v2726_v50 = vcombine.high %v2724_v38, %v2724_v38  ;;  %v1077_v54 = vld [vmem:[%s18199_s12 + $0x1740] sm:$0x3]  ;;  %v1079_v56 = vld [vmem:[%s18199_s12 + $0x1750] sm:$0x3] }
 0x327   : > { %v17532_v6 = vpack.c.bf16 %v1079_v56, %v695_v55 }
 0x328   : > { %15318 = vmatmul.mubr.f32.vlgmr.msra.gmra.mrb[172].mxu0 %v2666_v23  ;;  %v2708_v23 = vcombine.high %v2700_v8, %v2700_v8 }
 0x329   : > { %15388 = vmatmul.mubr.f32.vlgmr.msra.gmra.mrb[172].mxu1 %v2673_v29  ;;  %17505 = vmatpush1.bf16.xpose.msra.mxu0 %v17504_v60  ;;  %v689_v29 = vld [vmem:[%s18199_s12 + $0xb20] sm:$0xff]  ;;  %v698_v60 = vld [vmem:[%s18199_s12 + $0xb68] sm:$0xff] }
 0x32a   : > { %17509 = vmatpush1.bf16.xpose.msra.mxu1 %v17508_v61  ;;  %15457 = vmatprep.mubr.f32.mxu0 %v2691_v63  ;;  %v17520_v45 = vpack.c.bf16 %v1073_v30, %v689_v29  ;;  %v1082_v61 = vld [vmem:[%s18199_s12 + $0x1768] sm:$0x3]  ;;  %v329_v29 = vld [vmem:[%s18193_s21 + $0x2e0] sm:$0xff] }
 0x32b   : > { %17511 = vmatprep.subr.bf16.mxu0 %v17510_v0  ;;  %v11679_v9 = vpop.f32.mrb[120].mxu0  ;;  %15527 = vmatprep.mubr.f32.mxu1 %v2692_v1  ;;  %v2761_v37 = vcombine.high %v329_v29, %v329_v29  ;;  %v2768_v42 = vrot.slane %v329_v29, %v18225_v25 }
 0x32c   : > { %v11749_v10 = vpop.f32.mrb[120].mxu1  ;;  %17515 = vmatprep.subr.bf16.mxu1 %v17514_v2  ;;  %v11680_v14 = vadd.f32 %v11679_v9, %v11610_v62  ;;  %v11681_v15 = vpop.f32.mrb[121].mxu0  ;;  %v2741_v62 = vrot.slane %v2727_v52, %v18225_v25  ;;  %v700_v2 = vld [vmem:[%s18199_s12 + $0xb78] sm:$0xff]  ;;  %v17534_v9 = vpack.c.bf16 %v1082_v61, %v698_v60 }
 0x32d   : > { %v11751_v16 = vpop.f32.mrb[121].mxu1  ;;  %v17538_v11 = vpack.c.bf16 %v1084_v3, %v700_v2  ;;  %v699_v15 = vld [vmem:[%s18199_s12 + $0xb70] sm:$0xff]  ;;  %v1092_v52 = vld [vmem:[%s18199_s12 + $0x17b8] sm:$0x3] }
 0x32e   : > { %v11750_v22 = vadd.f32 %v11749_v10, %v11680_v14  ;;  %v2743_v10 = vcombine.high %v2741_v62, %v2741_v62  ;;  %v1081_v14 = vld [vmem:[%s18199_s12 + $0x1760] sm:$0x3]  ;;  %v1083_v16 = vld [vmem:[%s18199_s12 + $0x1770] sm:$0x3] }
 0x32f   : > { %v17540_v31 = vpack.c.bf16 %v1083_v16, %v699_v15 }
 0x330   : > { %15458 = vmatmul.mubr.f32.vlgmr.msra.gmra.mrb[174].mxu0 %v2683_v48  ;;  %v2725_v48 = vcombine.high %v2717_v33, %v2717_v33 }
 0x331   : > { %15528 = vmatmul.mubr.f32.vlgmr.msra.gmra.mrb[174].mxu1 %v2690_v53  ;;  %17513 = vmatpush1.bf16.xpose.msra.mxu0 %v17512_v20  ;;  %v693_v53 = vld [vmem:[%s18199_s12 + $0xb40] sm:$0xff]  ;;  %v702_v20 = vld [vmem:[%s18199_s12 + $0xb88] sm:$0xff] }
 0x332   : > { %17517 = vmatpush1.bf16.xpose.msra.mxu1 %v17516_v21  ;;  %15597 = vmatprep.mubr.f32.mxu0 %v2708_v23  ;;  %v17528_v5 = vpack.c.bf16 %v1077_v54, %v693_v53  ;;  %v1086_v21 = vld [vmem:[%s18199_s12 + $0x1788] sm:$0x3] }
 0x333   : > { %17519 = vmatprep.subr.bf16.mxu0 %v17518_v24  ;;  %v11819_v34 = vpop.f32.mrb[122].mxu0  ;;  %15667 = vmatprep.mubr.f32.mxu1 %v2709_v26  ;;  %v330_v53 = vld [vmem:[%s18193_s21 + $0x2e8] sm:$0xff] }
 0x334   : > { %v11889_v35 = vpop.f32.mrb[122].mxu1  ;;  %17523 = vmatprep.subr.bf16.mxu1 %v17522_v27  ;;  %v11820_v39 = vadd.f32 %v11819_v34, %v11750_v22  ;;  %v11821_v40 = vpop.f32.mrb[123].mxu0  ;;  %v2758_v22 = vrot.slane %v2744_v12, %v18225_v25  ;;  %v704_v27 = vld [vmem:[%s18199_s12 + $0xb98] sm:$0xff]  ;;  %v17542_v34 = vpack.c.bf16 %v1086_v21, %v702_v20  ;;  %v2778_v61 = vcombine.high %v330_v53, %v330_v53 }
 0x335   : > { %v11891_v41 = vpop.f32.mrb[123].mxu1  ;;  %v17546_v36 = vpack.c.bf16 %v1088_v28, %v704_v27  ;;  %v703_v40 = vld [vmem:[%s18199_s12 + $0xb90] sm:$0xff]  ;;  %v2785_v2 = vrot.slane %v330_v53, %v18225_v25  ;;  %v1096_v12 = vld [vmem:[%s18199_s12 + $0x17d8] sm:$0x3] }
 0x336   : > { %v11890_v47 = vadd.f32 %v11889_v35, %v11820_v39  ;;  %v2760_v35 = vcombine.high %v2758_v22, %v2758_v22  ;;  %v1085_v39 = vld [vmem:[%s18199_s12 + $0x1780] sm:$0x3]  ;;  %v1087_v41 = vld [vmem:[%s18199_s12 + $0x1790] sm:$0x3] }
 0x337   : > { %v17548_v55 = vpack.c.bf16 %v1087_v41, %v703_v40 }
 0x338   : > { %15598 = vmatmul.mubr.f32.vlgmr.msra.gmra.mrb[176].mxu0 %v2700_v8  ;;  %v2742_v8 = vcombine.high %v2734_v57, %v2734_v57 }
 0x339   : > { %15668 = vmatmul.mubr.f32.vlgmr.msra.gmra.mrb[176].mxu1 %v2707_v13  ;;  %17521 = vmatpush1.bf16.xpose.msra.mxu0 %v17520_v45  ;;  %v697_v13 = vld [vmem:[%s18199_s12 + $0xb60] sm:$0xff]  ;;  %v706_v45 = vld [vmem:[%s18199_s12 + $0xba8] sm:$0xff] }
 0x33a   : > { %17525 = vmatpush1.bf16.xpose.msra.mxu1 %v17524_v46  ;;  %15737 = vmatprep.mubr.f32.mxu0 %v2725_v48  ;;  %v17536_v30 = vpack.c.bf16 %v1081_v14, %v697_v13  ;;  %v1090_v46 = vld [vmem:[%s18199_s12 + $0x17a8] sm:$0x3]  ;;  %v331_v13 = vld [vmem:[%s18193_s21 + $0x2f0] sm:$0xff] }
 0x33b   : > { %17527 = vmatprep.subr.bf16.mxu0 %v17526_v49  ;;  %v11959_v58 = vpop.f32.mrb[124].mxu0  ;;  %15807 = vmatprep.mubr.f32.mxu1 %v2726_v50  ;;  %v2795_v21 = vcombine.high %v331_v13, %v331_v13  ;;  %v2802_v27 = vrot.slane %v331_v13, %v18225_v25 }
 0x33c   : > { %v12029_v59 = vpop.f32.mrb[124].mxu1  ;;  %17531 = vmatprep.subr.bf16.mxu1 %v17530_v51  ;;  %v11960_v63 = vadd.f32 %v11959_v58, %v11890_v47  ;;  %v11961_v0 = vpop.f32.mrb[125].mxu0  ;;  %v2775_v47 = vrot.slane %v2761_v37, %v18225_v25  ;;  %v708_v51 = vld [vmem:[%s18199_s12 + $0xbb8] sm:$0xff]  ;;  %v17550_v58 = vpack.c.bf16 %v1090_v46, %v706_v45 }
 0x33d   : > { %v12031_v1 = vpop.f32.mrb[125].mxu1  ;;  %v17554_v60 = vpack.c.bf16 %v1092_v52, %v708_v51  ;;  %v707_v0 = vld [vmem:[%s18199_s12 + $0xbb0] sm:$0xff]  ;;  %v716_v37 = vld [vmem:[%s18199_s12 + $0xbf8] sm:$0xff] }
 0x33e   : > { %v12030_v7 = vadd.f32 %v12029_v59, %v11960_v63  ;;  %v2777_v59 = vcombine.high %v2775_v47, %v2775_v47  ;;  %v1089_v63 = vld [vmem:[%s18199_s12 + $0x17a0] sm:$0x3]  ;;  %v1091_v1 = vld [vmem:[%s18199_s12 + $0x17b0] sm:$0x3] }
 0x33f   : > { %v17556_v15 = vpack.c.bf16 %v1091_v1, %v707_v0 }
 0x340   : > { %15738 = vmatmul.mubr.f32.vlgmr.msra.gmra.mrb[178].mxu0 %v2717_v33  ;;  %v2759_v33 = vcombine.high %v2751_v17, %v2751_v17 }
 0x341   : > { %15808 = vmatmul.mubr.f32.vlgmr.msra.gmra.mrb[178].mxu1 %v2724_v38  ;;  %17529 = vmatpush1.bf16.xpose.msra.mxu0 %v17528_v5  ;;  %v701_v38 = vld [vmem:[%s18199_s12 + $0xb80] sm:$0xff]  ;;  %v710_v5 = vld [vmem:[%s18199_s12 + $0xbc8] sm:$0xff] }
 0x342   : > { %17533 = vmatpush1.bf16.xpose.msra.mxu1 %v17532_v6  ;;  %15877 = vmatprep.mubr.f32.mxu0 %v2742_v8  ;;  %v17544_v54 = vpack.c.bf16 %v1085_v39, %v701_v38  ;;  %v1094_v6 = vld [vmem:[%s18199_s12 + $0x17c8] sm:$0x3]  ;;  %v1100_v38 = vld [vmem:[%s18199_s12 + $0x17f8] sm:$0x3] }
 0x343   : > { %17535 = vmatprep.subr.bf16.mxu0 %v17534_v9  ;;  %v12099_v18 = vpop.f32.mrb[126].mxu0  ;;  %15947 = vmatprep.mubr.f32.mxu1 %v2743_v10  ;;  %v17570_v46 = vpack.c.bf16 %v1100_v38, %v716_v37 }
 0x344   : > { %v12169_v19 = vpop.f32.mrb[126].mxu1  ;;  %17539 = vmatprep.subr.bf16.mxu1 %v17538_v11  ;;  %v12100_v23 = vadd.f32 %v12099_v18, %v12030_v7  ;;  %v12101_v24 = vpop.f32.mrb[127].mxu0  ;;  %v2792_v7 = vrot.slane %v2778_v61, %v18225_v25  ;;  %v712_v11 = vld [vmem:[%s18199_s12 + $0xbd8] sm:$0xff]  ;;  %v17558_v18 = vpack.c.bf16 %v1094_v6, %v710_v5 }
 0x345   : > { %v12171_v26 = vpop.f32.mrb[127].mxu1  ;;  %v17562_v20 = vpack.c.bf16 %v1096_v12, %v712_v11  ;;  %v711_v24 = vld [vmem:[%s18199_s12 + $0xbd0] sm:$0xff] }
 0x346   : > { %v12170_v32 = vadd.f32 %v12169_v19, %v12100_v23  ;;  %v2794_v19 = vcombine.high %v2792_v7, %v2792_v7  ;;  %v1093_v23 = vld [vmem:[%s18199_s12 + $0x17c0] sm:$0x3]  ;;  %v1095_v26 = vld [vmem:[%s18199_s12 + $0x17d0] sm:$0x3] }
 0x347   : > { %v17564_v40 = vpack.c.bf16 %v1095_v26, %v711_v24 }
 0x348   : > { %15878 = vmatmul.mubr.f32.vlgmr.msra.gmra.mrb[180].mxu0 %v2734_v57  ;;  %v2776_v57 = vcombine.high %v2768_v42, %v2768_v42 }
 0x349   : > { %15948 = vmatmul.mubr.f32.vlgmr.msra.gmra.mrb[180].mxu1 %v2741_v62  ;;  %17537 = vmatpush1.bf16.xpose.msra.mxu0 %v17536_v30  ;;  %v705_v62 = vld [vmem:[%s18199_s12 + $0xba0] sm:$0xff]  ;;  %v714_v30 = vld [vmem:[%s18199_s12 + $0xbe8] sm:$0xff] }
 0x34a   : > { %17541 = vmatpush1.bf16.xpose.msra.mxu1 %v17540_v31  ;;  %16017 = vmatprep.mubr.f32.mxu0 %v2759_v33  ;;  %v17552_v14 = vpack.c.bf16 %v1089_v63, %v705_v62  ;;  %v1098_v31 = vld [vmem:[%s18199_s12 + $0x17e8] sm:$0x3]  ;;  %v332_v33 = vld [vmem:[%s18193_s21 + $0x2f8] sm:$0xff] }
 0x34b   : > { %17543 = vmatprep.subr.bf16.mxu0 %v17542_v34  ;;  %v12239_v43 = vpop.f32.mrb[128].mxu0  ;;  %16087 = vmatprep.mubr.f32.mxu1 %v2760_v35  ;;  %v2819_v51 = vrot.slane %v332_v33, %v18225_v25 }
 0x34c   : > { %v12309_v44 = vpop.f32.mrb[128].mxu1  ;;  %17547 = vmatprep.subr.bf16.mxu1 %v17546_v36  ;;  %v12240_v48 = vadd.f32 %v12239_v43, %v12170_v32  ;;  %v12241_v49 = vpop.f32.mrb[129].mxu0  ;;  %v2809_v32 = vrot.slane %v2795_v21, %v18225_v25  ;;  %v17566_v43 = vpack.c.bf16 %v1098_v31, %v714_v30 }
 0x34d   : > { %v12311_v50 = vpop.f32.mrb[129].mxu1  ;;  %v715_v49 = vld [vmem:[%s18199_s12 + $0xbf0] sm:$0xff]  ;;  %v2827_v61 = vcombine.high %v2819_v51, %v2819_v51 }
 0x34e   : > { %v12310_v56 = vadd.f32 %v12309_v44, %v12240_v48  ;;  %v2812_v44 = vcombine.high %v332_v33, %v332_v33  ;;  %v2811_v45 = vcombine.high %v2809_v32, %v2809_v32  ;;  %v1097_v48 = vld [vmem:[%s18199_s12 + $0x17e0] sm:$0x3]  ;;  %v1099_v50 = vld [vmem:[%s18199_s12 + $0x17f0] sm:$0x3] }
 0x350   : > { %16018 = vmatmul.mubr.f32.vlgmr.msra.gmra.mrb[182].mxu0 %v2751_v17  ;;  %v2793_v17 = vcombine.high %v2785_v2, %v2785_v2  ;;  %v2826_v52 = vrot.slane %v2812_v44, %v18225_v25 }
 0x351   : > { %16088 = vmatmul.mubr.f32.vlgmr.msra.gmra.mrb[182].mxu1 %v2758_v22  ;;  %17545 = vmatpush1.bf16.xpose.msra.mxu0 %v17544_v54  ;;  %v709_v22 = vld [vmem:[%s18199_s12 + $0xbc0] sm:$0xff] }
 0x352   : > { %17549 = vmatpush1.bf16.xpose.msra.mxu1 %v17548_v55  ;;  %16157 = vmatprep.mubr.f32.mxu0 %v2776_v57  ;;  %v17560_v39 = vpack.c.bf16 %v1093_v23, %v709_v22  ;;  %v2828_v62 = vcombine.high %v2826_v52, %v2826_v52 }
 0x353   : > { %17551 = vmatprep.subr.bf16.mxu0 %v17550_v58  ;;  %v12379_v3 = vpop.f32.mrb[130].mxu0  ;;  %16227 = vmatprep.mubr.f32.mxu1 %v2777_v59  ;;  %v17572_v59 = vpack.c.bf16 %v1099_v50, %v715_v49 }
 0x354   : > { %v12449_v4 = vpop.f32.mrb[130].mxu1  ;;  %17555 = vmatprep.subr.bf16.mxu1 %v17554_v60  ;;  %v12380_v8 = vadd.f32 %v12379_v3, %v12310_v56  ;;  %v12381_v9 = vpop.f32.mrb[131].mxu0 }
 0x355   : > { %v12451_v10 = vpop.f32.mrb[131].mxu1 }
 0x356   : > { %v12450_v16 = vadd.f32 %v12449_v4, %v12380_v8 }
 0x358   : > { %16158 = vmatmul.mubr.f32.vlgmr.msra.gmra.mrb[184].mxu0 %v2768_v42  ;;  %v2810_v42 = vcombine.high %v2802_v27, %v2802_v27 }
 0x359   : > { %16228 = vmatmul.mubr.f32.vlgmr.msra.gmra.mrb[184].mxu1 %v2775_v47  ;;  %17553 = vmatpush1.bf16.xpose.msra.mxu0 %v17552_v14  ;;  %v713_v47 = vld [vmem:[%s18199_s12 + $0xbe0] sm:$0xff] }
 0x35a   : > { %17557 = vmatpush1.bf16.xpose.msra.mxu1 %v17556_v15  ;;  %16297 = vmatprep.mubr.f32.mxu0 %v2793_v17  ;;  %v17568_v58 = vpack.c.bf16 %v1097_v48, %v713_v47 }
 0x35b   : > { %17559 = vmatprep.subr.bf16.mxu0 %v17558_v18  ;;  %v12519_v28 = vpop.f32.mrb[132].mxu0  ;;  %16367 = vmatprep.mubr.f32.mxu1 %v2794_v19 }
 0x35c   : > { %v12589_v29 = vpop.f32.mrb[132].mxu1  ;;  %17563 = vmatprep.subr.bf16.mxu1 %v17562_v20  ;;  %v12520_v34 = vadd.f32 %v12519_v28, %v12450_v16  ;;  %v12521_v35 = vpop.f32.mrb[133].mxu0 }
 0x35d   : > { %v12591_v36 = vpop.f32.mrb[133].mxu1 }
 0x35e   : > { %v12590_v41 = vadd.f32 %v12589_v29, %v12520_v34 }
 0x360   : > { %16298 = vmatmul.mubr.f32.vlgmr.msra.gmra.mrb[186].mxu0 %v2785_v2 }
 0x361   : > { %16368 = vmatmul.mubr.f32.vlgmr.msra.gmra.mrb[186].mxu1 %v2792_v7  ;;  %17561 = vmatpush1.bf16.xpose.msra.mxu0 %v17560_v39 }
 0x362   : > { %17565 = vmatpush1.bf16.xpose.msra.mxu1 %v17564_v40  ;;  %16437 = vmatprep.mubr.f32.mxu0 %v2810_v42 }
 0x363   : > { %17567 = vmatprep.subr.bf16.mxu0 %v17566_v43  ;;  %v12659_v53 = vpop.f32.mrb[134].mxu0  ;;  %16507 = vmatprep.mubr.f32.mxu1 %v2811_v45 }
 0x364   : > { %v12729_v54 = vpop.f32.mrb[134].mxu1  ;;  %17571 = vmatprep.subr.bf16.mxu1 %v17570_v46  ;;  %v12660_v55 = vadd.f32 %v12659_v53, %v12590_v41  ;;  %v12661_v56 = vpop.f32.mrb[135].mxu0 }
 0x365   : > { %v12731_v57 = vpop.f32.mrb[135].mxu1 }
 0x366   : > { %v12730_v60 = vadd.f32 %v12729_v54, %v12660_v55 }
 0x368   : > { %16438 = vmatmul.mubr.f32.vlgmr.msra.gmra.mrb[188].mxu0 %v2802_v27 }
 0x369   : > { %16508 = vmatmul.mubr.f32.vlgmr.msra.gmra.mrb[188].mxu1 %v2809_v32  ;;  %17569 = vmatpush1.bf16.xpose.msra.mxu0 %v17568_v58 }
 0x36a   : > { %17573 = vmatpush1.bf16.xpose.msra.mxu1 %v17572_v59  ;;  %16577 = vmatprep.mubr.f32.mxu0 %v2827_v61 }
 0x36b   : > { %16647 = vmatprep.mubr.f32.mxu1 %v2828_v62  ;;  %v12799_v63 = vpop.f32.mrb[136].mxu0 }
 0x36c   : > { %v12869_v25 = vpop.f32.mrb[136].mxu1  ;;  %v12800_v0 = vadd.f32 %v12799_v63, %v12730_v60  ;;  %v12801_v1 = vpop.f32.mrb[137].mxu0 }
 0x36d   : > { %v12871_v2 = vpop.f32.mrb[137].mxu1 }
 0x36e   : > { %v12870_v3 = vadd.f32 %v12869_v25, %v12800_v0 }
 0x370   : > { %16578 = vmatmul.mubr.f32.vlgmr.msra.gmra.mrb[190].mxu0 %v2819_v51 }
 0x371   : > { %16648 = vmatmul.mubr.f32.vlgmr.msra.gmra.mrb[190].mxu1 %v2826_v52 }
 0x373   : > { %v12939_v4 = vpop.f32.mrb[138].mxu0 }
 0x374   : > { %v13009_v5 = vpop.f32.mrb[138].mxu1  ;;  %v12940_v6 = vadd.f32 %v12939_v4, %v12870_v3  ;;  %v12941_v7 = vpop.f32.mrb[139].mxu0 }
 0x375   : > { %v13011_v8 = vpop.f32.mrb[139].mxu1 }
 0x376   : > { %v13010_v9 = vadd.f32 %v13009_v5, %v12940_v6 }
 0x37b   : > { %v13079_v10 = vpop.f32.mrb[140].mxu0 }
 0x37c   : > { %v13149_v11 = vpop.f32.mrb[140].mxu1  ;;  %v13080_v12 = vadd.f32 %v13079_v10, %v13010_v9  ;;  %v13081_v13 = vpop.f32.mrb[141].mxu0 }
 0x37d   : > { %v13151_v14 = vpop.f32.mrb[141].mxu1 }
 0x37e   : > { %v13150_v15 = vadd.f32 %v13149_v11, %v13080_v12 }
 0x383   : > { %v13219_v16 = vpop.f32.mrb[142].mxu0 }
 0x384   : > { %v13289_v17 = vpop.f32.mrb[142].mxu1  ;;  %v13220_v18 = vadd.f32 %v13219_v16, %v13150_v15  ;;  %v13221_v19 = vpop.f32.mrb[143].mxu0 }
 0x385   : > { %v13291_v20 = vpop.f32.mrb[143].mxu1 }
 0x386   : > { %v13290_v21 = vadd.f32 %v13289_v17, %v13220_v18 }
 0x38b   : > { %v13359_v22 = vpop.f32.mrb[144].mxu0 }
 0x38c   : > { %v13429_v23 = vpop.f32.mrb[144].mxu1  ;;  %v13360_v24 = vadd.f32 %v13359_v22, %v13290_v21  ;;  %v13361_v26 = vpop.f32.mrb[145].mxu0 }
 0x38d   : > { %v13431_v27 = vpop.f32.mrb[145].mxu1 }
 0x38e   : > { %v13430_v28 = vadd.f32 %v13429_v23, %v13360_v24 }
 0x393   : > { %v13499_v29 = vpop.f32.mrb[146].mxu0 }
 0x394   : > { %v13569_v30 = vpop.f32.mrb[146].mxu1  ;;  %v13500_v31 = vadd.f32 %v13499_v29, %v13430_v28  ;;  %v13501_v32 = vpop.f32.mrb[147].mxu0 }
 0x395   : > { %v13571_v33 = vpop.f32.mrb[147].mxu1 }
 0x396   : > { %v13570_v34 = vadd.f32 %v13569_v30, %v13500_v31 }
 0x39b   : > { %v13639_v35 = vpop.f32.mrb[148].mxu0 }
 0x39c   : > { %v13709_v36 = vpop.f32.mrb[148].mxu1  ;;  %v13640_v37 = vadd.f32 %v13639_v35, %v13570_v34  ;;  %v13641_v38 = vpop.f32.mrb[149].mxu0 }
 0x39d   : > { %v13711_v39 = vpop.f32.mrb[149].mxu1 }
 0x39e   : > { %v13710_v40 = vadd.f32 %v13709_v36, %v13640_v37 }
 0x3a3   : > { %v13779_v41 = vpop.f32.mrb[150].mxu0 }
 0x3a4   : > { %v13849_v42 = vpop.f32.mrb[150].mxu1  ;;  %v13780_v43 = vadd.f32 %v13779_v41, %v13710_v40  ;;  %v13781_v44 = vpop.f32.mrb[151].mxu0 }
 0x3a5   : > { %v13851_v45 = vpop.f32.mrb[151].mxu1 }
 0x3a6   : > { %v13850_v46 = vadd.f32 %v13849_v42, %v13780_v43 }
 0x3ab   : > { %v13919_v47 = vpop.f32.mrb[152].mxu0 }
 0x3ac   : > { %v13989_v48 = vpop.f32.mrb[152].mxu1  ;;  %v13920_v49 = vadd.f32 %v13919_v47, %v13850_v46  ;;  %v13921_v50 = vpop.f32.mrb[153].mxu0 }
 0x3ad   : > { %v13991_v51 = vpop.f32.mrb[153].mxu1 }
 0x3ae   : > { %v13990_v52 = vadd.f32 %v13989_v48, %v13920_v49 }
 0x3b3   : > { %v14059_v53 = vpop.f32.mrb[154].mxu0 }
 0x3b4   : > { %v14129_v54 = vpop.f32.mrb[154].mxu1  ;;  %v14060_v55 = vadd.f32 %v14059_v53, %v13990_v52  ;;  %v14061_v56 = vpop.f32.mrb[155].mxu0 }
 0x3b5   : > { %v14131_v57 = vpop.f32.mrb[155].mxu1 }
 0x3b6   : > { %v14130_v58 = vadd.f32 %v14129_v54, %v14060_v55 }
 0x3bb   : > { %v14199_v59 = vpop.f32.mrb[156].mxu0 }
 0x3bc   : > { %v14269_v60 = vpop.f32.mrb[156].mxu1  ;;  %v14200_v61 = vadd.f32 %v14199_v59, %v14130_v58  ;;  %v14201_v62 = vpop.f32.mrb[157].mxu0 }
 0x3bd   : > { %v14271_v63 = vpop.f32.mrb[157].mxu1 }
 0x3be   : > { %v14270_v25 = vadd.f32 %v14269_v60, %v14200_v61 }
 0x3c3   : > { %v14339_v0 = vpop.f32.mrb[158].mxu0 }
 0x3c4   : > { %v14409_v1 = vpop.f32.mrb[158].mxu1  ;;  %v14340_v2 = vadd.f32 %v14339_v0, %v14270_v25  ;;  %v14341_v3 = vpop.f32.mrb[159].mxu0 }
 0x3c5   : > { %v14411_v4 = vpop.f32.mrb[159].mxu1 }
 0x3c6   : > { %v14410_v5 = vadd.f32 %v14409_v1, %v14340_v2 }
 0x3cb   : > { %v14479_v6 = vpop.f32.mrb[160].mxu0 }
 0x3cc   : > { %v14549_v7 = vpop.f32.mrb[160].mxu1  ;;  %v14480_v8 = vadd.f32 %v14479_v6, %v14410_v5  ;;  %v14481_v9 = vpop.f32.mrb[161].mxu0 }
 0x3cd   : > { %v14551_v10 = vpop.f32.mrb[161].mxu1 }
 0x3ce   : > { %v14550_v11 = vadd.f32 %v14549_v7, %v14480_v8 }
 0x3d3   : > { %v14619_v12 = vpop.f32.mrb[162].mxu0 }
 0x3d4   : > { %v14689_v13 = vpop.f32.mrb[162].mxu1  ;;  %v14620_v14 = vadd.f32 %v14619_v12, %v14550_v11  ;;  %v14621_v15 = vpop.f32.mrb[163].mxu0 }
 0x3d5   : > { %v14691_v16 = vpop.f32.mrb[163].mxu1 }
 0x3d6   : > { %v14690_v17 = vadd.f32 %v14689_v13, %v14620_v14 }
 0x3db   : > { %v14759_v18 = vpop.f32.mrb[164].mxu0 }
 0x3dc   : > { %v14829_v19 = vpop.f32.mrb[164].mxu1  ;;  %v14760_v20 = vadd.f32 %v14759_v18, %v14690_v17  ;;  %v14761_v21 = vpop.f32.mrb[165].mxu0 }
 0x3dd   : > { %v14831_v22 = vpop.f32.mrb[165].mxu1 }
 0x3de   : > { %v14830_v23 = vadd.f32 %v14829_v19, %v14760_v20 }
 0x3e3   : > { %v14899_v24 = vpop.f32.mrb[166].mxu0 }
 0x3e4   : > { %v14969_v26 = vpop.f32.mrb[166].mxu1  ;;  %v14900_v27 = vadd.f32 %v14899_v24, %v14830_v23  ;;  %v14901_v28 = vpop.f32.mrb[167].mxu0 }
 0x3e5   : > { %v14971_v29 = vpop.f32.mrb[167].mxu1 }
 0x3e6   : > { %v14970_v30 = vadd.f32 %v14969_v26, %v14900_v27 }
 0x3eb   : > { %v15039_v31 = vpop.f32.mrb[168].mxu0 }
 0x3ec   : > { %v15109_v32 = vpop.f32.mrb[168].mxu1  ;;  %v15040_v33 = vadd.f32 %v15039_v31, %v14970_v30  ;;  %v15041_v34 = vpop.f32.mrb[169].mxu0 }
 0x3ed   : > { %v15111_v35 = vpop.f32.mrb[169].mxu1 }
 0x3ee   : > { %v15110_v36 = vadd.f32 %v15109_v32, %v15040_v33 }
 0x3f3   : > { %v15179_v37 = vpop.f32.mrb[170].mxu0 }
 0x3f4   : > { %v15249_v38 = vpop.f32.mrb[170].mxu1  ;;  %v15180_v39 = vadd.f32 %v15179_v37, %v15110_v36  ;;  %v15181_v40 = vpop.f32.mrb[171].mxu0 }
 0x3f5   : > { %v15251_v41 = vpop.f32.mrb[171].mxu1 }
 0x3f6   : > { %v15250_v42 = vadd.f32 %v15249_v38, %v15180_v39  ;;  %v236_v38 = vld [vmem:[#allocation2] sm:$0x3] }
 0x3fb   : > { %v15319_v43 = vpop.f32.mrb[172].mxu0 }
 0x3fc   : > { %v15389_v44 = vpop.f32.mrb[172].mxu1  ;;  %v15320_v45 = vadd.f32 %v15319_v43, %v15250_v42  ;;  %v15321_v46 = vpop.f32.mrb[173].mxu0 }
 0x3fd   : > { %v15391_v47 = vpop.f32.mrb[173].mxu1 }
 0x3fe   : > { %v15390_v48 = vadd.f32 %v15389_v44, %v15320_v45 }
 0x403   : > { %v15459_v49 = vpop.f32.mrb[174].mxu0 }
 0x404   : > { %v15529_v50 = vpop.f32.mrb[174].mxu1  ;;  %v15460_v51 = vadd.f32 %v15459_v49, %v15390_v48  ;;  %v15461_v52 = vpop.f32.mrb[175].mxu0 }
 0x405   : > { %v15531_v53 = vpop.f32.mrb[175].mxu1 }
 0x406   : > { %v15530_v54 = vadd.f32 %v15529_v50, %v15460_v51 }
 0x40b   : > { %v15599_v55 = vpop.f32.mrb[176].mxu0 }
 0x40c   : > { %v15669_v56 = vpop.f32.mrb[176].mxu1  ;;  %v15600_v57 = vadd.f32 %v15599_v55, %v15530_v54  ;;  %v15601_v58 = vpop.f32.mrb[177].mxu0 }
 0x40d   : > { %v15671_v59 = vpop.f32.mrb[177].mxu1 }
 0x40e   : > { %v15670_v60 = vadd.f32 %v15669_v56, %v15600_v57 }
 0x413   : > { %v15739_v61 = vpop.f32.mrb[178].mxu0 }
 0x414   : > { %v15809_v62 = vpop.f32.mrb[178].mxu1  ;;  %v15740_v63 = vadd.f32 %v15739_v61, %v15670_v60  ;;  %v15741_v25 = vpop.f32.mrb[179].mxu0 }
 0x415   : > { %v15811_v0 = vpop.f32.mrb[179].mxu1 }
 0x416   : > { %v15810_v1 = vadd.f32 %v15809_v62, %v15740_v63 }
 0x41b   : > { %v15879_v2 = vpop.f32.mrb[180].mxu0 }
 0x41c   : > { %v15949_v3 = vpop.f32.mrb[180].mxu1  ;;  %v15880_v4 = vadd.f32 %v15879_v2, %v15810_v1  ;;  %v15881_v5 = vpop.f32.mrb[181].mxu0 }
 0x41d   : > { %v15951_v6 = vpop.f32.mrb[181].mxu1 }
 0x41e   : > { %v15950_v7 = vadd.f32 %v15949_v3, %v15880_v4 }
 0x423   : > { %v16019_v8 = vpop.f32.mrb[182].mxu0 }
 0x424   : > { %v16089_v9 = vpop.f32.mrb[182].mxu1  ;;  %v16020_v10 = vadd.f32 %v16019_v8, %v15950_v7  ;;  %v16021_v11 = vpop.f32.mrb[183].mxu0 }
 0x425   : > { %v16091_v12 = vpop.f32.mrb[183].mxu1 }
 0x426   : > { %v16090_v13 = vadd.f32 %v16089_v9, %v16020_v10 }
 0x42b   : > { %v16159_v14 = vpop.f32.mrb[184].mxu0 }
 0x42c   : > { %v16229_v15 = vpop.f32.mrb[184].mxu1  ;;  %v16160_v16 = vadd.f32 %v16159_v14, %v16090_v13  ;;  %v16161_v17 = vpop.f32.mrb[185].mxu0 }
 0x42d   : > { %v16231_v18 = vpop.f32.mrb[185].mxu1 }
 0x42e   : > { %v16230_v19 = vadd.f32 %v16229_v15, %v16160_v16 }
 0x433   : > { %v16299_v20 = vpop.f32.mrb[186].mxu0 }
 0x434   : > { %v16369_v21 = vpop.f32.mrb[186].mxu1  ;;  %v16300_v22 = vadd.f32 %v16299_v20, %v16230_v19  ;;  %v16301_v23 = vpop.f32.mrb[187].mxu0 }
 0x435   : > { %v16371_v24 = vpop.f32.mrb[187].mxu1 }
 0x436   : > { %v16370_v26 = vadd.f32 %v16369_v21, %v16300_v22 }
 0x43b   : > { %v16439_v27 = vpop.f32.mrb[188].mxu0 }
 0x43c   : > { %v16509_v28 = vpop.f32.mrb[188].mxu1  ;;  %v16440_v29 = vadd.f32 %v16439_v27, %v16370_v26  ;;  %v16441_v30 = vpop.f32.mrb[189].mxu0 }
 0x43d   : > { %v16511_v31 = vpop.f32.mrb[189].mxu1 }
 0x43e   : > { %v16510_v32 = vadd.f32 %v16509_v28, %v16440_v29 }
 0x443   : > { %v16579_v33 = vpop.f32.mrb[190].mxu0 }
 0x444   : > { %v16649_v34 = vpop.f32.mrb[190].mxu1  ;;  %v16580_v35 = vadd.f32 %v16579_v33, %v16510_v32  ;;  %v16581_v36 = vpop.f32.mrb[191].mxu0  ;;  %16659 = sbr.rel (%p16799_p5) target bundleno = 1107 (0x453), region = 44 }
 0x445   : > { %v16651_v37 = vpop.f32.mrb[191].mxu1 }
 0x446   : > { %v16650_v39 = vadd.f32 %v16649_v34, %v16580_v35 }
 0x448   : > { %v16653_v40 = vadd.f32 %v16650_v39, %v236_v38 }
 0x44a   : > { %16655 = vst.msk [vmem:[#allocation2] sm:$0x3] %vm16654_vm1, %v16653_v40 }
 0x451   : > { %v16660_v41 = vld [vmem:[#allocation2] sm:$0x3] }
 0x452   : > { %16661 = vst.msk [vmem:[%s223_s29] sm:$0x3] %vm16654_vm1, %v16660_v41 }
 0x453 PF: > { %s16801_s28 = sshll.u32 %s17960_s16, 5  ;;  %s16676_s5 = sshll.u32 %s223_s29, 4  ;;  %s16677_s5 = int_to_ptr.vmem [resolvable:$true] %s16676_s5 }
 0x454   : > { %s19277_s25 = scalar_lea.hbm %s19339_s2, %s16801_s28  ;;  %s16663_s15 = scalar_lea.sflag [#allocation5], %s221_s30 }
 0x455   : > { %s17846_s17 = scalar_lea.vmem %s16677_s5, 32  ;;  %p19357_p1 = scmp.ne.s32.totalorder %s19352_s8, 0 }
 0x456   : > { %p17847_p12 = scmp.ne.s32.totalorder %s16677_s5, %s17846_s17  ;;  %s17981_s18 = smov [#allocation8]  }
 0x457   : > { %s17850_s27 = sshll.u32 %s17981_s18, 4  ;;  %s17851_s27 = int_to_ptr.vmem [resolvable:$false] %s17850_s27 }
 0x458   : > { %p17848_p10 = pnand %p17847_p12, %p19357_p1  ;;  %s17852_s22 = scalar_lea.vmem %s17851_s27, 64 }
 0x459   : > { %p17853_p8 = scmp.lt.s32.totalorder %s16677_s5, %s17851_s27  ;;  %p17854_p13 = scmp.lt.s32.totalorder %s17852_s22, %s17846_s17 }
 0x45a   : > { %p17849_p11 = pneg %p17848_p10 }
 0x45b   : > { %p17855_p2 = por %p17854_p13, %p17853_p8 }
 0x45d   : > { %p17856_p0 = pnand %p17855_p2, %p17849_p11 }
 0x45f   : > { %17859 = shalt.err (!%p17856_p0)
}
 0x460   : > { %s17860_s16 = scalar_lea.hbm %s19277_s25, 32  ;;  %s17864_s26 = scalar_lea.hbm %s19339_s2, 64 }
 0x461   : > { %p17861_p4 = scmp.ne.s32.totalorder %s19277_s25, %s17860_s16  ;;  %p17865_p7 = scmp.lt.u32.totalorder %s19277_s25, %s19339_s2 }
 0x462   : > { %p17866_p3 = scmp.lt.u32.totalorder %s17864_s26, %s17860_s16  ;;  %p17868_p12 = scmp.lt.u32.totalorder %s17860_s16, %s19277_s25 }
 0x463   : > { %p17862_p6 = pnand %p17861_p4, %p19357_p1 }
 0x464   : > { %p17867_p5 = por %p17866_p3, %p17865_p7 }
 0x465   : > { %p17863_p9 = pneg %p17862_p6 }
 0x466   : > { %p17869_p10 = por %p17868_p12, %p17867_p5 }
 0x468   : > { %p17870_p11 = pnand %p17869_p10, %p17863_p9 }
 0x46a   : > { %17873 = shalt.err (!%p17870_p11)
}
 0x46b   : > { %17582 = dma.vmem_to_hbm [thread:$0]  (%p19357_p1), %s16677_s5, 32, %s19277_s25, %s16663_s15  }
 0x46c PF: > { %p17596_p8 = scmp.ge.s32.totalorder %s17972_s19, 2  ;;  %s16688_s4 = sand.u32 1, %s17932_s9  }
 0x46d   : > { %p19358_p13 = scmp.ne.s32.totalorder %s19353_s24, 0  ;;  %s16689_s29 = scalar_lea.sflag [#allocation5], %s16688_s4 }
 0x46f   : > { %p17592_p2 = pnand %p17596_p8, %p19358_p13 }
 0x471   : > { %17927 = dma.done.wait (!%p17592_p2), %s16689_s29, 32  }
 0x472   : > { %17929 = vsyncadd (!%p17592_p2), %s16689_s29, 4294967264  ;;  %s21_s19 = sadd.s32 1, %s17972_s19   ;;  %s19359_s15 = sld [smem:[#allocation12_spill]] }
 0x473   : > { %p18_p0 = scmp.ge.s32.totalorder %s21_s19, 6   ;;  %s19360_s16 = sld [smem:[#allocation13_spill]] }
 0x474   : > { %s19361_s17 = sld [smem:[#allocation14_spill]]  ;;  %s19362_s18 = sld [smem:[#allocation15_spill]] }
 0x475   : > { %s19363_s9 = smov %s17936_s10  ;;  %s19364_s10 = smov %s17940_s11 }
 0x476   : > { %s19365_s11 = smov %s18085_s6  ;;  %s19366_s12 = smov %s17948_s13 }
 0x477   : > { %s19367_s13 = smov %s17952_s14  ;;  %s19368_s14 = smov %s18088_s7 }
 0x478   :  { %20 = sbr.rel (!%p18_p0) target bundleno = 11 (0xb), region = 94 }
 0x47f   :  { %16694 = vsyncpa [#allocation4], 1 }
 0x480   :  { %16696 = vsyncpa [#allocation4 + $0x1], 1 }
 0x481   :  { %16697 = vsyncpa [#allocation7], 1 }
 0x482   :  { %16699 = vsyncpa [#allocation7 + $0x1], 1 }
 0x483   :  { %16700 = vsyncpa [#allocation5], 1 }
 0x484   :  { %16702 = vsyncpa [#allocation5 + $0x1], 1 }

</bundles_post_ra>
